<compile_context>
chip_gen: v6e
topology: v6e:2x2x1
jax: 0.10.0
libtpu: 0.0.40
codegen_flags: <defaults>
</compile_context>

<pallas_src>
from functools import partial

import jax
import jax.numpy as jnp
from jax import lax
from jax.experimental import pallas as pl
from jax.experimental.pallas import tpu as pltpu

LANE = 128


def _round_up(x, m):
    return (x + m - 1) // m * m


# ----------------------------------------------------------------------------
# Pallas kernels
# ----------------------------------------------------------------------------
def dcn_proj_kernel(x_ref, win_ref, bin_ref, dww_ref, dwb_ref, lng_ref, lnb_ref,
                    wom_ref, bom_ref, v_ref, om_ref, *, eps):
    """Fused: value projection + (dw 1x1 conv -> LayerNorm -> GELU) -> offset|mask proj."""
    x = x_ref[...].astype(jnp.float32)                              # (tm, C)
    # value path (output channel-padded to 128 lanes -> lane-dense store)
    v = jnp.dot(x.astype(jnp.bfloat16), win_ref[...],
                preferred_element_type=jnp.float32) + bin_ref[...]
    v_ref[...] = v.astype(v_ref.dtype)
    # offset / mask path
    t = x * dww_ref[...] + dwb_ref[...]                             # depthwise 1x1 conv
    mean = jnp.mean(t, axis=-1, keepdims=True)
    d = t - mean
    var = jnp.mean(d * d, axis=-1, keepdims=True)
    y = d * lax.rsqrt(var + eps) * lng_ref[...] + lnb_ref[...]      # LayerNorm(C)
    y = 0.5 * y * (1.0 + lax.erf(y * 0.7071067811865475))           # exact GELU
    om = jnp.dot(y.astype(jnp.bfloat16), wom_ref[...],
                 preferred_element_type=jnp.float32) + bom_ref[...]
    om_ref[...] = om.astype(om_ref.dtype)


def dcn_sample_outproj_kernel(idx_ref, wts_ref, x_ref, wout_ref, bout_ref,
                              o_ref, gather_ref, *, num_corners):
    """Deformable bilinear sampling (SMEM-indexed gather) fused with output_proj.

    idx_ref/wts_ref : (N, HWout*K) scalar-prefetched into SMEM
    x_ref           : (HWpad, Cp) padded value tensor of the current sample (VMEM)
    gather_ref      : (HWout, Cp) f32 VMEM scratch holding the gathered values
    """
    n = pl.program_id(0)
    hw_out = gather_ref.shape[0]

    def body(i, carry):
        base = i * num_corners
        acc = wts_ref[n, base] * x_ref[pl.ds(idx_ref[n, base], 1), :]
        for c in range(1, num_corners):
            acc = acc + wts_ref[n, base + c] * x_ref[pl.ds(idx_ref[n, base + c], 1), :]
        gather_ref[pl.ds(i, 1), :] = acc
        return carry

    lax.fori_loop(0, hw_out, body, 0)
    o_ref[...] = (jnp.dot(gather_ref[...].astype(jnp.bfloat16), wout_ref[...],
                          preferred_element_type=jnp.float32)
                  + bout_ref[...]).astype(o_ref.dtype)


def groupnorm_silu_kernel(x_ref, gmat_ref, gmatt_ref, g_ref, b_ref, o_ref, *,
                          inv_count, eps, silu):
    """GroupNorm over one (HW, Cp) sample (+ optional SiLU); padded channels stay 0."""
    x = x_ref[...].astype(jnp.float32)                              # (HW, Cp)
    col_sum = jnp.sum(x, axis=0, keepdims=True)                     # (1, Cp)
    mean_g = jnp.dot(col_sum, gmat_ref[...],
                     preferred_element_type=jnp.float32) * inv_count
    mean_c = jnp.dot(mean_g, gmatt_ref[...], preferred_element_type=jnp.float32)
    d = x - mean_c
    var_g = jnp.dot(jnp.sum(d * d, axis=0, keepdims=True), gmat_ref[...],
                    preferred_element_type=jnp.float32) * inv_count
    var_c = jnp.dot(var_g, gmatt_ref[...], preferred_element_type=jnp.float32)
    y = d * lax.rsqrt(var_c + eps) * g_ref[...] + b_ref[...]
    if silu:
        y = y * jax.nn.sigmoid(y)
    o_ref[...] = y.astype(o_ref.dtype)


def conv3x3_s1_kernel(xp_ref, w_ref, b_ref, o_ref, *, ho, wo):
    """3x3 stride-1 conv; im2col formed in-kernel from a padded VMEM tile."""
    x = xp_ref[...].astype(jnp.float32)                             # (ho+2, wo+2, Cp)
    cp = x.shape[-1]
    acc = jnp.zeros((ho * wo, w_ref.shape[-1]), jnp.float32)
    for kh in range(3):
        for kw in range(3):
            slab = x[kh:kh + ho, kw:kw + wo, :].reshape(ho * wo, cp)
            acc = acc + jnp.dot(slab.astype(jnp.bfloat16), w_ref[kh * 3 + kw],
                                preferred_element_type=jnp.float32)
    o_ref[...] = (acc + b_ref[...]).astype(o_ref.dtype)


def conv3x3_s2_kernel(x00_ref, x01_ref, x10_ref, x11_ref, w_ref, b_ref, o_ref,
                      *, ho, wo):
    """3x3 stride-2 conv; stride handled by an even/odd parity split of the input."""
    parts = ((x00_ref[...].astype(jnp.float32), x01_ref[...].astype(jnp.float32)),
             (x10_ref[...].astype(jnp.float32), x11_ref[...].astype(jnp.float32)))
    cp = parts[0][0].shape[-1]
    acc = jnp.zeros((ho * wo, w_ref.shape[-1]), jnp.float32)
    for kh in range(3):
        for kw in range(3):
            xpar = parts[kh % 2][kw % 2]
            r0, c0 = kh // 2, kw // 2
            slab = xpar[r0:r0 + ho, c0:c0 + wo, :].reshape(ho * wo, cp)
            acc = acc + jnp.dot(slab.astype(jnp.bfloat16), w_ref[kh * 3 + kw],
                                preferred_element_type=jnp.float32)
    o_ref[...] = (acc + b_ref[...]).astype(o_ref.dtype)


# ----------------------------------------------------------------------------
# Pallas wrappers
# ----------------------------------------------------------------------------
def pallas_dcn_proj(xf, win, bin_p, dww, dwb, lng, lnb, wom, bom, eps=1e-5):
    M, C = xf.shape
    Cp = win.shape[1]
    OMp = wom.shape[1]
    tm = 256 if M >= 256 else _round_up(M, 8)
    Mp = _round_up(M, tm)
    if Mp != M:
        xf = jnp.pad(xf, ((0, Mp - M), (0, 0)))
    v, om = pl.pallas_call(
        partial(dcn_proj_kernel, eps=eps),
        out_shape=(jax.ShapeDtypeStruct((Mp, Cp), jnp.float32),
                   jax.ShapeDtypeStruct((Mp, OMp), jnp.float32)),
        grid=(Mp // tm,),
        in_specs=[pl.BlockSpec((tm, C), lambda i: (i, 0)),
                  pl.BlockSpec((C, Cp), lambda i: (0, 0)),
                  pl.BlockSpec((1, Cp), lambda i: (0, 0)),
                  pl.BlockSpec((1, C), lambda i: (0, 0)),
                  pl.BlockSpec((1, C), lambda i: (0, 0)),
                  pl.BlockSpec((1, C), lambda i: (0, 0)),
                  pl.BlockSpec((1, C), lambda i: (0, 0)),
                  pl.BlockSpec((C, OMp), lambda i: (0, 0)),
                  pl.BlockSpec((1, OMp), lambda i: (0, 0))],
        out_specs=(pl.BlockSpec((tm, Cp), lambda i: (i, 0)),
                   pl.BlockSpec((tm, OMp), lambda i: (i, 0))),
        compiler_params=pltpu.CompilerParams(dimension_semantics=("parallel",)),
    )(xf, win, bin_p, dww, dwb, lng, lnb, wom, bom)
    return v[:M], om[:M]


def pallas_dcn_sample_outproj(v_flat, idx, wts, w_out, b_out):
    N, HWp, Cp = v_flat.shape
    _, HWout, K = idx.shape
    idx_f = idx.reshape(N, HWout * K).astype(jnp.int32)
    wts_f = wts.reshape(N, HWout * K).astype(jnp.float32)
    grid_spec = pltpu.PrefetchScalarGridSpec(
        num_scalar_prefetch=2,
        grid=(N,),
        in_specs=[pl.BlockSpec((None, HWp, Cp), lambda n, i_r, w_r: (n, 0, 0)),
                  pl.BlockSpec((Cp, Cp), lambda n, i_r, w_r: (0, 0)),
                  pl.BlockSpec((1, Cp), lambda n, i_r, w_r: (0, 0))],
        out_specs=pl.BlockSpec((None, HWout, Cp), lambda n, i_r, w_r: (n, 0, 0)),
        scratch_shapes=[pltpu.VMEM((HWout, Cp), jnp.float32)],
    )
    return pl.pallas_call(
        partial(dcn_sample_outproj_kernel, num_corners=K),
        out_shape=jax.ShapeDtypeStruct((N, HWout, Cp), jnp.float32),
        grid_spec=grid_spec,
        compiler_params=pltpu.CompilerParams(dimension_semantics=("parallel",)),
    )(idx_f, wts_f, v_flat, w_out, b_out)


def pallas_groupnorm_silu(x_nlc, gamma_p, beta_p, gmat, gmatt, cg_real, silu,
                          out_dtype, eps=1e-5):
    N, HW, Cp = x_nlc.shape
    G = gmat.shape[1]
    inv_count = 1.0 / float(HW * cg_real)
    # TODO(synk): for large H*W, tile the HW axis with a two-pass stats reduction.
    return pl.pallas_call(
        partial(groupnorm_silu_kernel, inv_count=inv_count, eps=eps, silu=silu),
        out_shape=jax.ShapeDtypeStruct((N, HW, Cp), out_dtype),
        grid=(N,),
        in_specs=[pl.BlockSpec((None, HW, Cp), lambda n: (n, 0, 0)),
                  pl.BlockSpec((Cp, G), lambda n: (0, 0)),
                  pl.BlockSpec((G, Cp), lambda n: (0, 0)),
                  pl.BlockSpec((1, Cp), lambda n: (0, 0)),
                  pl.BlockSpec((1, Cp), lambda n: (0, 0))],
        out_specs=pl.BlockSpec((None, HW, Cp), lambda n: (n, 0, 0)),
        compiler_params=pltpu.CompilerParams(dimension_semantics=("parallel",)),
    )(x_nlc, gmat, gmatt, gamma_p, beta_p)


def pallas_conv3x3(x_nhwc, w9, bias_p, stride, out_dtype):
    """PyTorch-semantics Conv2d(k=3, padding=1, stride in {1,2}), im2col in-kernel."""
    N, H, W, Cp = x_nhwc.shape
    Cop = w9.shape[-1]
    xp = jnp.pad(x_nhwc, ((0, 0), (1, 1), (1, 1), (0, 0)))
    Hp, Wp = H + 2, W + 2
    if stride == 1:
        ho, wo = H, W
        kern = partial(conv3x3_s1_kernel, ho=ho, wo=wo)
        x_in = (xp,)
        x_specs = [pl.BlockSpec((None, Hp, Wp, Cp), lambda n: (n, 0, 0, 0))]
    else:
        assert stride == 2 and H % 2 == 0 and W % 2 == 0
        ho, wo = H // 2, W // 2
        x_in = tuple(xp[:, p::2, q::2, :] for p in (0, 1) for q in (0, 1))
        Hh, Wh = Hp // 2, Wp // 2
        kern = partial(conv3x3_s2_kernel, ho=ho, wo=wo)
        x_specs = [pl.BlockSpec((None, Hh, Wh, Cp), lambda n: (n, 0, 0, 0))
                   for _ in range(4)]
    in_specs = x_specs + [pl.BlockSpec((9, Cp, Cop), lambda n: (0, 0, 0)),
                          pl.BlockSpec((1, Cop), lambda n: (0, 0))]
    return pl.pallas_call(
        kern,
        out_shape=jax.ShapeDtypeStruct((N, ho * wo, Cop), out_dtype),
        grid=(N,),
        in_specs=in_specs,
        out_specs=pl.BlockSpec((None, ho * wo, Cop), lambda n: (n, 0, 0)),
        compiler_params=pltpu.CompilerParams(dimension_semantics=("parallel",)),
    )(*x_in, w9, bias_p)


# ----------------------------------------------------------------------------
# Deformable sampling index math (wrapper-side, tiny)
# ----------------------------------------------------------------------------
def dcn_coeffs(offset, mask, H, W, k, stride, pad, dilation, group):
    """Bilinear-corner indices/weights for grid_sample(zeros, align_corners=False)."""
    assert group == 1, "group > 1 not supported (block uses group=1)"
    N, Hout, Wout, _ = offset.shape
    P = k * k
    Hp, Wp = H + 2 * pad, W + 2 * pad
    off = offset.reshape(N, Hout, Wout, P, 2)         # (..., (x, y))

    ref_x = (pad + 0.5 + stride * jnp.arange(Wout, dtype=jnp.float32)) / Wp
    ref_y = (pad + 0.5 + stride * jnp.arange(Hout, dtype=jnp.float32)) / Hp

    base = -float((dilation * (k - 1)) // 2)
    taps = base + dilation * jnp.arange(k, dtype=jnp.float32)
    dx = jnp.repeat(taps, k) / Wp
    dy = jnp.tile(taps, k) / Hp

    loc_x = ref_x[None, None, :, None] + dx[None, None, None, :] + off[..., 0] / Wp
    loc_y = ref_y[None, :, None, None] + dy[None, None, None, :] + off[..., 1] / Hp

    # grid_sample unnormalization: ((2*loc - 1) + 1) * size - 1) / 2 == loc*size - 0.5
    ix = loc_x * Wp - 0.5
    iy = loc_y * Hp - 0.5
    x0 = jnp.floor(ix)
    y0 = jnp.floor(iy)
    wx1 = ix - x0
    wx0 = 1.0 - wx1
    wy1 = iy - y0
    wy0 = 1.0 - wy1
    x0i = x0.astype(jnp.int32)
    x1i = x0i + 1
    y0i = y0.astype(jnp.int32)
    y1i = y0i + 1

    m = mask.reshape(N, Hout, Wout, P)
    idx_list, w_list = [], []
    for yi, wy in ((y0i, wy0), (y1i, wy1)):
        for xi, wx in ((x0i, wx0), (x1i, wx1)):
            valid = ((xi >= 0) & (xi < Wp) & (yi >= 0) & (yi < Hp)).astype(jnp.float32)
            w_list.append(wy * wx * valid * m)
            idx_list.append(jnp.clip(yi, 0, Hp - 1) * Wp + jnp.clip(xi, 0, Wp - 1))
    idx = jnp.stack(idx_list, axis=-1).reshape(N, Hout * Wout, 4 * P)
    wts = jnp.stack(w_list, axis=-1).reshape(N, Hout * Wout, 4 * P)
    return idx.astype(jnp.int32), wts.astype(jnp.float32)


# ----------------------------------------------------------------------------
# DCNv3 / block forward
# ----------------------------------------------------------------------------
def dcnv3_forward(x_nhwc, p, *, k=1, stride=1, pad=1, dilation=1, group=1):
    N, H, W, C = x_nhwc.shape
    M = N * H * W
    P = k * k
    xf = x_nhwc.reshape(M, C)

    # fused: input_proj + (dw conv -> LN -> GELU) -> (offset | mask) projection
    v, om = pallas_dcn_proj(xf, p["W_in_p"], p["b_in_p"], p["dw_w"], p["dw_b"],
                            p["ln_g"], p["ln_b"], p["W_om_p"], p["b_om_p"])
    Cp = v.shape[-1]

    offset = om[:, :group * P * 2].reshape(N, H, W, group * P * 2)
    mask_logits = om[:, group * P * 2: group * P * 3].reshape(N, H, W, group, P)
    # with k=1 (P=1) this softmax is identically 1.0; kept for generality
    mask = jax.nn.softmax(mask_logits, axis=-1).reshape(N, H, W, group * P)

    idx, wts = dcn_coeffs(offset, mask, H, W, k, stride, pad, dilation, group)

    v_pad = jnp.pad(v.reshape(N, H, W, Cp),
                    ((0, 0), (pad, pad), (pad, pad), (0, 0)))
    v_flat = v_pad.reshape(N, (H + 2 * pad) * (W + 2 * pad), Cp)

    # gather-based deformable sampling fused with output_proj
    return pallas_dcn_sample_outproj(v_flat, idx, wts, p["W_out_p"], p["b_out_p"])


def dcnv3_block_forward(x_nchw, p, *, out_channels):
    N, C, H, W = x_nchw.shape
    x = jnp.transpose(x_nchw, (0, 2, 3, 1)).astype(jnp.float32)     # NCHW -> NHWC

    # block_in: DCNv3(C, k=1, s=1, pad=1, g=1, d=1) -> (N, H*W, Cp), channel-padded
    y = dcnv3_forward(x, p)
    Cp = y.shape[-1]
    cg_in = C // 32

    # block_out: GN(32,C) -> SiLU -> Conv3x3(C->C) -> GN(32,C) -> SiLU
    y = pallas_groupnorm_silu(y, p["gn1_g_p"], p["gn1_b_p"], p["gmat_in"],
                              p["gmatt_in"], cg_in, True, jnp.bfloat16)
    y = pallas_conv3x3(y.reshape(N, H, W, Cp), p["conv_w_p"], p["conv_b_p"],
                       stride=1, out_dtype=jnp.float32)
    y = pallas_groupnorm_silu(y, p["gn2_g_p"], p["gn2_b_p"], p["gmat_in"],
                              p["gmatt_in"], cg_in, True, jnp.bfloat16)

    # down_sample: Conv3x3(C -> Cout, stride=2) -> GN(32, Cout)
    y = pallas_conv3x3(y.reshape(N, H, W, Cp), p["down_w_p"], p["down_b_p"],
                       stride=2, out_dtype=jnp.float32)
    Ho, Wo = H // 2, W // 2
    y = pallas_groupnorm_silu(y, p["gn3_g_p"], p["gn3_b_p"], p["gmat_out"],
                              p["gmatt_out"], out_channels // 32, False, jnp.float32)

    Cop = y.shape[-1]
    y = y.reshape(N, Ho, Wo, Cop)[:, :, :, :out_channels]
    return jnp.transpose(y, (0, 3, 1, 2))                           # NHWC -> NCHW


# ----------------------------------------------------------------------------
# Deterministic parameter init (module shapes) + TPU-layout packing
# ----------------------------------------------------------------------------
def init_params(key, C, Cout, P=1, group=1):
    ks = jax.random.split(key, 20)
    nrm = lambda k_, shp, s=0.05: s * jax.random.normal(k_, shp, jnp.float32)
    p = {}
    # DCNv3 (group=1, kernel_size=1 -> P=1)
    p["dw_w"] = 1.0 + nrm(ks[0], (C,))
    p["dw_b"] = nrm(ks[1], (C,))
    p["ln_g"] = jnp.ones((C,), jnp.float32)
    p["ln_b"] = jnp.zeros((C,), jnp.float32)
    p["W_off"] = nrm(ks[2], (C, 2 * P * group), 0.2)
    p["b_off"] = nrm(ks[3], (2 * P * group,), 0.2)
    p["W_mask"] = nrm(ks[4], (C, P * group))
    p["b_mask"] = nrm(ks[5], (P * group,))
    p["W_in"] = nrm(ks[6], (C, C))
    p["b_in"] = nrm(ks[7], (C,))
    p["W_out"] = nrm(ks[8], (C, C))
    p["b_out"] = nrm(ks[9], (C,))
    # block_out
    p["gn1_g"] = 1.0 + nrm(ks[10], (C,))
    p["gn1_b"] = nrm(ks[11], (C,))
    p["conv_w"] = nrm(ks[12], (C, C, 3, 3))
    p["conv_b"] = nrm(ks[13], (C,))
    p["gn2_g"] = 1.0 + nrm(ks[14], (C,))
    p["gn2_b"] = nrm(ks[15], (C,))
    # down_sample
    p["down_w"] = nrm(ks[16], (Cout, C, 3, 3))
    p["down_b"] = nrm(ks[17], (Cout,))
    p["gn3_g"] = 1.0 + nrm(ks[18], (Cout,))
    p["gn3_b"] = nrm(ks[19], (Cout,))
    return p


def _pad_cols(v, n):
    out = jnp.zeros((1, n), jnp.float32)
    return out.at[0, :v.shape[0]].set(v.astype(jnp.float32))


def _pad_mat(w, rows, cols):
    out = jnp.zeros((rows, cols), jnp.float32)
    return out.at[:w.shape[0], :w.shape[1]].set(w.astype(jnp.float32))


def _group_mats(c_real, c_pad, groups=32):
    cg = c_real // groups
    ch = jnp.arange(c_pad)
    gm = ((ch[:, None] // cg) == jnp.arange(groups)[None, :]) & (ch[:, None] < c_real)
    gm = gm.astype(jnp.float32)
    return gm, jnp.transpose(gm)


def _pack_conv(w_oihw, b, cin_pad, cout_pad):
    cout, cin = w_oihw.shape[0], w_oihw.shape[1]
    w9 = jnp.zeros((9, cin_pad, cout_pad), jnp.float32)
    for kh in range(3):
        for kw in range(3):
            w9 = w9.at[kh * 3 + kw, :cin, :cout].set(
                jnp.transpose(w_oihw[:, :, kh, kw]))
    return w9.astype(jnp.bfloat16), _pad_cols(b, cout_pad)


def prepare_params(raw, C, Cout, P=1, group=1):
    Cp = max(LANE, _round_up(C, LANE))
    Cop = max(LANE, _round_up(Cout, LANE))
    OMp = max(LANE, _round_up(3 * P * group, LANE))
    p = {}
    # DCNv3
    p["W_in_p"] = _pad_mat(raw["W_in"], C, Cp).astype(jnp.bfloat16)
    p["b_in_p"] = _pad_cols(raw["b_in"], Cp)
    p["dw_w"] = raw["dw_w"].reshape(1, C)
    p["dw_b"] = raw["dw_b"].reshape(1, C)
    p["ln_g"] = raw["ln_g"].reshape(1, C)
    p["ln_b"] = raw["ln_b"].reshape(1, C)
    w_om = jnp.concatenate([raw["W_off"], raw["W_mask"]], axis=1)   # (C, 3P)
    b_om = jnp.concatenate([raw["b_off"], raw["b_mask"]], axis=0)   # (3P,)
    p["W_om_p"] = _pad_mat(w_om, C, OMp).astype(jnp.bfloat16)
    p["b_om_p"] = _pad_cols(b_om, OMp)
    p["W_out_p"] = _pad_mat(raw["W_out"], Cp, Cp).astype(jnp.bfloat16)
    p["b_out_p"] = _pad_cols(raw["b_out"], Cp)
    # block_out
    p["gn1_g_p"] = _pad_cols(raw["gn1_g"], Cp)
    p["gn1_b_p"] = _pad_cols(raw["gn1_b"], Cp)
    p["conv_w_p"], p["conv_b_p"] = _pack_conv(raw["conv_w"], raw["conv_b"], Cp, Cp)
    p["gn2_g_p"] = _pad_cols(raw["gn2_g"], Cp)
    p["gn2_b_p"] = _pad_cols(raw["gn2_b"], Cp)
    # down_sample
    p["down_w_p"], p["down_b_p"] = _pack_conv(raw["down_w"], raw["down_b"], Cp, Cop)
    p["gn3_g_p"] = _pad_cols(raw["gn3_g"], Cop)
    p["gn3_b_p"] = _pad_cols(raw["gn3_b"], Cop)
    # precomputed GroupNorm channel->group one-hot matrices (pad channels -> no group)
    p["gmat_in"], p["gmatt_in"] = _group_mats(C, Cp)
    p["gmat_out"], p["gmatt_out"] = _group_mats(Cout, Cop)
    return p


if __name__ == "__main__":
    # GroupNorm(32, .) requires channel counts divisible by 32
    N, C, H, W = 2, 32, 8, 8
    Cout = 64

    key = jax.random.PRNGKey(0)
    kx, kp = jax.random.split(key)
    x = jax.random.normal(kx, (N, C, H, W), jnp.float32)
    params = prepare_params(init_params(kp, C, Cout), C, Cout)

    fwd = jax.jit(partial(dcnv3_block_forward, out_channels=Cout))
    y = jax.block_until_ready(fwd(x, params))

    assert y.shape == (N, Cout, H // 2, W // 2), y.shape
    assert bool(jnp.all(jnp.isfinite(y)))
    print("KERNEL_OK")
</pallas_src>

<mosaic_0001>
module attributes {stable_mosaic.version = 11 : i64} {
  func.func @dcn_proj_kernel(%arg0: i32, %arg1: memref<128x32xf32, #tpu.memory_space<vmem>>, %arg2: memref<32x128xbf16, #tpu.memory_space<vmem>>, %arg3: memref<1x128xf32, #tpu.memory_space<vmem>>, %arg4: memref<1x32xf32, #tpu.memory_space<vmem>>, %arg5: memref<1x32xf32, #tpu.memory_space<vmem>>, %arg6: memref<1x32xf32, #tpu.memory_space<vmem>>, %arg7: memref<1x32xf32, #tpu.memory_space<vmem>>, %arg8: memref<32x128xbf16, #tpu.memory_space<vmem>>, %arg9: memref<1x128xf32, #tpu.memory_space<vmem>>, %arg10: memref<128x128xf32, #tpu.memory_space<vmem>>, %arg11: memref<128x128xf32, #tpu.memory_space<vmem>>) attributes {dimension_semantics = [#tpu.dimension_semantics<parallel>], iteration_bounds = array<i64: 1>, scalar_prefetch = 0 : i64, scratch_operands = 0 : i64, tpu.core_type = #tpu.core_type<tc>, window_params = [{transform_indices = @transform_0, window_bounds = array<i64: 128, 32>}, {pipeline_mode = #tpu.pipeline_mode<synchronous>, transform_indices = @transform_1, window_bounds = array<i64: 32, 128>}, {pipeline_mode = #tpu.pipeline_mode<synchronous>, transform_indices = @transform_2, window_bounds = array<i64: 1, 128>}, {pipeline_mode = #tpu.pipeline_mode<synchronous>, transform_indices = @transform_3, window_bounds = array<i64: 1, 32>}, {pipeline_mode = #tpu.pipeline_mode<synchronous>, transform_indices = @transform_4, window_bounds = array<i64: 1, 32>}, {pipeline_mode = #tpu.pipeline_mode<synchronous>, transform_indices = @transform_5, window_bounds = array<i64: 1, 32>}, {pipeline_mode = #tpu.pipeline_mode<synchronous>, transform_indices = @transform_6, window_bounds = array<i64: 1, 32>}, {pipeline_mode = #tpu.pipeline_mode<synchronous>, transform_indices = @transform_7, window_bounds = array<i64: 32, 128>}, {pipeline_mode = #tpu.pipeline_mode<synchronous>, transform_indices = @transform_8, window_bounds = array<i64: 1, 128>}, {transform_indices = @transform_9, window_bounds = array<i64: 128, 128>}, {transform_indices = @transform_10, window_bounds = array<i64: 128, 128>}]} {
    %c0 = arith.constant 0 : index
    %c0_0 = arith.constant 0 : index
    %0 = vector.load %arg1[%c0, %c0_0] : memref<128x32xf32, #tpu.memory_space<vmem>>, vector<128x32xf32>
    %1 = arith.truncf %0 : vector<128x32xf32> to vector<128x32xbf16>
    %c0_1 = arith.constant 0 : index
    %c0_2 = arith.constant 0 : index
    %2 = vector.load %arg2[%c0_1, %c0_2] : memref<32x128xbf16, #tpu.memory_space<vmem>>, vector<32x128xbf16>
    %cst = arith.constant dense<0.000000e+00> : vector<128x128xf32>
    %3 = tpu.matmul %1, %2, %cst {dimension_numbers = #tpu.dot_dimension_numbers<[1], [0], [0], [1], [0, 0, 1, 1], [], []>} : vector<128x32xbf16>, vector<32x128xbf16>, vector<128x128xf32> -> vector<128x128xf32>
    %c0_3 = arith.constant 0 : index
    %c0_4 = arith.constant 0 : index
    %4 = vector.load %arg3[%c0_3, %c0_4] : memref<1x128xf32, #tpu.memory_space<vmem>>, vector<1x128xf32>
    %5 = vector.broadcast %4 : vector<1x128xf32> to vector<128x128xf32>
    %6 = arith.addf %3, %5 : vector<128x128xf32>
    %c0_5 = arith.constant 0 : index
    %c0_6 = arith.constant 0 : index
    %7 = vector.load %arg10[%c0_5, %c0_6] : memref<128x128xf32, #tpu.memory_space<vmem>>, vector<128x128xf32>
    tpu.vector_store %arg10[%c0_5, %c0_6], %6 {strides = array<i32>} : memref<128x128xf32, #tpu.memory_space<vmem>>, vector<128x128xf32>,
    %c0_7 = arith.constant 0 : index
    %c0_8 = arith.constant 0 : index
    %8 = vector.load %arg4[%c0_7, %c0_8] : memref<1x32xf32, #tpu.memory_space<vmem>>, vector<1x32xf32>
    %9 = vector.broadcast %8 : vector<1x32xf32> to vector<128x32xf32>
    %10 = arith.mulf %0, %9 : vector<128x32xf32>
    %c0_9 = arith.constant 0 : index
    %c0_10 = arith.constant 0 : index
    %11 = vector.load %arg5[%c0_9, %c0_10] : memref<1x32xf32, #tpu.memory_space<vmem>>, vector<1x32xf32>
    %12 = vector.broadcast %11 : vector<1x32xf32> to vector<128x32xf32>
    %13 = arith.addf %10, %12 : vector<128x32xf32>
    %cst_11 = arith.constant dense<0.000000e+00> : vector<128xf32>
    %14 = vector.multi_reduction <add>, %13, %cst_11 [1] : vector<128x32xf32> to vector<128xf32>
    %15 = vector.shape_cast %14 : vector<128xf32> to vector<128x1xf32>
    %cst_12 = arith.constant 3.200000e+01 : f32
    %16 = vector.broadcast %cst_12 : f32 to vector<128x1xf32>
    %17 = arith.divf %15, %16 : vector<128x1xf32>
    %18 = vector.broadcast %17 : vector<128x1xf32> to vector<128x32xf32>
    %19 = arith.subf %13, %18 : vector<128x32xf32>
    %20 = arith.mulf %19, %19 : vector<128x32xf32>
    %cst_13 = arith.constant dense<0.000000e+00> : vector<128xf32>
    %21 = vector.multi_reduction <add>, %20, %cst_13 [1] : vector<128x32xf32> to vector<128xf32>
    %22 = vector.shape_cast %21 : vector<128xf32> to vector<128x1xf32>
    %cst_14 = arith.constant 3.200000e+01 : f32
    %23 = vector.broadcast %cst_14 : f32 to vector<128x1xf32>
    %24 = arith.divf %22, %23 : vector<128x1xf32>
    %cst_15 = arith.constant 9.99999974E-6 : f32
    %25 = vector.broadcast %cst_15 : f32 to vector<128x1xf32>
    %26 = arith.addf %24, %25 : vector<128x1xf32>
    %27 = math.rsqrt %26 : vector<128x1xf32>
    %28 = vector.broadcast %27 : vector<128x1xf32> to vector<128x32xf32>
    %29 = arith.mulf %19, %28 : vector<128x32xf32>
    %c0_16 = arith.constant 0 : index
    %c0_17 = arith.constant 0 : index
    %30 = vector.load %arg6[%c0_16, %c0_17] : memref<1x32xf32, #tpu.memory_space<vmem>>, vector<1x32xf32>
    %31 = vector.broadcast %30 : vector<1x32xf32> to vector<128x32xf32>
    %32 = arith.mulf %29, %31 : vector<128x32xf32>
    %c0_18 = arith.constant 0 : index
    %c0_19 = arith.constant 0 : index
    %33 = vector.load %arg7[%c0_18, %c0_19] : memref<1x32xf32, #tpu.memory_space<vmem>>, vector<1x32xf32>
    %34 = vector.broadcast %33 : vector<1x32xf32> to vector<128x32xf32>
    %35 = arith.addf %32, %34 : vector<128x32xf32>
    %cst_20 = arith.constant 5.000000e-01 : f32
    %36 = vector.broadcast %cst_20 : f32 to vector<128x32xf32>
    %37 = arith.mulf %36, %35 : vector<128x32xf32>
    %cst_21 = arith.constant 0.707106769 : f32
    %38 = vector.broadcast %cst_21 : f32 to vector<128x32xf32>
    %39 = arith.mulf %35, %38 : vector<128x32xf32>
    %40 = math.erf %39 : vector<128x32xf32>
    %cst_22 = arith.constant 1.000000e+00 : f32
    %41 = vector.broadcast %cst_22 : f32 to vector<128x32xf32>
    %42 = arith.addf %41, %40 : vector<128x32xf32>
    %43 = arith.mulf %37, %42 : vector<128x32xf32>
    %44 = arith.truncf %43 : vector<128x32xf32> to vector<128x32xbf16>
    %c0_23 = arith.constant 0 : index
    %c0_24 = arith.constant 0 : index
    %45 = vector.load %arg8[%c0_23, %c0_24] : memref<32x128xbf16, #tpu.memory_space<vmem>>, vector<32x128xbf16>
    %cst_25 = arith.constant dense<0.000000e+00> : vector<128x128xf32>
    %46 = tpu.matmul %44, %45, %cst_25 {dimension_numbers = #tpu.dot_dimension_numbers<[1], [0], [0], [1], [0, 0, 1, 1], [], []>} : vector<128x32xbf16>, vector<32x128xbf16>, vector<128x128xf32> -> vector<128x128xf32>
    %c0_26 = arith.constant 0 : index
    %c0_27 = arith.constant 0 : index
    %47 = vector.load %arg9[%c0_26, %c0_27] : memref<1x128xf32, #tpu.memory_space<vmem>>, vector<1x128xf32>
    %48 = vector.broadcast %47 : vector<1x128xf32> to vector<128x128xf32>
    %49 = arith.addf %46, %48 : vector<128x128xf32>
    %c0_28 = arith.constant 0 : index
    %c0_29 = arith.constant 0 : index
    %50 = vector.load %arg11[%c0_28, %c0_29] : memref<128x128xf32, #tpu.memory_space<vmem>>, vector<128x128xf32>
    tpu.vector_store %arg11[%c0_28, %c0_29], %49 {strides = array<i32>} : memref<128x128xf32, #tpu.memory_space<vmem>>, vector<128x128xf32>,
    return
  }
  func.func @transform_0(%arg0: i32) -> (i32, i32) {
    %c0_i32 = arith.constant 0 : i32
    %c0_i32_0 = arith.constant 0 : i32
    return %arg0, %c0_i32 : i32, i32
  }
  func.func @transform_1(%arg0: i32) -> (i32, i32) {
    %c0_i32 = arith.constant 0 : i32
    %c0_i32_0 = arith.constant 0 : i32
    %c0_i32_1 = arith.constant 0 : i32
    return %c0_i32, %c0_i32_0 : i32, i32
  }
  func.func @transform_2(%arg0: i32) -> (i32, i32) {
    %c0_i32 = arith.constant 0 : i32
    %c0_i32_0 = arith.constant 0 : i32
    %c0_i32_1 = arith.constant 0 : i32
    return %c0_i32, %c0_i32_0 : i32, i32
  }
  func.func @transform_3(%arg0: i32) -> (i32, i32) {
    %c0_i32 = arith.constant 0 : i32
    %c0_i32_0 = arith.constant 0 : i32
    %c0_i32_1 = arith.constant 0 : i32
    return %c0_i32, %c0_i32_0 : i32, i32
  }
  func.func @transform_4(%arg0: i32) -> (i32, i32) {
    %c0_i32 = arith.constant 0 : i32
    %c0_i32_0 = arith.constant 0 : i32
    %c0_i32_1 = arith.constant 0 : i32
    return %c0_i32, %c0_i32_0 : i32, i32
  }
  func.func @transform_5(%arg0: i32) -> (i32, i32) {
    %c0_i32 = arith.constant 0 : i32
    %c0_i32_0 = arith.constant 0 : i32
    %c0_i32_1 = arith.constant 0 : i32
    return %c0_i32, %c0_i32_0 : i32, i32
  }
  func.func @transform_6(%arg0: i32) -> (i32, i32) {
    %c0_i32 = arith.constant 0 : i32
    %c0_i32_0 = arith.constant 0 : i32
    %c0_i32_1 = arith.constant 0 : i32
    return %c0_i32, %c0_i32_0 : i32, i32
  }
  func.func @transform_7(%arg0: i32) -> (i32, i32) {
    %c0_i32 = arith.constant 0 : i32
    %c0_i32_0 = arith.constant 0 : i32
    %c0_i32_1 = arith.constant 0 : i32
    return %c0_i32, %c0_i32_0 : i32, i32
  }
  func.func @transform_8(%arg0: i32) -> (i32, i32) {
    %c0_i32 = arith.constant 0 : i32
    %c0_i32_0 = arith.constant 0 : i32
    %c0_i32_1 = arith.constant 0 : i32
    return %c0_i32, %c0_i32_0 : i32, i32
  }
  func.func @transform_9(%arg0: i32) -> (i32, i32) {
    %c0_i32 = arith.constant 0 : i32
    %c0_i32_0 = arith.constant 0 : i32
    return %arg0, %c0_i32 : i32, i32
  }
  func.func @transform_10(%arg0: i32) -> (i32, i32) {
    %c0_i32 = arith.constant 0 : i32
    %c0_i32_0 = arith.constant 0 : i32
    return %arg0, %c0_i32 : i32, i32
  }
}

module attributes {stable_mosaic.version = 11 : i64} {
  func.func @dcn_sample_outproj_kernel(%arg0: i32, %arg1: memref<2x256xi32, #tpu.memory_space<smem>>, %arg2: memref<2x256xf32, #tpu.memory_space<smem>>, %arg3: memref<1x100x128xf32, #tpu.memory_space<vmem>>, %arg4: memref<128x128xbf16, #tpu.memory_space<vmem>>, %arg5: memref<1x128xf32, #tpu.memory_space<vmem>>, %arg6: memref<1x64x128xf32, #tpu.memory_space<vmem>>, %arg7: memref<64x128xf32, #tpu.memory_space<vmem>>) attributes {dimension_semantics = [#tpu.dimension_semantics<parallel>], iteration_bounds = array<i64: 2>, scalar_prefetch = 2 : i64, scratch_operands = 1 : i64, tpu.core_type = #tpu.core_type<tc>, window_params = [{transform_indices = @transform_0, window_bounds = array<i64: 1, 100, 128>}, {pipeline_mode = #tpu.pipeline_mode<synchronous>, transform_indices = @transform_1, window_bounds = array<i64: 128, 128>}, {pipeline_mode = #tpu.pipeline_mode<synchronous>, transform_indices = @transform_2, window_bounds = array<i64: 1, 128>}, {transform_indices = @transform_3, window_bounds = array<i64: 1, 64, 128>}]} {
    %c0_i32 = arith.constant 0 : i32
    %c64_i32 = arith.constant 64 : i32
    %0 = arith.addi %c0_i32, %c64_i32 : i32
    %c1_i32 = arith.constant 1 : i32
    scf.for %arg8 = %c0_i32 to %0 step %c1_i32  : i32 {
      %c4_i32 = arith.constant 4 : i32
      %11 = arith.muli %arg8, %c4_i32 : i32
      %12 = arith.index_cast %arg0 : i32 to index
      %13 = arith.index_cast %11 : i32 to index
      %14 = memref.load %arg2[%12, %13] : memref<2x256xf32, #tpu.memory_space<smem>>
      %15 = arith.index_cast %arg0 : i32 to index
      %16 = arith.index_cast %11 : i32 to index
      %17 = memref.load %arg1[%15, %16] : memref<2x256xi32, #tpu.memory_space<smem>>
      %c0_9 = arith.constant 0 : index
      %18 = arith.index_cast %17 : i32 to index
      %c0_10 = arith.constant 0 : index
      %19 = vector.load %arg3[%c0_9, %18, %c0_10] : memref<1x100x128xf32, #tpu.memory_space<vmem>>, vector<1x1x128xf32>
      %20 = vector.shape_cast %19 : vector<1x1x128xf32> to vector<1x128xf32>
      %21 = vector.broadcast %14 : f32 to vector<1x128xf32>
      %22 = arith.mulf %21, %20 : vector<1x128xf32>
      %c1_i32_11 = arith.constant 1 : i32
      %23 = arith.addi %11, %c1_i32_11 : i32
      %24 = arith.index_cast %arg0 : i32 to index
      %25 = arith.index_cast %23 : i32 to index
      %26 = memref.load %arg2[%24, %25] : memref<2x256xf32, #tpu.memory_space<smem>>
      %c1_i32_12 = arith.constant 1 : i32
      %27 = arith.addi %11, %c1_i32_12 : i32
      %28 = arith.index_cast %arg0 : i32 to index
      %29 = arith.index_cast %27 : i32 to index
      %30 = memref.load %arg1[%28, %29] : memref<2x256xi32, #tpu.memory_space<smem>>
      %c0_13 = arith.constant 0 : index
      %31 = arith.index_cast %30 : i32 to index
      %c0_14 = arith.constant 0 : index
      %32 = vector.load %arg3[%c0_13, %31, %c0_14] : memref<1x100x128xf32, #tpu.memory_space<vmem>>, vector<1x1x128xf32>
      %33 = vector.shape_cast %32 : vector<1x1x128xf32> to vector<1x128xf32>
      %34 = vector.broadcast %26 : f32 to vector<1x128xf32>
      %35 = arith.mulf %34, %33 : vector<1x128xf32>
      %36 = arith.addf %22, %35 : vector<1x128xf32>
      %c2_i32 = arith.constant 2 : i32
      %37 = arith.addi %11, %c2_i32 : i32
      %38 = arith.index_cast %arg0 : i32 to index
      %39 = arith.index_cast %37 : i32 to index
      %40 = memref.load %arg2[%38, %39] : memref<2x256xf32, #tpu.memory_space<smem>>
      %c2_i32_15 = arith.constant 2 : i32
      %41 = arith.addi %11, %c2_i32_15 : i32
      %42 = arith.index_cast %arg0 : i32 to index
      %43 = arith.index_cast %41 : i32 to index
      %44 = memref.load %arg1[%42, %43] : memref<2x256xi32, #tpu.memory_space<smem>>
      %c0_16 = arith.constant 0 : index
      %45 = arith.index_cast %44 : i32 to index
      %c0_17 = arith.constant 0 : index
      %46 = vector.load %arg3[%c0_16, %45, %c0_17] : memref<1x100x128xf32, #tpu.memory_space<vmem>>, vector<1x1x128xf32>
      %47 = vector.shape_cast %46 : vector<1x1x128xf32> to vector<1x128xf32>
      %48 = vector.broadcast %40 : f32 to vector<1x128xf32>
      %49 = arith.mulf %48, %47 : vector<1x128xf32>
      %50 = arith.addf %36, %49 : vector<1x128xf32>
      %c3_i32 = arith.constant 3 : i32
      %51 = arith.addi %11, %c3_i32 : i32
      %52 = arith.index_cast %arg0 : i32 to index
      %53 = arith.index_cast %51 : i32 to index
      %54 = memref.load %arg2[%52, %53] : memref<2x256xf32, #tpu.memory_space<smem>>
      %c3_i32_18 = arith.constant 3 : i32
      %55 = arith.addi %11, %c3_i32_18 : i32
      %56 = arith.index_cast %arg0 : i32 to index
      %57 = arith.index_cast %55 : i32 to index
      %58 = memref.load %arg1[%56, %57] : memref<2x256xi32, #tpu.memory_space<smem>>
      %c0_19 = arith.constant 0 : index
      %59 = arith.index_cast %58 : i32 to index
      %c0_20 = arith.constant 0 : index
      %60 = vector.load %arg3[%c0_19, %59, %c0_20] : memref<1x100x128xf32, #tpu.memory_space<vmem>>, vector<1x1x128xf32>
      %61 = vector.shape_cast %60 : vector<1x1x128xf32> to vector<1x128xf32>
      %62 = vector.broadcast %54 : f32 to vector<1x128xf32>
      %63 = arith.mulf %62, %61 : vector<1x128xf32>
      %64 = arith.addf %50, %63 : vector<1x128xf32>
      %65 = arith.index_cast %arg8 : i32 to index
      %c0_21 = arith.constant 0 : index
      %66 = vector.load %arg7[%65, %c0_21] : memref<64x128xf32, #tpu.memory_space<vmem>>, vector<1x128xf32>
      tpu.vector_store %arg7[%65, %c0_21], %64 {strides = array<i32>} : memref<64x128xf32, #tpu.memory_space<vmem>>, vector<1x128xf32>,
    }
    %c64_i32_0 = arith.constant 64 : i32
    %c0 = arith.constant 0 : index
    %c0_1 = arith.constant 0 : index
    %1 = vector.load %arg7[%c0, %c0_1] : memref<64x128xf32, #tpu.memory_space<vmem>>, vector<64x128xf32>
    %2 = arith.truncf %1 : vector<64x128xf32> to vector<64x128xbf16>
    %c0_2 = arith.constant 0 : index
    %c0_3 = arith.constant 0 : index
    %3 = vector.load %arg4[%c0_2, %c0_3] : memref<128x128xbf16, #tpu.memory_space<vmem>>, vector<128x128xbf16>
    %cst = arith.constant dense<0.000000e+00> : vector<64x128xf32>
    %4 = tpu.matmul %2, %3, %cst {dimension_numbers = #tpu.dot_dimension_numbers<[1], [0], [0], [1], [0, 0, 1, 1], [], []>} : vector<64x128xbf16>, vector<128x128xbf16>, vector<64x128xf32> -> vector<64x128xf32>
    %c0_4 = arith.constant 0 : index
    %c0_5 = arith.constant 0 : index
    %5 = vector.load %arg5[%c0_4, %c0_5] : memref<1x128xf32, #tpu.memory_space<vmem>>, vector<1x128xf32>
    %6 = vector.broadcast %5 : vector<1x128xf32> to vector<64x128xf32>
    %7 = arith.addf %4, %6 : vector<64x128xf32>
    %c0_6 = arith.constant 0 : index
    %c0_7 = arith.constant 0 : index
    %c0_8 = arith.constant 0 : index
    %8 = vector.load %arg6[%c0_6, %c0_7, %c0_8] : memref<1x64x128xf32, #tpu.memory_space<vmem>>, vector<1x64x128xf32>
    %9 = vector.shape_cast %8 : vector<1x64x128xf32> to vector<64x128xf32>
    %10 = vector.shape_cast %7 : vector<64x128xf32> to vector<1x64x128xf32>
    tpu.vector_store %arg6[%c0_6, %c0_7, %c0_8], %10 {strides = array<i32>} : memref<1x64x128xf32, #tpu.memory_space<vmem>>, vector<1x64x128xf32>,
    return
  }
  func.func @transform_0(%arg0: i32, %arg1: memref<2x256xi32, #tpu.memory_space<smem>>, %arg2: memref<2x256xf32, #tpu.memory_space<smem>>) -> (i32, i32, i32) {
    %c0_i32 = arith.constant 0 : i32
    %c0_i32_0 = arith.constant 0 : i32
    %c0_i32_1 = arith.constant 0 : i32
    return %arg0, %c0_i32, %c0_i32_0 : i32, i32, i32
  }
  func.func @transform_1(%arg0: i32, %arg1: memref<2x256xi32, #tpu.memory_space<smem>>, %arg2: memref<2x256xf32, #tpu.memory_space<smem>>) -> (i32, i32) {
    %c0_i32 = arith.constant 0 : i32
    %c0_i32_0 = arith.constant 0 : i32
    %c0_i32_1 = arith.constant 0 : i32
    return %c0_i32, %c0_i32_0 : i32, i32
  }
  func.func @transform_2(%arg0: i32, %arg1: memref<2x256xi32, #tpu.memory_space<smem>>, %arg2: memref<2x256xf32, #tpu.memory_space<smem>>) -> (i32, i32) {
    %c0_i32 = arith.constant 0 : i32
    %c0_i32_0 = arith.constant 0 : i32
    %c0_i32_1 = arith.constant 0 : i32
    return %c0_i32, %c0_i32_0 : i32, i32
  }
  func.func @transform_3(%arg0: i32, %arg1: memref<2x256xi32, #tpu.memory_space<smem>>, %arg2: memref<2x256xf32, #tpu.memory_space<smem>>) -> (i32, i32, i32) {
    %c0_i32 = arith.constant 0 : i32
    %c0_i32_0 = arith.constant 0 : i32
    %c0_i32_1 = arith.constant 0 : i32
    return %arg0, %c0_i32, %c0_i32_0 : i32, i32, i32
  }
}

module attributes {stable_mosaic.version = 11 : i64} {
  func.func @groupnorm_silu_kernel(%arg0: i32, %arg1: memref<1x64x128xf32, #tpu.memory_space<vmem>>, %arg2: memref<128x32xf32, #tpu.memory_space<vmem>>, %arg3: memref<32x128xf32, #tpu.memory_space<vmem>>, %arg4: memref<1x128xf32, #tpu.memory_space<vmem>>, %arg5: memref<1x128xf32, #tpu.memory_space<vmem>>, %arg6: memref<1x64x128xbf16, #tpu.memory_space<vmem>>) attributes {dimension_semantics = [#tpu.dimension_semantics<parallel>], iteration_bounds = array<i64: 2>, scalar_prefetch = 0 : i64, scratch_operands = 0 : i64, tpu.core_type = #tpu.core_type<tc>, window_params = [{transform_indices = @transform_0, window_bounds = array<i64: 1, 64, 128>}, {pipeline_mode = #tpu.pipeline_mode<synchronous>, transform_indices = @transform_1, window_bounds = array<i64: 128, 32>}, {pipeline_mode = #tpu.pipeline_mode<synchronous>, transform_indices = @transform_2, window_bounds = array<i64: 32, 128>}, {pipeline_mode = #tpu.pipeline_mode<synchronous>, transform_indices = @transform_3, window_bounds = array<i64: 1, 128>}, {pipeline_mode = #tpu.pipeline_mode<synchronous>, transform_indices = @transform_4, window_bounds = array<i64: 1, 128>}, {transform_indices = @transform_5, window_bounds = array<i64: 1, 64, 128>}]} {
    %c0 = arith.constant 0 : index
    %c0_0 = arith.constant 0 : index
    %c0_1 = arith.constant 0 : index
    %0 = vector.load %arg1[%c0, %c0_0, %c0_1] : memref<1x64x128xf32, #tpu.memory_space<vmem>>, vector<1x64x128xf32>
    %1 = vector.shape_cast %0 : vector<1x64x128xf32> to vector<64x128xf32>
    %cst = arith.constant dense<0.000000e+00> : vector<128xf32>
    %2 = vector.multi_reduction <add>, %1, %cst [0] : vector<64x128xf32> to vector<128xf32>
    %3 = vector.shape_cast %2 : vector<128xf32> to vector<1x128xf32>
    %c0_2 = arith.constant 0 : index
    %c0_3 = arith.constant 0 : index
    %4 = vector.load %arg2[%c0_2, %c0_3] : memref<128x32xf32, #tpu.memory_space<vmem>>, vector<128x32xf32>
    %cst_4 = arith.constant dense<0.000000e+00> : vector<1x32xf32>
    %5 = tpu.matmul %3, %4, %cst_4 {dimension_numbers = #tpu.dot_dimension_numbers<[1], [0], [0], [1], [0, 0, 1, 1], [], []>} : vector<1x128xf32>, vector<128x32xf32>, vector<1x32xf32> -> vector<1x32xf32>
    %cst_5 = arith.constant 1.562500e-02 : f32
    %6 = vector.broadcast %cst_5 : f32 to vector<1x32xf32>
    %7 = arith.mulf %5, %6 : vector<1x32xf32>
    %c0_6 = arith.constant 0 : index
    %c0_7 = arith.constant 0 : index
    %8 = vector.load %arg3[%c0_6, %c0_7] : memref<32x128xf32, #tpu.memory_space<vmem>>, vector<32x128xf32>
    %cst_8 = arith.constant dense<0.000000e+00> : vector<1x128xf32>
    %9 = tpu.matmul %7, %8, %cst_8 {dimension_numbers = #tpu.dot_dimension_numbers<[1], [0], [0], [1], [0, 0, 1, 1], [], []>} : vector<1x32xf32>, vector<32x128xf32>, vector<1x128xf32> -> vector<1x128xf32>
    %10 = vector.broadcast %9 : vector<1x128xf32> to vector<64x128xf32>
    %11 = arith.subf %1, %10 : vector<64x128xf32>
    %12 = arith.mulf %11, %11 : vector<64x128xf32>
    %cst_9 = arith.constant dense<0.000000e+00> : vector<128xf32>
    %13 = vector.multi_reduction <add>, %12, %cst_9 [0] : vector<64x128xf32> to vector<128xf32>
    %14 = vector.shape_cast %13 : vector<128xf32> to vector<1x128xf32>
    %c0_10 = arith.constant 0 : index
    %c0_11 = arith.constant 0 : index
    %15 = vector.load %arg2[%c0_10, %c0_11] : memref<128x32xf32, #tpu.memory_space<vmem>>, vector<128x32xf32>
    %cst_12 = arith.constant dense<0.000000e+00> : vector<1x32xf32>
    %16 = tpu.matmul %14, %15, %cst_12 {dimension_numbers = #tpu.dot_dimension_numbers<[1], [0], [0], [1], [0, 0, 1, 1], [], []>} : vector<1x128xf32>, vector<128x32xf32>, vector<1x32xf32> -> vector<1x32xf32>
    %cst_13 = arith.constant 1.562500e-02 : f32
    %17 = vector.broadcast %cst_13 : f32 to vector<1x32xf32>
    %18 = arith.mulf %16, %17 : vector<1x32xf32>
    %c0_14 = arith.constant 0 : index
    %c0_15 = arith.constant 0 : index
    %19 = vector.load %arg3[%c0_14, %c0_15] : memref<32x128xf32, #tpu.memory_space<vmem>>, vector<32x128xf32>
    %cst_16 = arith.constant dense<0.000000e+00> : vector<1x128xf32>
    %20 = tpu.matmul %18, %19, %cst_16 {dimension_numbers = #tpu.dot_dimension_numbers<[1], [0], [0], [1], [0, 0, 1, 1], [], []>} : vector<1x32xf32>, vector<32x128xf32>, vector<1x128xf32> -> vector<1x128xf32>
    %cst_17 = arith.constant 9.99999974E-6 : f32
    %21 = vector.broadcast %cst_17 : f32 to vector<1x128xf32>
    %22 = arith.addf %20, %21 : vector<1x128xf32>
    %23 = math.rsqrt %22 : vector<1x128xf32>
    %24 = vector.broadcast %23 : vector<1x128xf32> to vector<64x128xf32>
    %25 = arith.mulf %11, %24 : vector<64x128xf32>
    %c0_18 = arith.constant 0 : index
    %c0_19 = arith.constant 0 : index
    %26 = vector.load %arg4[%c0_18, %c0_19] : memref<1x128xf32, #tpu.memory_space<vmem>>, vector<1x128xf32>
    %27 = vector.broadcast %26 : vector<1x128xf32> to vector<64x128xf32>
    %28 = arith.mulf %25, %27 : vector<64x128xf32>
    %c0_20 = arith.constant 0 : index
    %c0_21 = arith.constant 0 : index
    %29 = vector.load %arg5[%c0_20, %c0_21] : memref<1x128xf32, #tpu.memory_space<vmem>>, vector<1x128xf32>
    %30 = vector.broadcast %29 : vector<1x128xf32> to vector<64x128xf32>
    %31 = arith.addf %28, %30 : vector<64x128xf32>
    %32 = arith.negf %31 : vector<64x128xf32>
    %33 = math.exp %32 : vector<64x128xf32>
    %cst_22 = arith.constant 1.000000e+00 : f32
    %34 = vector.broadcast %cst_22 : f32 to vector<64x128xf32>
    %35 = arith.addf %34, %33 : vector<64x128xf32>
    %36 = arith.divf %34, %35 : vector<64x128xf32>
    %37 = arith.mulf %31, %36 : vector<64x128xf32>
    %38 = arith.truncf %37 : vector<64x128xf32> to vector<64x128xbf16>
    %c0_23 = arith.constant 0 : index
    %c0_24 = arith.constant 0 : index
    %c0_25 = arith.constant 0 : index
    %39 = vector.load %arg6[%c0_23, %c0_24, %c0_25] : memref<1x64x128xbf16, #tpu.memory_space<vmem>>, vector<1x64x128xbf16>
    %40 = vector.shape_cast %39 : vector<1x64x128xbf16> to vector<64x128xbf16>
    %41 = vector.shape_cast %38 : vector<64x128xbf16> to vector<1x64x128xbf16>
    tpu.vector_store %arg6[%c0_23, %c0_24, %c0_25], %41 {strides = array<i32>} : memref<1x64x128xbf16, #tpu.memory_space<vmem>>, vector<1x64x128xbf16>,
    return
  }
  func.func @transform_0(%arg0: i32) -> (i32, i32, i32) {
    %c0_i32 = arith.constant 0 : i32
    %c0_i32_0 = arith.constant 0 : i32
    %c0_i32_1 = arith.constant 0 : i32
    return %arg0, %c0_i32, %c0_i32_0 : i32, i32, i32
  }
  func.func @transform_1(%arg0: i32) -> (i32, i32) {
    %c0_i32 = arith.constant 0 : i32
    %c0_i32_0 = arith.constant 0 : i32
    %c0_i32_1 = arith.constant 0 : i32
    return %c0_i32, %c0_i32_0 : i32, i32
  }
  func.func @transform_2(%arg0: i32) -> (i32, i32) {
    %c0_i32 = arith.constant 0 : i32
    %c0_i32_0 = arith.constant 0 : i32
    %c0_i32_1 = arith.constant 0 : i32
    return %c0_i32, %c0_i32_0 : i32, i32
  }
  func.func @transform_3(%arg0: i32) -> (i32, i32) {
    %c0_i32 = arith.constant 0 : i32
    %c0_i32_0 = arith.constant 0 : i32
    %c0_i32_1 = arith.constant 0 : i32
    return %c0_i32, %c0_i32_0 : i32, i32
  }
  func.func @transform_4(%arg0: i32) -> (i32, i32) {
    %c0_i32 = arith.constant 0 : i32
    %c0_i32_0 = arith.constant 0 : i32
    %c0_i32_1 = arith.constant 0 : i32
    return %c0_i32, %c0_i32_0 : i32, i32
  }
  func.func @transform_5(%arg0: i32) -> (i32, i32, i32) {
    %c0_i32 = arith.constant 0 : i32
    %c0_i32_0 = arith.constant 0 : i32
    %c0_i32_1 = arith.constant 0 : i32
    return %arg0, %c0_i32, %c0_i32_0 : i32, i32, i32
  }
}

module attributes {stable_mosaic.version = 11 : i64} {
  func.func @conv3x3_s1_kernel(%arg0: i32, %arg1: memref<1x10x10x128xbf16, #tpu.memory_space<vmem>>, %arg2: memref<9x128x128xbf16, #tpu.memory_space<vmem>>, %arg3: memref<1x128xf32, #tpu.memory_space<vmem>>, %arg4: memref<1x64x128xf32, #tpu.memory_space<vmem>>) attributes {dimension_semantics = [#tpu.dimension_semantics<parallel>], iteration_bounds = array<i64: 2>, scalar_prefetch = 0 : i64, scratch_operands = 0 : i64, tpu.core_type = #tpu.core_type<tc>, window_params = [{transform_indices = @transform_0, window_bounds = array<i64: 1, 10, 10, 128>}, {pipeline_mode = #tpu.pipeline_mode<synchronous>, transform_indices = @transform_1, window_bounds = array<i64: 9, 128, 128>}, {pipeline_mode = #tpu.pipeline_mode<synchronous>, transform_indices = @transform_2, window_bounds = array<i64: 1, 128>}, {transform_indices = @transform_3, window_bounds = array<i64: 1, 64, 128>}]} {
    %c0 = arith.constant 0 : index
    %c0_0 = arith.constant 0 : index
    %c0_1 = arith.constant 0 : index
    %c0_2 = arith.constant 0 : index
    %0 = vector.load %arg1[%c0, %c0_0, %c0_1, %c0_2] : memref<1x10x10x128xbf16, #tpu.memory_space<vmem>>, vector<1x10x10x128xbf16>
    %1 = vector.shape_cast %0 : vector<1x10x10x128xbf16> to vector<10x10x128xbf16>
    %2 = arith.extf %1 : vector<10x10x128xbf16> to vector<10x10x128xf32>
    %cst = arith.constant 0.000000e+00 : f32
    %3 = vector.broadcast %cst : f32 to vector<64x128xf32>
    %4 = vector.extract_strided_slice %2 {offsets = [0, 0, 0], sizes = [8, 8, 128], strides = [1, 1, 1]} : vector<10x10x128xf32> to vector<8x8x128xf32>
    %5 = vector.shape_cast %4 : vector<8x8x128xf32> to vector<64x128xf32>
    %6 = arith.truncf %5 : vector<64x128xf32> to vector<64x128xbf16>
    %c0_3 = arith.constant 0 : index
    %c0_4 = arith.constant 0 : index
    %c0_5 = arith.constant 0 : index
    %7 = vector.load %arg2[%c0_3, %c0_4, %c0_5] : memref<9x128x128xbf16, #tpu.memory_space<vmem>>, vector<1x128x128xbf16>
    %8 = vector.shape_cast %7 : vector<1x128x128xbf16> to vector<128x128xbf16>
    %cst_6 = arith.constant dense<0.000000e+00> : vector<64x128xf32>
    %9 = tpu.matmul %6, %8, %cst_6 {dimension_numbers = #tpu.dot_dimension_numbers<[1], [0], [0], [1], [0, 0, 1, 1], [], []>} : vector<64x128xbf16>, vector<128x128xbf16>, vector<64x128xf32> -> vector<64x128xf32>
    %10 = arith.addf %3, %9 : vector<64x128xf32>
    %11 = vector.extract_strided_slice %2 {offsets = [0, 1, 0], sizes = [8, 8, 128], strides = [1, 1, 1]} : vector<10x10x128xf32> to vector<8x8x128xf32>
    %12 = vector.shape_cast %11 : vector<8x8x128xf32> to vector<64x128xf32>
    %13 = arith.truncf %12 : vector<64x128xf32> to vector<64x128xbf16>
    %c1 = arith.constant 1 : index
    %c0_7 = arith.constant 0 : index
    %c0_8 = arith.constant 0 : index
    %14 = vector.load %arg2[%c1, %c0_7, %c0_8] : memref<9x128x128xbf16, #tpu.memory_space<vmem>>, vector<1x128x128xbf16>
    %15 = vector.shape_cast %14 : vector<1x128x128xbf16> to vector<128x128xbf16>
    %cst_9 = arith.constant dense<0.000000e+00> : vector<64x128xf32>
    %16 = tpu.matmul %13, %15, %cst_9 {dimension_numbers = #tpu.dot_dimension_numbers<[1], [0], [0], [1], [0, 0, 1, 1], [], []>} : vector<64x128xbf16>, vector<128x128xbf16>, vector<64x128xf32> -> vector<64x128xf32>
    %17 = arith.addf %10, %16 : vector<64x128xf32>
    %18 = vector.extract_strided_slice %2 {offsets = [0, 2, 0], sizes = [8, 8, 128], strides = [1, 1, 1]} : vector<10x10x128xf32> to vector<8x8x128xf32>
    %19 = vector.shape_cast %18 : vector<8x8x128xf32> to vector<64x128xf32>
    %20 = arith.truncf %19 : vector<64x128xf32> to vector<64x128xbf16>
    %c2 = arith.constant 2 : index
    %c0_10 = arith.constant 0 : index
    %c0_11 = arith.constant 0 : index
    %21 = vector.load %arg2[%c2, %c0_10, %c0_11] : memref<9x128x128xbf16, #tpu.memory_space<vmem>>, vector<1x128x128xbf16>
    %22 = vector.shape_cast %21 : vector<1x128x128xbf16> to vector<128x128xbf16>
    %cst_12 = arith.constant dense<0.000000e+00> : vector<64x128xf32>
    %23 = tpu.matmul %20, %22, %cst_12 {dimension_numbers = #tpu.dot_dimension_numbers<[1], [0], [0], [1], [0, 0, 1, 1], [], []>} : vector<64x128xbf16>, vector<128x128xbf16>, vector<64x128xf32> -> vector<64x128xf32>
    %24 = arith.addf %17, %23 : vector<64x128xf32>
    %25 = vector.extract_strided_slice %2 {offsets = [1, 0, 0], sizes = [8, 8, 128], strides = [1, 1, 1]} : vector<10x10x128xf32> to vector<8x8x128xf32>
    %26 = vector.shape_cast %25 : vector<8x8x128xf32> to vector<64x128xf32>
    %27 = arith.truncf %26 : vector<64x128xf32> to vector<64x128xbf16>
    %c3 = arith.constant 3 : index
    %c0_13 = arith.constant 0 : index
    %c0_14 = arith.constant 0 : index
    %28 = vector.load %arg2[%c3, %c0_13, %c0_14] : memref<9x128x128xbf16, #tpu.memory_space<vmem>>, vector<1x128x128xbf16>
    %29 = vector.shape_cast %28 : vector<1x128x128xbf16> to vector<128x128xbf16>
    %cst_15 = arith.constant dense<0.000000e+00> : vector<64x128xf32>
    %30 = tpu.matmul %27, %29, %cst_15 {dimension_numbers = #tpu.dot_dimension_numbers<[1], [0], [0], [1], [0, 0, 1, 1], [], []>} : vector<64x128xbf16>, vector<128x128xbf16>, vector<64x128xf32> -> vector<64x128xf32>
    %31 = arith.addf %24, %30 : vector<64x128xf32>
    %32 = vector.extract_strided_slice %2 {offsets = [1, 1, 0], sizes = [8, 8, 128], strides = [1, 1, 1]} : vector<10x10x128xf32> to vector<8x8x128xf32>
    %33 = vector.shape_cast %32 : vector<8x8x128xf32> to vector<64x128xf32>
    %34 = arith.truncf %33 : vector<64x128xf32> to vector<64x128xbf16>
    %c4 = arith.constant 4 : index
    %c0_16 = arith.constant 0 : index
    %c0_17 = arith.constant 0 : index
    %35 = vector.load %arg2[%c4, %c0_16, %c0_17] : memref<9x128x128xbf16, #tpu.memory_space<vmem>>, vector<1x128x128xbf16>
    %36 = vector.shape_cast %35 : vector<1x128x128xbf16> to vector<128x128xbf16>
    %cst_18 = arith.constant dense<0.000000e+00> : vector<64x128xf32>
    %37 = tpu.matmul %34, %36, %cst_18 {dimension_numbers = #tpu.dot_dimension_numbers<[1], [0], [0], [1], [0, 0, 1, 1], [], []>} : vector<64x128xbf16>, vector<128x128xbf16>, vector<64x128xf32> -> vector<64x128xf32>
    %38 = arith.addf %31, %37 : vector<64x128xf32>
    %39 = vector.extract_strided_slice %2 {offsets = [1, 2, 0], sizes = [8, 8, 128], strides = [1, 1, 1]} : vector<10x10x128xf32> to vector<8x8x128xf32>
    %40 = vector.shape_cast %39 : vector<8x8x128xf32> to vector<64x128xf32>
    %41 = arith.truncf %40 : vector<64x128xf32> to vector<64x128xbf16>
    %c5 = arith.constant 5 : index
    %c0_19 = arith.constant 0 : index
    %c0_20 = arith.constant 0 : index
    %42 = vector.load %arg2[%c5, %c0_19, %c0_20] : memref<9x128x128xbf16, #tpu.memory_space<vmem>>, vector<1x128x128xbf16>
    %43 = vector.shape_cast %42 : vector<1x128x128xbf16> to vector<128x128xbf16>
    %cst_21 = arith.constant dense<0.000000e+00> : vector<64x128xf32>
    %44 = tpu.matmul %41, %43, %cst_21 {dimension_numbers = #tpu.dot_dimension_numbers<[1], [0], [0], [1], [0, 0, 1, 1], [], []>} : vector<64x128xbf16>, vector<128x128xbf16>, vector<64x128xf32> -> vector<64x128xf32>
    %45 = arith.addf %38, %44 : vector<64x128xf32>
    %46 = vector.extract_strided_slice %2 {offsets = [2, 0, 0], sizes = [8, 8, 128], strides = [1, 1, 1]} : vector<10x10x128xf32> to vector<8x8x128xf32>
    %47 = vector.shape_cast %46 : vector<8x8x128xf32> to vector<64x128xf32>
    %48 = arith.truncf %47 : vector<64x128xf32> to vector<64x128xbf16>
    %c6 = arith.constant 6 : index
    %c0_22 = arith.constant 0 : index
    %c0_23 = arith.constant 0 : index
    %49 = vector.load %arg2[%c6, %c0_22, %c0_23] : memref<9x128x128xbf16, #tpu.memory_space<vmem>>, vector<1x128x128xbf16>
    %50 = vector.shape_cast %49 : vector<1x128x128xbf16> to vector<128x128xbf16>
    %cst_24 = arith.constant dense<0.000000e+00> : vector<64x128xf32>
    %51 = tpu.matmul %48, %50, %cst_24 {dimension_numbers = #tpu.dot_dimension_numbers<[1], [0], [0], [1], [0, 0, 1, 1], [], []>} : vector<64x128xbf16>, vector<128x128xbf16>, vector<64x128xf32> -> vector<64x128xf32>
    %52 = arith.addf %45, %51 : vector<64x128xf32>
    %53 = vector.extract_strided_slice %2 {offsets = [2, 1, 0], sizes = [8, 8, 128], strides = [1, 1, 1]} : vector<10x10x128xf32> to vector<8x8x128xf32>
    %54 = vector.shape_cast %53 : vector<8x8x128xf32> to vector<64x128xf32>
    %55 = arith.truncf %54 : vector<64x128xf32> to vector<64x128xbf16>
    %c7 = arith.constant 7 : index
    %c0_25 = arith.constant 0 : index
    %c0_26 = arith.constant 0 : index
    %56 = vector.load %arg2[%c7, %c0_25, %c0_26] : memref<9x128x128xbf16, #tpu.memory_space<vmem>>, vector<1x128x128xbf16>
    %57 = vector.shape_cast %56 : vector<1x128x128xbf16> to vector<128x128xbf16>
    %cst_27 = arith.constant dense<0.000000e+00> : vector<64x128xf32>
    %58 = tpu.matmul %55, %57, %cst_27 {dimension_numbers = #tpu.dot_dimension_numbers<[1], [0], [0], [1], [0, 0, 1, 1], [], []>} : vector<64x128xbf16>, vector<128x128xbf16>, vector<64x128xf32> -> vector<64x128xf32>
    %59 = arith.addf %52, %58 : vector<64x128xf32>
    %60 = vector.extract_strided_slice %2 {offsets = [2, 2, 0], sizes = [8, 8, 128], strides = [1, 1, 1]} : vector<10x10x128xf32> to vector<8x8x128xf32>
    %61 = vector.shape_cast %60 : vector<8x8x128xf32> to vector<64x128xf32>
    %62 = arith.truncf %61 : vector<64x128xf32> to vector<64x128xbf16>
    %c8 = arith.constant 8 : index
    %c0_28 = arith.constant 0 : index
    %c0_29 = arith.constant 0 : index
    %63 = vector.load %arg2[%c8, %c0_28, %c0_29] : memref<9x128x128xbf16, #tpu.memory_space<vmem>>, vector<1x128x128xbf16>
    %64 = vector.shape_cast %63 : vector<1x128x128xbf16> to vector<128x128xbf16>
    %cst_30 = arith.constant dense<0.000000e+00> : vector<64x128xf32>
    %65 = tpu.matmul %62, %64, %cst_30 {dimension_numbers = #tpu.dot_dimension_numbers<[1], [0], [0], [1], [0, 0, 1, 1], [], []>} : vector<64x128xbf16>, vector<128x128xbf16>, vector<64x128xf32> -> vector<64x128xf32>
    %66 = arith.addf %59, %65 : vector<64x128xf32>
    %c0_31 = arith.constant 0 : index
    %c0_32 = arith.constant 0 : index
    %67 = vector.load %arg3[%c0_31, %c0_32] : memref<1x128xf32, #tpu.memory_space<vmem>>, vector<1x128xf32>
    %68 = vector.broadcast %67 : vector<1x128xf32> to vector<64x128xf32>
    %69 = arith.addf %66, %68 : vector<64x128xf32>
    %c0_33 = arith.constant 0 : index
    %c0_34 = arith.constant 0 : index
    %c0_35 = arith.constant 0 : index
    %70 = vector.load %arg4[%c0_33, %c0_34, %c0_35] : memref<1x64x128xf32, #tpu.memory_space<vmem>>, vector<1x64x128xf32>
    %71 = vector.shape_cast %70 : vector<1x64x128xf32> to vector<64x128xf32>
    %72 = vector.shape_cast %69 : vector<64x128xf32> to vector<1x64x128xf32>
    tpu.vector_store %arg4[%c0_33, %c0_34, %c0_35], %72 {strides = array<i32>} : memref<1x64x128xf32, #tpu.memory_space<vmem>>, vector<1x64x128xf32>,
    return
  }
  func.func @transform_0(%arg0: i32) -> (i32, i32, i32, i32) {
    %c0_i32 = arith.constant 0 : i32
    %c0_i32_0 = arith.constant 0 : i32
    %c0_i32_1 = arith.constant 0 : i32
    %c0_i32_2 = arith.constant 0 : i32
    return %arg0, %c0_i32, %c0_i32_0, %c0_i32_1 : i32, i32, i32, i32
  }
  func.func @transform_1(%arg0: i32) -> (i32, i32, i32) {
    %c0_i32 = arith.constant 0 : i32
    %c0_i32_0 = arith.constant 0 : i32
    %c0_i32_1 = arith.constant 0 : i32
    %c0_i32_2 = arith.constant 0 : i32
    return %c0_i32, %c0_i32_0, %c0_i32_1 : i32, i32, i32
  }
  func.func @transform_2(%arg0: i32) -> (i32, i32) {
    %c0_i32 = arith.constant 0 : i32
    %c0_i32_0 = arith.constant 0 : i32
    %c0_i32_1 = arith.constant 0 : i32
    return %c0_i32, %c0_i32_0 : i32, i32
  }
  func.func @transform_3(%arg0: i32) -> (i32, i32, i32) {
    %c0_i32 = arith.constant 0 : i32
    %c0_i32_0 = arith.constant 0 : i32
    %c0_i32_1 = arith.constant 0 : i32
    return %arg0, %c0_i32, %c0_i32_0 : i32, i32, i32
  }
}

module attributes {stable_mosaic.version = 11 : i64} {
  func.func @groupnorm_silu_kernel(%arg0: i32, %arg1: memref<1x16x128xf32, #tpu.memory_space<vmem>>, %arg2: memref<128x32xf32, #tpu.memory_space<vmem>>, %arg3: memref<32x128xf32, #tpu.memory_space<vmem>>, %arg4: memref<1x128xf32, #tpu.memory_space<vmem>>, %arg5: memref<1x128xf32, #tpu.memory_space<vmem>>, %arg6: memref<1x16x128xf32, #tpu.memory_space<vmem>>) attributes {dimension_semantics = [#tpu.dimension_semantics<parallel>], iteration_bounds = array<i64: 2>, scalar_prefetch = 0 : i64, scratch_operands = 0 : i64, tpu.core_type = #tpu.core_type<tc>, window_params = [{transform_indices = @transform_0, window_bounds = array<i64: 1, 16, 128>}, {pipeline_mode = #tpu.pipeline_mode<synchronous>, transform_indices = @transform_1, window_bounds = array<i64: 128, 32>}, {pipeline_mode = #tpu.pipeline_mode<synchronous>, transform_indices = @transform_2, window_bounds = array<i64: 32, 128>}, {pipeline_mode = #tpu.pipeline_mode<synchronous>, transform_indices = @transform_3, window_bounds = array<i64: 1, 128>}, {pipeline_mode = #tpu.pipeline_mode<synchronous>, transform_indices = @transform_4, window_bounds = array<i64: 1, 128>}, {transform_indices = @transform_5, window_bounds = array<i64: 1, 16, 128>}]} {
    %c0 = arith.constant 0 : index
    %c0_0 = arith.constant 0 : index
    %c0_1 = arith.constant 0 : index
    %0 = vector.load %arg1[%c0, %c0_0, %c0_1] : memref<1x16x128xf32, #tpu.memory_space<vmem>>, vector<1x16x128xf32>
    %1 = vector.shape_cast %0 : vector<1x16x128xf32> to vector<16x128xf32>
    %cst = arith.constant dense<0.000000e+00> : vector<128xf32>
    %2 = vector.multi_reduction <add>, %1, %cst [0] : vector<16x128xf32> to vector<128xf32>
    %3 = vector.shape_cast %2 : vector<128xf32> to vector<1x128xf32>
    %c0_2 = arith.constant 0 : index
    %c0_3 = arith.constant 0 : index
    %4 = vector.load %arg2[%c0_2, %c0_3] : memref<128x32xf32, #tpu.memory_space<vmem>>, vector<128x32xf32>
    %cst_4 = arith.constant dense<0.000000e+00> : vector<1x32xf32>
    %5 = tpu.matmul %3, %4, %cst_4 {dimension_numbers = #tpu.dot_dimension_numbers<[1], [0], [0], [1], [0, 0, 1, 1], [], []>} : vector<1x128xf32>, vector<128x32xf32>, vector<1x32xf32> -> vector<1x32xf32>
    %cst_5 = arith.constant 3.125000e-02 : f32
    %6 = vector.broadcast %cst_5 : f32 to vector<1x32xf32>
    %7 = arith.mulf %5, %6 : vector<1x32xf32>
    %c0_6 = arith.constant 0 : index
    %c0_7 = arith.constant 0 : index
    %8 = vector.load %arg3[%c0_6, %c0_7] : memref<32x128xf32, #tpu.memory_space<vmem>>, vector<32x128xf32>
    %cst_8 = arith.constant dense<0.000000e+00> : vector<1x128xf32>
    %9 = tpu.matmul %7, %8, %cst_8 {dimension_numbers = #tpu.dot_dimension_numbers<[1], [0], [0], [1], [0, 0, 1, 1], [], []>} : vector<1x32xf32>, vector<32x128xf32>, vector<1x128xf32> -> vector<1x128xf32>
    %10 = vector.broadcast %9 : vector<1x128xf32> to vector<16x128xf32>
    %11 = arith.subf %1, %10 : vector<16x128xf32>
    %12 = arith.mulf %11, %11 : vector<16x128xf32>
    %cst_9 = arith.constant dense<0.000000e+00> : vector<128xf32>
    %13 = vector.multi_reduction <add>, %12, %cst_9 [0] : vector<16x128xf32> to vector<128xf32>
    %14 = vector.shape_cast %13 : vector<128xf32> to vector<1x128xf32>
    %c0_10 = arith.constant 0 : index
    %c0_11 = arith.constant 0 : index
    %15 = vector.load %arg2[%c0_10, %c0_11] : memref<128x32xf32, #tpu.memory_space<vmem>>, vector<128x32xf32>
    %cst_12 = arith.constant dense<0.000000e+00> : vector<1x32xf32>
    %16 = tpu.matmul %14, %15, %cst_12 {dimension_numbers = #tpu.dot_dimension_numbers<[1], [0], [0], [1], [0, 0, 1, 1], [], []>} : vector<1x128xf32>, vector<128x32xf32>, vector<1x32xf32> -> vector<1x32xf32>
    %cst_13 = arith.constant 3.125000e-02 : f32
    %17 = vector.broadcast %cst_13 : f32 to vector<1x32xf32>
    %18 = arith.mulf %16, %17 : vector<1x32xf32>
    %c0_14 = arith.constant 0 : index
    %c0_15 = arith.constant 0 : index
    %19 = vector.load %arg3[%c0_14, %c0_15] : memref<32x128xf32, #tpu.memory_space<vmem>>, vector<32x128xf32>
    %cst_16 = arith.constant dense<0.000000e+00> : vector<1x128xf32>
    %20 = tpu.matmul %18, %19, %cst_16 {dimension_numbers = #tpu.dot_dimension_numbers<[1], [0], [0], [1], [0, 0, 1, 1], [], []>} : vector<1x32xf32>, vector<32x128xf32>, vector<1x128xf32> -> vector<1x128xf32>
    %cst_17 = arith.constant 9.99999974E-6 : f32
    %21 = vector.broadcast %cst_17 : f32 to vector<1x128xf32>
    %22 = arith.addf %20, %21 : vector<1x128xf32>
    %23 = math.rsqrt %22 : vector<1x128xf32>
    %24 = vector.broadcast %23 : vector<1x128xf32> to vector<16x128xf32>
    %25 = arith.mulf %11, %24 : vector<16x128xf32>
    %c0_18 = arith.constant 0 : index
    %c0_19 = arith.constant 0 : index
    %26 = vector.load %arg4[%c0_18, %c0_19] : memref<1x128xf32, #tpu.memory_space<vmem>>, vector<1x128xf32>
    %27 = vector.broadcast %26 : vector<1x128xf32> to vector<16x128xf32>
    %28 = arith.mulf %25, %27 : vector<16x128xf32>
    %c0_20 = arith.constant 0 : index
    %c0_21 = arith.constant 0 : index
    %29 = vector.load %arg5[%c0_20, %c0_21] : memref<1x128xf32, #tpu.memory_space<vmem>>, vector<1x128xf32>
    %30 = vector.broadcast %29 : vector<1x128xf32> to vector<16x128xf32>
    %31 = arith.addf %28, %30 : vector<16x128xf32>
    %c0_22 = arith.constant 0 : index
    %c0_23 = arith.constant 0 : index
    %c0_24 = arith.constant 0 : index
    %32 = vector.load %arg6[%c0_22, %c0_23, %c0_24] : memref<1x16x128xf32, #tpu.memory_space<vmem>>, vector<1x16x128xf32>
    %33 = vector.shape_cast %32 : vector<1x16x128xf32> to vector<16x128xf32>
    %34 = vector.shape_cast %31 : vector<16x128xf32> to vector<1x16x128xf32>
    tpu.vector_store %arg6[%c0_22, %c0_23, %c0_24], %34 {strides = array<i32>} : memref<1x16x128xf32, #tpu.memory_space<vmem>>, vector<1x16x128xf32>,
    return
  }
  func.func @transform_0(%arg0: i32) -> (i32, i32, i32) {
    %c0_i32 = arith.constant 0 : i32
    %c0_i32_0 = arith.constant 0 : i32
    %c0_i32_1 = arith.constant 0 : i32
    return %arg0, %c0_i32, %c0_i32_0 : i32, i32, i32
  }
  func.func @transform_1(%arg0: i32) -> (i32, i32) {
    %c0_i32 = arith.constant 0 : i32
    %c0_i32_0 = arith.constant 0 : i32
    %c0_i32_1 = arith.constant 0 : i32
    return %c0_i32, %c0_i32_0 : i32, i32
  }
  func.func @transform_2(%arg0: i32) -> (i32, i32) {
    %c0_i32 = arith.constant 0 : i32
    %c0_i32_0 = arith.constant 0 : i32
    %c0_i32_1 = arith.constant 0 : i32
    return %c0_i32, %c0_i32_0 : i32, i32
  }
  func.func @transform_3(%arg0: i32) -> (i32, i32) {
    %c0_i32 = arith.constant 0 : i32
    %c0_i32_0 = arith.constant 0 : i32
    %c0_i32_1 = arith.constant 0 : i32
    return %c0_i32, %c0_i32_0 : i32, i32
  }
  func.func @transform_4(%arg0: i32) -> (i32, i32) {
    %c0_i32 = arith.constant 0 : i32
    %c0_i32_0 = arith.constant 0 : i32
    %c0_i32_1 = arith.constant 0 : i32
    return %c0_i32, %c0_i32_0 : i32, i32
  }
  func.func @transform_5(%arg0: i32) -> (i32, i32, i32) {
    %c0_i32 = arith.constant 0 : i32
    %c0_i32_0 = arith.constant 0 : i32
    %c0_i32_1 = arith.constant 0 : i32
    return %arg0, %c0_i32, %c0_i32_0 : i32, i32, i32
  }
}

module attributes {stable_mosaic.version = 11 : i64} {
  func.func @conv3x3_s2_kernel(%arg0: i32, %arg1: memref<1x5x5x128xbf16, #tpu.memory_space<vmem>>, %arg2: memref<1x5x5x128xbf16, #tpu.memory_space<vmem>>, %arg3: memref<1x5x5x128xbf16, #tpu.memory_space<vmem>>, %arg4: memref<1x5x5x128xbf16, #tpu.memory_space<vmem>>, %arg5: memref<9x128x128xbf16, #tpu.memory_space<vmem>>, %arg6: memref<1x128xf32, #tpu.memory_space<vmem>>, %arg7: memref<1x16x128xf32, #tpu.memory_space<vmem>>) attributes {dimension_semantics = [#tpu.dimension_semantics<parallel>], iteration_bounds = array<i64: 2>, scalar_prefetch = 0 : i64, scratch_operands = 0 : i64, tpu.core_type = #tpu.core_type<tc>, window_params = [{transform_indices = @transform_0, window_bounds = array<i64: 1, 5, 5, 128>}, {transform_indices = @transform_1, window_bounds = array<i64: 1, 5, 5, 128>}, {transform_indices = @transform_2, window_bounds = array<i64: 1, 5, 5, 128>}, {transform_indices = @transform_3, window_bounds = array<i64: 1, 5, 5, 128>}, {pipeline_mode = #tpu.pipeline_mode<synchronous>, transform_indices = @transform_4, window_bounds = array<i64: 9, 128, 128>}, {pipeline_mode = #tpu.pipeline_mode<synchronous>, transform_indices = @transform_5, window_bounds = array<i64: 1, 128>}, {transform_indices = @transform_6, window_bounds = array<i64: 1, 16, 128>}]} {
    %c0 = arith.constant 0 : index
    %c0_0 = arith.constant 0 : index
    %c0_1 = arith.constant 0 : index
    %c0_2 = arith.constant 0 : index
    %0 = vector.load %arg1[%c0, %c0_0, %c0_1, %c0_2] : memref<1x5x5x128xbf16, #tpu.memory_space<vmem>>, vector<1x5x5x128xbf16>
    %1 = vector.shape_cast %0 : vector<1x5x5x128xbf16> to vector<5x5x128xbf16>
    %2 = arith.extf %1 : vector<5x5x128xbf16> to vector<5x5x128xf32>
    %c0_3 = arith.constant 0 : index
    %c0_4 = arith.constant 0 : index
    %c0_5 = arith.constant 0 : index
    %c0_6 = arith.constant 0 : index
    %3 = vector.load %arg2[%c0_3, %c0_4, %c0_5, %c0_6] : memref<1x5x5x128xbf16, #tpu.memory_space<vmem>>, vector<1x5x5x128xbf16>
    %4 = vector.shape_cast %3 : vector<1x5x5x128xbf16> to vector<5x5x128xbf16>
    %5 = arith.extf %4 : vector<5x5x128xbf16> to vector<5x5x128xf32>
    %c0_7 = arith.constant 0 : index
    %c0_8 = arith.constant 0 : index
    %c0_9 = arith.constant 0 : index
    %c0_10 = arith.constant 0 : index
    %6 = vector.load %arg3[%c0_7, %c0_8, %c0_9, %c0_10] : memref<1x5x5x128xbf16, #tpu.memory_space<vmem>>, vector<1x5x5x128xbf16>
    %7 = vector.shape_cast %6 : vector<1x5x5x128xbf16> to vector<5x5x128xbf16>
    %8 = arith.extf %7 : vector<5x5x128xbf16> to vector<5x5x128xf32>
    %c0_11 = arith.constant 0 : index
    %c0_12 = arith.constant 0 : index
    %c0_13 = arith.constant 0 : index
    %c0_14 = arith.constant 0 : index
    %9 = vector.load %arg4[%c0_11, %c0_12, %c0_13, %c0_14] : memref<1x5x5x128xbf16, #tpu.memory_space<vmem>>, vector<1x5x5x128xbf16>
    %10 = vector.shape_cast %9 : vector<1x5x5x128xbf16> to vector<5x5x128xbf16>
    %11 = arith.extf %10 : vector<5x5x128xbf16> to vector<5x5x128xf32>
    %cst = arith.constant 0.000000e+00 : f32
    %12 = vector.broadcast %cst : f32 to vector<16x128xf32>
    %13 = vector.extract_strided_slice %2 {offsets = [0, 0, 0], sizes = [4, 4, 128], strides = [1, 1, 1]} : vector<5x5x128xf32> to vector<4x4x128xf32>
    %14 = vector.shape_cast %13 : vector<4x4x128xf32> to vector<16x128xf32>
    %15 = arith.truncf %14 : vector<16x128xf32> to vector<16x128xbf16>
    %c0_15 = arith.constant 0 : index
    %c0_16 = arith.constant 0 : index
    %c0_17 = arith.constant 0 : index
    %16 = vector.load %arg5[%c0_15, %c0_16, %c0_17] : memref<9x128x128xbf16, #tpu.memory_space<vmem>>, vector<1x128x128xbf16>
    %17 = vector.shape_cast %16 : vector<1x128x128xbf16> to vector<128x128xbf16>
    %cst_18 = arith.constant dense<0.000000e+00> : vector<16x128xf32>
    %18 = tpu.matmul %15, %17, %cst_18 {dimension_numbers = #tpu.dot_dimension_numbers<[1], [0], [0], [1], [0, 0, 1, 1], [], []>} : vector<16x128xbf16>, vector<128x128xbf16>, vector<16x128xf32> -> vector<16x128xf32>
    %19 = arith.addf %12, %18 : vector<16x128xf32>
    %20 = vector.extract_strided_slice %5 {offsets = [0, 0, 0], sizes = [4, 4, 128], strides = [1, 1, 1]} : vector<5x5x128xf32> to vector<4x4x128xf32>
    %21 = vector.shape_cast %20 : vector<4x4x128xf32> to vector<16x128xf32>
    %22 = arith.truncf %21 : vector<16x128xf32> to vector<16x128xbf16>
    %c1 = arith.constant 1 : index
    %c0_19 = arith.constant 0 : index
    %c0_20 = arith.constant 0 : index
    %23 = vector.load %arg5[%c1, %c0_19, %c0_20] : memref<9x128x128xbf16, #tpu.memory_space<vmem>>, vector<1x128x128xbf16>
    %24 = vector.shape_cast %23 : vector<1x128x128xbf16> to vector<128x128xbf16>
    %cst_21 = arith.constant dense<0.000000e+00> : vector<16x128xf32>
    %25 = tpu.matmul %22, %24, %cst_21 {dimension_numbers = #tpu.dot_dimension_numbers<[1], [0], [0], [1], [0, 0, 1, 1], [], []>} : vector<16x128xbf16>, vector<128x128xbf16>, vector<16x128xf32> -> vector<16x128xf32>
    %26 = arith.addf %19, %25 : vector<16x128xf32>
    %27 = vector.extract_strided_slice %2 {offsets = [0, 1, 0], sizes = [4, 4, 128], strides = [1, 1, 1]} : vector<5x5x128xf32> to vector<4x4x128xf32>
    %28 = vector.shape_cast %27 : vector<4x4x128xf32> to vector<16x128xf32>
    %29 = arith.truncf %28 : vector<16x128xf32> to vector<16x128xbf16>
    %c2 = arith.constant 2 : index
    %c0_22 = arith.constant 0 : index
    %c0_23 = arith.constant 0 : index
    %30 = vector.load %arg5[%c2, %c0_22, %c0_23] : memref<9x128x128xbf16, #tpu.memory_space<vmem>>, vector<1x128x128xbf16>
    %31 = vector.shape_cast %30 : vector<1x128x128xbf16> to vector<128x128xbf16>
    %cst_24 = arith.constant dense<0.000000e+00> : vector<16x128xf32>
    %32 = tpu.matmul %29, %31, %cst_24 {dimension_numbers = #tpu.dot_dimension_numbers<[1], [0], [0], [1], [0, 0, 1, 1], [], []>} : vector<16x128xbf16>, vector<128x128xbf16>, vector<16x128xf32> -> vector<16x128xf32>
    %33 = arith.addf %26, %32 : vector<16x128xf32>
    %34 = vector.extract_strided_slice %8 {offsets = [0, 0, 0], sizes = [4, 4, 128], strides = [1, 1, 1]} : vector<5x5x128xf32> to vector<4x4x128xf32>
    %35 = vector.shape_cast %34 : vector<4x4x128xf32> to vector<16x128xf32>
    %36 = arith.truncf %35 : vector<16x128xf32> to vector<16x128xbf16>
    %c3 = arith.constant 3 : index
    %c0_25 = arith.constant 0 : index
    %c0_26 = arith.constant 0 : index
    %37 = vector.load %arg5[%c3, %c0_25, %c0_26] : memref<9x128x128xbf16, #tpu.memory_space<vmem>>, vector<1x128x128xbf16>
    %38 = vector.shape_cast %37 : vector<1x128x128xbf16> to vector<128x128xbf16>
    %cst_27 = arith.constant dense<0.000000e+00> : vector<16x128xf32>
    %39 = tpu.matmul %36, %38, %cst_27 {dimension_numbers = #tpu.dot_dimension_numbers<[1], [0], [0], [1], [0, 0, 1, 1], [], []>} : vector<16x128xbf16>, vector<128x128xbf16>, vector<16x128xf32> -> vector<16x128xf32>
    %40 = arith.addf %33, %39 : vector<16x128xf32>
    %41 = vector.extract_strided_slice %11 {offsets = [0, 0, 0], sizes = [4, 4, 128], strides = [1, 1, 1]} : vector<5x5x128xf32> to vector<4x4x128xf32>
    %42 = vector.shape_cast %41 : vector<4x4x128xf32> to vector<16x128xf32>
    %43 = arith.truncf %42 : vector<16x128xf32> to vector<16x128xbf16>
    %c4 = arith.constant 4 : index
    %c0_28 = arith.constant 0 : index
    %c0_29 = arith.constant 0 : index
    %44 = vector.load %arg5[%c4, %c0_28, %c0_29] : memref<9x128x128xbf16, #tpu.memory_space<vmem>>, vector<1x128x128xbf16>
    %45 = vector.shape_cast %44 : vector<1x128x128xbf16> to vector<128x128xbf16>
    %cst_30 = arith.constant dense<0.000000e+00> : vector<16x128xf32>
    %46 = tpu.matmul %43, %45, %cst_30 {dimension_numbers = #tpu.dot_dimension_numbers<[1], [0], [0], [1], [0, 0, 1, 1], [], []>} : vector<16x128xbf16>, vector<128x128xbf16>, vector<16x128xf32> -> vector<16x128xf32>
    %47 = arith.addf %40, %46 : vector<16x128xf32>
    %48 = vector.extract_strided_slice %8 {offsets = [0, 1, 0], sizes = [4, 4, 128], strides = [1, 1, 1]} : vector<5x5x128xf32> to vector<4x4x128xf32>
    %49 = vector.shape_cast %48 : vector<4x4x128xf32> to vector<16x128xf32>
    %50 = arith.truncf %49 : vector<16x128xf32> to vector<16x128xbf16>
    %c5 = arith.constant 5 : index
    %c0_31 = arith.constant 0 : index
    %c0_32 = arith.constant 0 : index
    %51 = vector.load %arg5[%c5, %c0_31, %c0_32] : memref<9x128x128xbf16, #tpu.memory_space<vmem>>, vector<1x128x128xbf16>
    %52 = vector.shape_cast %51 : vector<1x128x128xbf16> to vector<128x128xbf16>
    %cst_33 = arith.constant dense<0.000000e+00> : vector<16x128xf32>
    %53 = tpu.matmul %50, %52, %cst_33 {dimension_numbers = #tpu.dot_dimension_numbers<[1], [0], [0], [1], [0, 0, 1, 1], [], []>} : vector<16x128xbf16>, vector<128x128xbf16>, vector<16x128xf32> -> vector<16x128xf32>
    %54 = arith.addf %47, %53 : vector<16x128xf32>
    %55 = vector.extract_strided_slice %2 {offsets = [1, 0, 0], sizes = [4, 4, 128], strides = [1, 1, 1]} : vector<5x5x128xf32> to vector<4x4x128xf32>
    %56 = vector.shape_cast %55 : vector<4x4x128xf32> to vector<16x128xf32>
    %57 = arith.truncf %56 : vector<16x128xf32> to vector<16x128xbf16>
    %c6 = arith.constant 6 : index
    %c0_34 = arith.constant 0 : index
    %c0_35 = arith.constant 0 : index
    %58 = vector.load %arg5[%c6, %c0_34, %c0_35] : memref<9x128x128xbf16, #tpu.memory_space<vmem>>, vector<1x128x128xbf16>
    %59 = vector.shape_cast %58 : vector<1x128x128xbf16> to vector<128x128xbf16>
    %cst_36 = arith.constant dense<0.000000e+00> : vector<16x128xf32>
    %60 = tpu.matmul %57, %59, %cst_36 {dimension_numbers = #tpu.dot_dimension_numbers<[1], [0], [0], [1], [0, 0, 1, 1], [], []>} : vector<16x128xbf16>, vector<128x128xbf16>, vector<16x128xf32> -> vector<16x128xf32>
    %61 = arith.addf %54, %60 : vector<16x128xf32>
    %62 = vector.extract_strided_slice %5 {offsets = [1, 0, 0], sizes = [4, 4, 128], strides = [1, 1, 1]} : vector<5x5x128xf32> to vector<4x4x128xf32>
    %63 = vector.shape_cast %62 : vector<4x4x128xf32> to vector<16x128xf32>
    %64 = arith.truncf %63 : vector<16x128xf32> to vector<16x128xbf16>
    %c7 = arith.constant 7 : index
    %c0_37 = arith.constant 0 : index
    %c0_38 = arith.constant 0 : index
    %65 = vector.load %arg5[%c7, %c0_37, %c0_38] : memref<9x128x128xbf16, #tpu.memory_space<vmem>>, vector<1x128x128xbf16>
    %66 = vector.shape_cast %65 : vector<1x128x128xbf16> to vector<128x128xbf16>
    %cst_39 = arith.constant dense<0.000000e+00> : vector<16x128xf32>
    %67 = tpu.matmul %64, %66, %cst_39 {dimension_numbers = #tpu.dot_dimension_numbers<[1], [0], [0], [1], [0, 0, 1, 1], [], []>} : vector<16x128xbf16>, vector<128x128xbf16>, vector<16x128xf32> -> vector<16x128xf32>
    %68 = arith.addf %61, %67 : vector<16x128xf32>
    %69 = vector.extract_strided_slice %2 {offsets = [1, 1, 0], sizes = [4, 4, 128], strides = [1, 1, 1]} : vector<5x5x128xf32> to vector<4x4x128xf32>
    %70 = vector.shape_cast %69 : vector<4x4x128xf32> to vector<16x128xf32>
    %71 = arith.truncf %70 : vector<16x128xf32> to vector<16x128xbf16>
    %c8 = arith.constant 8 : index
    %c0_40 = arith.constant 0 : index
    %c0_41 = arith.constant 0 : index
    %72 = vector.load %arg5[%c8, %c0_40, %c0_41] : memref<9x128x128xbf16, #tpu.memory_space<vmem>>, vector<1x128x128xbf16>
    %73 = vector.shape_cast %72 : vector<1x128x128xbf16> to vector<128x128xbf16>
    %cst_42 = arith.constant dense<0.000000e+00> : vector<16x128xf32>
    %74 = tpu.matmul %71, %73, %cst_42 {dimension_numbers = #tpu.dot_dimension_numbers<[1], [0], [0], [1], [0, 0, 1, 1], [], []>} : vector<16x128xbf16>, vector<128x128xbf16>, vector<16x128xf32> -> vector<16x128xf32>
    %75 = arith.addf %68, %74 : vector<16x128xf32>
    %c0_43 = arith.constant 0 : index
    %c0_44 = arith.constant 0 : index
    %76 = vector.load %arg6[%c0_43, %c0_44] : memref<1x128xf32, #tpu.memory_space<vmem>>, vector<1x128xf32>
    %77 = vector.broadcast %76 : vector<1x128xf32> to vector<16x128xf32>
    %78 = arith.addf %75, %77 : vector<16x128xf32>
    %c0_45 = arith.constant 0 : index
    %c0_46 = arith.constant 0 : index
    %c0_47 = arith.constant 0 : index
    %79 = vector.load %arg7[%c0_45, %c0_46, %c0_47] : memref<1x16x128xf32, #tpu.memory_space<vmem>>, vector<1x16x128xf32>
    %80 = vector.shape_cast %79 : vector<1x16x128xf32> to vector<16x128xf32>
    %81 = vector.shape_cast %78 : vector<16x128xf32> to vector<1x16x128xf32>
    tpu.vector_store %arg7[%c0_45, %c0_46, %c0_47], %81 {strides = array<i32>} : memref<1x16x128xf32, #tpu.memory_space<vmem>>, vector<1x16x128xf32>,
    return
  }
  func.func @transform_0(%arg0: i32) -> (i32, i32, i32, i32) {
    %c0_i32 = arith.constant 0 : i32
    %c0_i32_0 = arith.constant 0 : i32
    %c0_i32_1 = arith.constant 0 : i32
    %c0_i32_2 = arith.constant 0 : i32
    return %arg0, %c0_i32, %c0_i32_0, %c0_i32_1 : i32, i32, i32, i32
  }
  func.func @transform_1(%arg0: i32) -> (i32, i32, i32, i32) {
    %c0_i32 = arith.constant 0 : i32
    %c0_i32_0 = arith.constant 0 : i32
    %c0_i32_1 = arith.constant 0 : i32
    %c0_i32_2 = arith.constant 0 : i32
    return %arg0, %c0_i32, %c0_i32_0, %c0_i32_1 : i32, i32, i32, i32
  }
  func.func @transform_2(%arg0: i32) -> (i32, i32, i32, i32) {
    %c0_i32 = arith.constant 0 : i32
    %c0_i32_0 = arith.constant 0 : i32
    %c0_i32_1 = arith.constant 0 : i32
    %c0_i32_2 = arith.constant 0 : i32
    return %arg0, %c0_i32, %c0_i32_0, %c0_i32_1 : i32, i32, i32, i32
  }
  func.func @transform_3(%arg0: i32) -> (i32, i32, i32, i32) {
    %c0_i32 = arith.constant 0 : i32
    %c0_i32_0 = arith.constant 0 : i32
    %c0_i32_1 = arith.constant 0 : i32
    %c0_i32_2 = arith.constant 0 : i32
    return %arg0, %c0_i32, %c0_i32_0, %c0_i32_1 : i32, i32, i32, i32
  }
  func.func @transform_4(%arg0: i32) -> (i32, i32, i32) {
    %c0_i32 = arith.constant 0 : i32
    %c0_i32_0 = arith.constant 0 : i32
    %c0_i32_1 = arith.constant 0 : i32
    %c0_i32_2 = arith.constant 0 : i32
    return %c0_i32, %c0_i32_0, %c0_i32_1 : i32, i32, i32
  }
  func.func @transform_5(%arg0: i32) -> (i32, i32) {
    %c0_i32 = arith.constant 0 : i32
    %c0_i32_0 = arith.constant 0 : i32
    %c0_i32_1 = arith.constant 0 : i32
    return %c0_i32, %c0_i32_0 : i32, i32
  }
  func.func @transform_6(%arg0: i32) -> (i32, i32, i32) {
    %c0_i32 = arith.constant 0 : i32
    %c0_i32_0 = arith.constant 0 : i32
    %c0_i32_1 = arith.constant 0 : i32
    return %arg0, %c0_i32, %c0_i32_0 : i32, i32, i32
  }
}

</mosaic_0001>

<bundles_post_ra>
// kernel: dcnv3_block_forward.7
= control target key start
LH: loop header
LB: loop body
LE: loop exit
PB: predicated region body
PF: predicated region fallthrough
CT: control target
= control target key end

     0   :  { %16 = vsyncpa [#allocation3], 0  ;;  %s1629_s0 = inlined_call_operand.hbm [shape: f32[128,32], index: 0, kind: input, shape index: {}]   ;;  %s1630_s1 = inlined_call_operand.vmem [shape: bf16[32,128], index: 1, kind: input, shape index: {}]   ;;  %s1631_s2 = inlined_call_operand.vmem [shape: f32[1,128], index: 2, kind: input, shape index: {}]   ;;  %s1632_s3 = inlined_call_operand.vmem [shape: f32[1,32], index: 3, kind: input, shape index: {}]   ;;  %s1633_s4 = inlined_call_operand.vmem [shape: f32[1,32], index: 4, kind: input, shape index: {}]   ;;  %s1634_s5 = inlined_call_operand.hbm [shape: f32[1,32], index: 5, kind: input, shape index: {}]   ;;  %s1635_s6 = inlined_call_operand.hbm [shape: f32[1,32], index: 6, kind: input, shape index: {}]   ;;  %s1636_s7 = inlined_call_operand.vmem [shape: bf16[32,128], index: 7, kind: input, shape index: {}]   ;;  %s1637_s8 = inlined_call_operand.vmem [shape: f32[1,128], index: 8, kind: input, shape index: {}]   ;;  %s1638_s9 = inlined_call_operand.vmem [shape: f32[128,128], index: 9, kind: output, shape index: {0}]   ;;  %s1639_s10 = inlined_call_operand.vmem [shape: f32[128,128], index: 10, kind: output, shape index: {1}]  }
   0x1   :  { %17 = vsyncpa [#allocation5], 0  ;;  %s1039_s13 = smov [#allocation4]   ;;  %s1040_s15 = smov [#allocation2]  }
   0x2   :  { %s44_s14 = sshll.u32 %s1039_s13, 4  ;;  %s23_s16 = sshll.u32 %s1040_s15, 4  ;;  %s45_s14 = int_to_ptr.vmem [resolvable:$true] %s44_s14  ;;  %s24_s16 = int_to_ptr.vmem [resolvable:$true] %s23_s16 }
   0x3   :  { %s983_s17 = scalar_lea.vmem %s45_s14, 16  ;;  %s987_s18 = scalar_lea.vmem %s45_s14, 32 }
   0x4   :  { %p984_p0 = scmp.ne.s32.totalorder %s45_s14, %s983_s17  ;;  %p988_p1 = scmp.lt.s32.totalorder %s45_s14, %s45_s14 }
   0x5   :  { %p989_p2 = scmp.lt.s32.totalorder %s987_s18, %s983_s17 }
   0x7   :  { %p990_p3 = por %p989_p2, %p988_p1 }
   0x9   :  { %p991_p4 = pnand %p990_p3, %p984_p0 }
   0xb   :  { %994 = shalt.err (!%p991_p4)
}
   0xc   :  { %47 = dma.hbm_to_vmem [thread:$0]  %s1634_s5, 16, %s45_s14, [#allocation5]  }
   0xd   :  { %s1003_s21 = scalar_lea.vmem %s24_s16, 2048  ;;  %p1008_p6 = scmp.lt.s32.totalorder %s24_s16, %s24_s16 }
   0xe   :  { %p1004_p5 = scmp.ne.s32.totalorder %s24_s16, %s1003_s21  ;;  %p1009_p7 = scmp.lt.s32.totalorder %s1003_s21, %s1003_s21 }
  0x10   :  { %p1010_p8 = por %p1009_p7, %p1008_p6 }
  0x12   :  { %p1011_p9 = pnand %p1010_p8, %p1004_p5 }
  0x14   :  { %1014 = shalt.err (!%p1011_p9)
}
  0x15   :  { %s1041_s22 = smov 128   ;;  %s1042_s23 = smov 8  }
  0x16   :  { %29 = dma.hbm_to_vmem [thread:$0]  %s1629_s0, 2048, %s24_s16, [#allocation3], %s1041_s22, %s1041_s22, %s1042_s23  }
  0x17   :  { %s1043_s26 = smov [#allocation6]  }
  0x18   :  { %s54_s27 = sshll.u32 %s1043_s26, 4  ;;  %s55_s27 = int_to_ptr.vmem [resolvable:$true] %s54_s27 }
  0x19   :  { %s1023_s28 = scalar_lea.vmem %s55_s27, 16  ;;  %s1027_s29 = scalar_lea.vmem %s55_s27, 32 }
  0x1a   :  { %p1024_p10 = scmp.ne.s32.totalorder %s55_s27, %s1023_s28  ;;  %p1028_p11 = scmp.lt.s32.totalorder %s55_s27, %s55_s27 }
  0x1b   :  { %p1029_p12 = scmp.lt.s32.totalorder %s1027_s29, %s1023_s28 }
  0x1d   :  { %p1030_p13 = por %p1029_p12, %p1028_p11 }
  0x1f   :  { %p1031_p0 = pnand %p1030_p13, %p1024_p10 }
  0x21   :  { %1034 = shalt.err (!%p1031_p0)
}
  0x22   :  { %57 = dma.hbm_to_vmem [thread:$0]  %s1635_s6, 16, %s55_s27, [#allocation5]  }
  0x23   :  { %1035 = dma.done.wait [#allocation3], 2048  }
  0x24   :  { %1036 = vsyncadd [#allocation3], 4294965248 }
  0x25   :  { %1037 = dma.done.wait [#allocation5], 32  }
  0x26   :  { %1038 = vsyncadd [#allocation5], 4294967264  ;;  %v1108_v0 = vld [vmem:[#allocation2] sm:$0xff]  ;;  %vm119_vm0 = vcmask 261120   ;;  %v1122_v4 = vld [vmem:[#allocation2 + $0x10] sm:$0xff] }
  0x27   :  { %v1113_v1 = vld [vmem:[%s1632_s3] ss:$0 sm:$0xff]  ;;  %v1124_v5 = vld [vmem:[#allocation2 + $0x8] sm:$0xff]  ;;  %v1126_v6 = vld [vmem:[#allocation2 + $0x18] sm:$0xff] }
  0x28   :  { %v1118_v2 = vld [vmem:[%s1633_s4] ss:$0 sm:$0xff]  ;;  %v264_v3 = vmul.f32 %v1113_v1, %v1108_v0  ;;  %v266_v7 = vmul.f32 %v1113_v1, %v1122_v4  ;;  %v265_v8 = vmul.f32 %v1113_v1, %v1124_v5  ;;  %v267_v9 = vmul.f32 %v1113_v1, %v1126_v6  ;;  %v1138_v12 = vld [vmem:[#allocation2 + $0x28] sm:$0xff]  ;;  %v1158_v20 = vld [vmem:[#allocation2 + $0x30] sm:$0xff] }
  0x29   :  { %v89_v10 = vpack.c.bf16 %v1126_v6, %v1122_v4  ;;  %v1136_v11 = vld [vmem:[#allocation2 + $0x20] sm:$0xff]  ;;  %v269_v19 = vmul.f32 %v1113_v1, %v1138_v12  ;;  %v1160_v21 = vld [vmem:[#allocation2 + $0x38] sm:$0xff]  ;;  %v1168_v25 = vld [vmem:[#allocation2 + $0x48] sm:$0xff]  ;;  %v270_v31 = vmul.f32 %v1113_v1, %v1158_v20 }
  0x2a   :  { %v1141_v13 = vadd.f32 %v1118_v2, %v264_v3  ;;  %v268_v14 = vmul.f32 %v1113_v1, %v1136_v11  ;;  %v90_v15 = vpack.c.bf16 %v1138_v12, %v1136_v11  ;;  %v1148_v16 = vadd.f32 %v1118_v2, %v266_v7  ;;  %v1166_v24 = vld [vmem:[#allocation2 + $0x40] sm:$0xff]  ;;  %v1172_v27 = vld [vmem:[#allocation2 + $0x50] sm:$0xff]  ;;  %v1174_v28 = vld [vmem:[#allocation2 + $0x58] sm:$0xff] }
  0x2b   :  { %v1151_v17 = vadd.f32 %v1118_v2, %v265_v8  ;;  %v1154_v18 = vadd.f32 %v1118_v2, %v267_v9  ;;  %v91_v23 = vpack.c.bf16 %v1160_v21, %v1158_v20  ;;  %v1183_v32 = vld [vmem:[#allocation2 + $0x60] sm:$0xff]  ;;  %v1188_v34 = vadd.f32 %v1118_v2, %v269_v19  ;;  %v1194_v37 = vld [vmem:[#allocation2 + $0x68] sm:$0xff]  ;;  %v1214_v46 = vld [vmem:[#allocation2 + $0x70] sm:$0xff] }
  0x2c   :  { %v303_v22 = vsel %vm119_vm0, %v1141_v13, 0.0  ;;  %v309_v26 = vsel %vm119_vm0, %v1148_v16, 0.0  ;;  %v1179_v30 = vadd.f32 %v1118_v2, %v268_v14  ;;  %v271_v35 = vmul.f32 %v1113_v1, %v1160_v21  ;;  %v1216_v47 = vld [vmem:[#allocation2 + $0x78] sm:$0xff] }
  0x2d   :  { %304 = vadd.xlane.f32.xlu0 %v303_v22  ;;  %310 = vadd.xlane.f32.xlu1 %v309_v26  ;;  %v306_v29 = vsel %vm119_vm0, %v1151_v17, 0.0  ;;  %v312_v33 = vsel %vm119_vm0, %v1154_v18, 0.0  ;;  %v92_v36 = vpack.c.bf16 %v1168_v25, %v1166_v24  ;;  %v93_v38 = vpack.c.bf16 %v1174_v28, %v1172_v27 }
  0x2e   :  { %v94_v39 = vpack.c.bf16 %v1194_v37, %v1183_v32  ;;  %v315_v40 = vsel %vm119_vm0, %v1179_v30, 0.0  ;;  %v1203_v41 = vadd.f32 %v1118_v2, %v270_v31  ;;  %v272_v42 = vmul.f32 %v1113_v1, %v1166_v24 }
  0x2f   :  { %v318_v43 = vsel %vm119_vm0, %v1188_v34, 0.0  ;;  %v1210_v44 = vadd.f32 %v1118_v2, %v271_v35  ;;  %v273_v45 = vmul.f32 %v1113_v1, %v1168_v25  ;;  %v95_v48 = vpack.c.bf16 %v1216_v47, %v1214_v46 }
  0x30   :  { %v321_v49 = vsel %vm119_vm0, %v1203_v41, 0.0  ;;  %v1223_v50 = vadd.f32 %v1118_v2, %v272_v42  ;;  %v274_v51 = vmul.f32 %v1113_v1, %v1172_v27  ;;  %v275_v54 = vmul.f32 %v1113_v1, %v1174_v28 }
  0x31   :  { %307 = vadd.xlane.f32.xlu0 %v306_v29  ;;  %313 = vadd.xlane.f32.xlu1 %v312_v33  ;;  %v324_v52 = vsel %vm119_vm0, %v1210_v44, 0.0  ;;  %v1230_v53 = vadd.f32 %v1118_v2, %v273_v45  ;;  %v276_v57 = vmul.f32 %v1113_v1, %v1183_v32  ;;  %v277_v60 = vmul.f32 %v1113_v1, %v1194_v37 }
  0x32   :  { %v327_v55 = vsel %vm119_vm0, %v1223_v50, 0.0  ;;  %v1237_v56 = vadd.f32 %v1118_v2, %v274_v51  ;;  %v1244_v59 = vadd.f32 %v1118_v2, %v275_v54  ;;  %v278_v63 = vmul.f32 %v1113_v1, %v1214_v46 }
  0x33   :  { %v330_v58 = vsel %vm119_vm0, %v1230_v53, 0.0  ;;  %v1251_v62 = vadd.f32 %v1118_v2, %v276_v57  ;;  %v1258_v7 = vadd.f32 %v1118_v2, %v277_v60  ;;  %v279_v8 = vmul.f32 %v1113_v1, %v1216_v47 }
  0x34   :  { %v333_v61 = vsel %vm119_vm0, %v1237_v56, 0.0  ;;  %v336_v3 = vsel %vm119_vm0, %v1244_v59, 0.0  ;;  %v1265_v14 = vadd.f32 %v1118_v2, %v278_v63 }
  0x35   :  { %316 = vadd.xlane.f32.xlu0 %v315_v40  ;;  %319 = vadd.xlane.f32.xlu1 %v318_v43  ;;  %v339_v9 = vsel %vm119_vm0, %v1251_v62, 0.0  ;;  %v342_v19 = vsel %vm119_vm0, %v1258_v7, 0.0  ;;  %v1270_v22 = vadd.f32 %v1118_v2, %v279_v8 }
  0x36   :  { %v345_v26 = vsel %vm119_vm0, %v1265_v14, 0.0 }
  0x37   :  { %v348_v1 = vsel %vm119_vm0, %v1270_v22, 0.0 }
  0x39   :  { %322 = vadd.xlane.f32.xlu0 %v321_v49  ;;  %325 = vadd.xlane.f32.xlu1 %v324_v52 }
  0x3d   :  { %328 = vadd.xlane.f32.xlu0 %v327_v55  ;;  %331 = vadd.xlane.f32.xlu1 %v330_v58 }
  0x41   :  { %334 = vadd.xlane.f32.xlu0 %v333_v61  ;;  %337 = vadd.xlane.f32.xlu1 %v336_v3 }
  0x45   :  { %340 = vadd.xlane.f32.xlu0 %v339_v9  ;;  %343 = vadd.xlane.f32.xlu1 %v342_v19 }
  0x49   :  { %346 = vadd.xlane.f32.xlu0 %v345_v26  ;;  %349 = vadd.xlane.f32.xlu1 %v348_v1 }
  0xb6   :  { %v305_v29 = vpop.xlane.xlu0 %304  ;;  %v311_v33 = vpop.xlane.xlu1 %310 }
  0xb7   :  { %v352_v31 = vmul.f32 0.03125, %v305_v29  ;;  %v354_v35 = vmul.f32 0.03125, %v311_v33 }
  0xb9   :  { %v1277_v40 = vsub.f32 %v1141_v13, %v352_v31  ;;  %v1280_v2 = vsub.f32 %v1148_v16, %v354_v35 }
  0xba   :  { %v308_v42 = vpop.xlane.xlu0 %307  ;;  %v314_v45 = vpop.xlane.xlu1 %313 }
  0xbb   :  { %v353_v43 = vmul.f32 0.03125, %v308_v42  ;;  %v384_v49 = vmul.f32 %v1277_v40, %v1277_v40  ;;  %v355_v51 = vmul.f32 0.03125, %v314_v45  ;;  %v386_v52 = vmul.f32 %v1280_v2, %v1280_v2 }
  0xbd   :  { %v1287_v54 = vsub.f32 %v1151_v17, %v353_v43  ;;  %v400_v55 = vsel %vm119_vm0, %v384_v49, 0.0  ;;  %v1291_v13 = vsub.f32 %v1154_v18, %v355_v51  ;;  %v406_v60 = vsel %vm119_vm0, %v386_v52, 0.0 }
  0xbe   :  { %401 = vadd.xlane.f32.xlu0 %v400_v55  ;;  %v317_v16 = vpop.xlane.xlu0 %316  ;;  %v320_v58 = vpop.xlane.xlu1 %319 }
  0xbf   :  { %v356_v57 = vmul.f32 0.03125, %v317_v16  ;;  %v385_v61 = vmul.f32 %v1287_v54, %v1287_v54  ;;  %v357_v63 = vmul.f32 0.03125, %v320_v58  ;;  %v387_v3 = vmul.f32 %v1291_v13, %v1291_v13 }
  0xc1   :  { %v1299_v17 = vsub.f32 %v1179_v30, %v356_v57  ;;  %v403_v8 = vsel %vm119_vm0, %v385_v61, 0.0  ;;  %v1303_v18 = vsub.f32 %v1188_v34, %v357_v63  ;;  %v409_v1 = vsel %vm119_vm0, %v387_v3, 0.0 }
  0xc2   :  { %407 = vadd.xlane.f32.xlu0 %v406_v60  ;;  %404 = vadd.xlane.f32.xlu1 %v403_v8  ;;  %v323_v9 = vpop.xlane.xlu0 %322  ;;  %v326_v26 = vpop.xlane.xlu1 %325 }
  0xc3   :  { %v358_v19 = vmul.f32 0.03125, %v323_v9  ;;  %v388_v29 = vmul.f32 %v1299_v17, %v1299_v17  ;;  %v359_v31 = vmul.f32 0.03125, %v326_v26  ;;  %v389_v30 = vmul.f32 %v1303_v18, %v1303_v18 }
  0xc5   :  { %v1311_v33 = vsub.f32 %v1203_v41, %v358_v19  ;;  %v412_v34 = vsel %vm119_vm0, %v388_v29, 0.0  ;;  %v1315_v35 = vsub.f32 %v1210_v44, %v359_v31  ;;  %v415_v49 = vsel %vm119_vm0, %v389_v30, 0.0 }
  0xc6   :  { %410 = vadd.xlane.f32.xlu1 %v409_v1  ;;  %413 = vadd.xlane.f32.xlu0 %v412_v34  ;;  %v329_v42 = vpop.xlane.xlu0 %328  ;;  %v332_v45 = vpop.xlane.xlu1 %331 }
  0xc7   :  { %v360_v43 = vmul.f32 0.03125, %v329_v42  ;;  %v390_v51 = vmul.f32 %v1311_v33, %v1311_v33  ;;  %v361_v52 = vmul.f32 0.03125, %v332_v45  ;;  %v391_v41 = vmul.f32 %v1315_v35, %v1315_v35 }
  0xc9   :  { %v1323_v55 = vsub.f32 %v1223_v50, %v360_v43  ;;  %v418_v44 = vsel %vm119_vm0, %v390_v51, 0.0  ;;  %v1327_v16 = vsub.f32 %v1230_v53, %v361_v52  ;;  %v421_v61 = vsel %vm119_vm0, %v391_v41, 0.0 }
  0xca   :  { %416 = vadd.xlane.f32.xlu1 %v415_v49  ;;  %419 = vadd.xlane.f32.xlu0 %v418_v44  ;;  %v335_v57 = vpop.xlane.xlu0 %334  ;;  %v338_v60 = vpop.xlane.xlu1 %337 }
  0xcb   :  { %v362_v58 = vmul.f32 0.03125, %v335_v57  ;;  %v392_v63 = vmul.f32 %v1323_v55, %v1323_v55  ;;  %v363_v3 = vmul.f32 0.03125, %v338_v60  ;;  %v393_v50 = vmul.f32 %v1327_v16, %v1327_v16 }
  0xcd   :  { %v1335_v8 = vsub.f32 %v1237_v56, %v362_v58  ;;  %v424_v53 = vsel %vm119_vm0, %v392_v63, 0.0  ;;  %v1339_v9 = vsub.f32 %v1244_v59, %v363_v3  ;;  %v427_v29 = vsel %vm119_vm0, %v393_v50, 0.0  ;;  %v908_v3 = vld [vmem:[%s1630_s1] sm:$0xff]   ;;  %v909_v50 = vld [vmem:[%s1636_s7 + $0x8] sm:$0xff]  }
  0xce   :  { %422 = vadd.xlane.f32.xlu1 %v421_v61  ;;  %425 = vadd.xlane.f32.xlu0 %v424_v53  ;;  %v341_v19 = vpop.xlane.xlu0 %340  ;;  %v344_v1 = vpop.xlane.xlu1 %343  ;;  %v88_v53 = vpack.c.bf16 %v1124_v5, %v1108_v0 }
  0xcf   :  { %v364_v26 = vmul.f32 0.03125, %v341_v19  ;;  %v394_v31 = vmul.f32 %v1335_v8, %v1335_v8  ;;  %v365_v30 = vmul.f32 0.03125, %v344_v1  ;;  %v395_v56 = vmul.f32 %v1339_v9, %v1339_v9  ;;  %882 = vmatprep.subr.bf16.mxu1 %v909_v50  ;;  %v910_v19 = vld [vmem:[%s1636_s7] sm:$0xff]  }
  0xd0   :  { %866 = vmatprep.mubr.msk.bf16.mxu0 %vm119_vm0, %v88_v53  ;;  %883 = vmatpush3.bf16.msra.mxu1 %v909_v50 }
  0xd1   :  { %v1347_v34 = vsub.f32 %v1251_v62, %v364_v26  ;;  %v430_v59 = vsel %vm119_vm0, %v394_v31, 0.0  ;;  %v1351_v42 = vsub.f32 %v1258_v7, %v365_v30  ;;  %v433_v51 = vsel %vm119_vm0, %v395_v56, 0.0  ;;  %884 = vmatprep.subr.bf16.mxu1 %v910_v19  ;;  %v1415_v31 = vld [vmem:[#allocation4] ss:$0 sm:$0xff] }
  0xd2   :  { %428 = vadd.xlane.f32.xlu1 %v427_v29  ;;  %431 = vadd.xlane.f32.xlu0 %v430_v59  ;;  %v347_v43 = vpop.xlane.xlu0 %346  ;;  %v350_v49 = vpop.xlane.xlu1 %349 }
  0xd3   :  { %v366_v45 = vmul.f32 0.03125, %v347_v43  ;;  %v396_v52 = vmul.f32 %v1347_v34, %v1347_v34  ;;  %v367_v41 = vmul.f32 0.03125, %v350_v49  ;;  %v397_v62 = vmul.f32 %v1351_v42, %v1351_v42  ;;  %v1418_v49 = vld [vmem:[#allocation6] ss:$0 sm:$0xff] }
  0xd4   :  { %885 = vmatpush3.bf16.msra.mxu1 %v910_v19 }
  0xd5   :  { %v1359_v44 = vsub.f32 %v1265_v14, %v366_v45  ;;  %v436_v7 = vsel %vm119_vm0, %v396_v52, 0.0  ;;  %v1363_v57 = vsub.f32 %v1270_v22, %v367_v41  ;;  %v439_v58 = vsel %vm119_vm0, %v397_v62, 0.0  ;;  %v907_v22 = vld [vmem:[%s1630_s1 + $0x8] sm:$0xff]  }
  0xd6   :  { %434 = vadd.xlane.f32.xlu1 %v433_v51  ;;  %437 = vadd.xlane.f32.xlu0 %v436_v7 }
  0xd7   :  { %v398_v60 = vmul.f32 %v1359_v44, %v1359_v44  ;;  %v399_v61 = vmul.f32 %v1363_v57, %v1363_v57  ;;  %862 = vmatprep.subr.bf16.mxu0 %v907_v22 }
  0xd8   :  { %863 = vmatpush3.bf16.msra.mxu0 %v907_v22 }
  0xd9   :  { %v442_v63 = vsel %vm119_vm0, %v398_v60, 0.0  ;;  %v445_v14 = vsel %vm119_vm0, %v399_v61, 0.0  ;;  %864 = vmatprep.subr.bf16.mxu0 %v908_v3 }
  0xda   :  { %440 = vadd.xlane.f32.xlu1 %v439_v58  ;;  %443 = vadd.xlane.f32.xlu0 %v442_v63 }
  0xdc   :  { %865 = vmatpush3.bf16.msra.mxu0 %v908_v3 }
  0xde   :  { %446 = vadd.xlane.f32.xlu1 %v445_v14 }
  0xdf   :  { %867 = vmatmul.mubr.msk.bf16.vlgmr.msra.gmra.mxu0 %vm119_vm0, %v89_v10 }
  0xe0   :  { %870 = vmatprep.mubr.msk.bf16.mxu0 %vm119_vm0, %v90_v15 }
  0xe7   :  { %871 = vmatmul.mubr.msk.bf16.gmra.mxu0 %vm119_vm0, %v91_v23 }
  0xe8   :  { %874 = vmatprep.mubr.msk.bf16.mxu0 %vm119_vm0, %v92_v36 }
  0xef   :  { %875 = vmatmul.mubr.msk.bf16.gmra.mxu0 %vm119_vm0, %v93_v38 }
  0xf0   :  { %878 = vmatprep.mubr.msk.bf16.mxu0 %vm119_vm0, %v94_v39 }
  0xf7   :  { %879 = vmatmul.mubr.msk.bf16.gmra.mxu0 %vm119_vm0, %v95_v48 }
 0x147   :  { %v402_v0 = vpop.xlane.xlu0 %401 }
 0x148   :  { %v448_v4 = vmul.f32 0.03125, %v402_v0 }
 0x14a   :  { %v464_v5 = vadd.f32 1e-05, %v448_v4 }
 0x14b   :  { %v405_v6 = vpop.xlane.xlu1 %404  ;;  %v408_v10 = vpop.xlane.xlu0 %407 }
 0x14c   :  { %911 = vrsqrt.f32 %v464_v5  ;;  %v449_v11 = vmul.f32 0.03125, %v405_v6  ;;  %v450_v12 = vmul.f32 0.03125, %v408_v10 }
 0x14e   :  { %v465_v15 = vadd.f32 1e-05, %v449_v11  ;;  %v466_v20 = vadd.f32 1e-05, %v450_v12 }
 0x14f   :  { %v411_v21 = vpop.xlane.xlu1 %410  ;;  %v414_v23 = vpop.xlane.xlu0 %413 }
 0x150   :  { %913 = vrsqrt.f32 %v465_v15  ;;  %v451_v24 = vmul.f32 0.03125, %v411_v21  ;;  %v452_v25 = vmul.f32 0.03125, %v414_v23 }
 0x151   :  { %915 = vrsqrt.f32 %v466_v20 }
 0x152   :  { %v467_v27 = vadd.f32 1e-05, %v451_v24  ;;  %v468_v28 = vadd.f32 1e-05, %v452_v25 }
 0x153   :  { %v417_v32 = vpop.xlane.xlu1 %416  ;;  %v420_v36 = vpop.xlane.xlu0 %419 }
 0x154   :  { %917 = vrsqrt.f32 %v467_v27  ;;  %v453_v37 = vmul.f32 0.03125, %v417_v32  ;;  %v454_v38 = vmul.f32 0.03125, %v420_v36 }
 0x155   :  { %919 = vrsqrt.f32 %v468_v28 }
 0x156   :  { %v469_v39 = vadd.f32 1e-05, %v453_v37  ;;  %v470_v46 = vadd.f32 1e-05, %v454_v38 }
 0x157   :  { %v423_v47 = vpop.xlane.xlu1 %422  ;;  %v426_v48 = vpop.xlane.xlu0 %425 }
 0x158   :  { %921 = vrsqrt.f32 %v469_v39  ;;  %v455_v26 = vmul.f32 0.03125, %v423_v47  ;;  %v456_v1 = vmul.f32 0.03125, %v426_v48 }
 0x159   :  { %v912_v29 = vpop.eup %911  ;;  %923 = vrsqrt.f32 %v470_v46 }
 0x15a   :  { %v471_v30 = vadd.f32 1e-05, %v455_v26  ;;  %v472_v56 = vadd.f32 1e-05, %v456_v1  ;;  %v496_v59 = vmul.f32 %v912_v29, %v1277_v40 }
 0x15b   :  { %v429_v43 = vpop.xlane.xlu1 %428  ;;  %v432_v45 = vpop.xlane.xlu0 %431 }
 0x15c   :  { %925 = vrsqrt.f32 %v471_v30  ;;  %v457_v51 = vmul.f32 0.03125, %v429_v43  ;;  %v458_v52 = vmul.f32 0.03125, %v432_v45  ;;  %v519_v41 = vmul.f32 %v1415_v31, %v496_v59 }
 0x15d   :  { %v914_v62 = vpop.eup %913  ;;  %927 = vrsqrt.f32 %v472_v56 }
 0x15e   :  { %v916_v7 = vpop.eup %915  ;;  %v473_v58 = vadd.f32 1e-05, %v457_v51  ;;  %v474_v60 = vadd.f32 1e-05, %v458_v52  ;;  %v497_v61 = vmul.f32 %v914_v62, %v1287_v54  ;;  %v1423_v63 = vadd.f32 %v1418_v49, %v519_v41 }
 0x15f   :  { %v498_v40 = vmul.f32 %v916_v7, %v1280_v2  ;;  %v435_v14 = vpop.xlane.xlu1 %434  ;;  %v438_v22 = vpop.xlane.xlu0 %437 }
 0x160   :  { %929 = vrsqrt.f32 %v473_v58  ;;  %v459_v3 = vmul.f32 0.03125, %v435_v14  ;;  %v460_v50 = vmul.f32 0.03125, %v438_v22  ;;  %v520_v53 = vmul.f32 %v1415_v31, %v497_v61 }
 0x161   :  { %v918_v19 = vpop.eup %917  ;;  %931 = vrsqrt.f32 %v474_v60  ;;  %v574_v0 = vmul.f32 0.70710677, %v1423_v63  ;;  %v521_v4 = vmul.f32 %v1415_v31, %v498_v40 }
 0x162   :  { %v920_v5 = vpop.eup %919  ;;  %v499_v54 = vmul.f32 %v918_v19, %v1291_v13  ;;  %v475_v6 = vadd.f32 1e-05, %v459_v3  ;;  %v476_v10 = vadd.f32 1e-05, %v460_v50  ;;  %v1431_v2 = vadd.f32 %v1418_v49, %v520_v53 }
 0x163   :  { %v500_v11 = vmul.f32 %v920_v5, %v1299_v17  ;;  %v441_v12 = vpop.xlane.xlu1 %440  ;;  %v444_v15 = vpop.xlane.xlu0 %443  ;;  %933 = verf.f32 %v574_v0  ;;  %v1435_v20 = vadd.f32 %v1418_v49, %v521_v4 }
 0x164   :  { %935 = vrsqrt.f32 %v475_v6  ;;  %v461_v21 = vmul.f32 0.03125, %v441_v12  ;;  %v462_v23 = vmul.f32 0.03125, %v444_v15  ;;  %v575_v13 = vmul.f32 0.70710677, %v1431_v2 }
 0x165   :  { %v922_v24 = vpop.eup %921  ;;  %937 = vrsqrt.f32 %v476_v10  ;;  %v522_v25 = vmul.f32 %v1415_v31, %v499_v54  ;;  %v576_v36 = vmul.f32 0.70710677, %v1435_v20  ;;  %v523_v39 = vmul.f32 %v1415_v31, %v500_v11 }
 0x166   :  { %v924_v27 = vpop.eup %923  ;;  %v501_v28 = vmul.f32 %v922_v24, %v1303_v18  ;;  %v477_v32 = vadd.f32 1e-05, %v461_v21  ;;  %v478_v17 = vadd.f32 1e-05, %v462_v23  ;;  %939 = verf.f32 %v575_v13 }
 0x167   :  { %v447_v37 = vpop.xlane.xlu1 %446  ;;  %v1442_v38 = vadd.f32 %v1418_v49, %v522_v25  ;;  %v502_v46 = vmul.f32 %v924_v27, %v1311_v33  ;;  %v1449_v1 = vadd.f32 %v1418_v49, %v523_v39  ;;  %v558_v6 = vmul.f32 0.5, %v1423_v63 }
 0x168   :  { %941 = vrsqrt.f32 %v477_v32  ;;  %v463_v47 = vmul.f32 0.03125, %v447_v37  ;;  %v524_v48 = vmul.f32 %v1415_v31, %v501_v28  ;;  %v559_v12 = vmul.f32 0.5, %v1431_v2 }
 0x169   :  { %v926_v26 = vpop.eup %925  ;;  %943 = vrsqrt.f32 %v478_v17  ;;  %v577_v18 = vmul.f32 0.70710677, %v1442_v38  ;;  %v578_v43 = vmul.f32 0.70710677, %v1449_v1  ;;  %v525_v51 = vmul.f32 %v1415_v31, %v502_v46 }
 0x16a   :  { %v928_v29 = vpop.eup %927  ;;  %v503_v30 = vmul.f32 %v926_v26, %v1315_v35  ;;  %v479_v56 = vadd.f32 1e-05, %v463_v47  ;;  %945 = verf.f32 %v576_v36  ;;  %v1453_v59 = vadd.f32 %v1418_v49, %v524_v48 }
 0x16b   :  { %v504_v33 = vmul.f32 %v928_v29, %v1323_v55  ;;  %947 = verf.f32 %v577_v18  ;;  %v1463_v55 = vadd.f32 %v1418_v49, %v525_v51  ;;  %v560_v13 = vmul.f32 0.5, %v1435_v20 }
 0x16c   :  { %949 = vrsqrt.f32 %v479_v56  ;;  %v579_v45 = vmul.f32 0.70710677, %v1453_v59  ;;  %v526_v41 = vmul.f32 %v1415_v31, %v503_v30  ;;  %v561_v2 = vmul.f32 0.5, %v1442_v38 }
 0x16d   :  { %v930_v52 = vpop.eup %929  ;;  %951 = verf.f32 %v578_v43  ;;  %v527_v35 = vmul.f32 %v1415_v31, %v504_v33  ;;  %v580_v14 = vmul.f32 0.70710677, %v1463_v55  ;;  %v562_v18 = vmul.f32 0.5, %v1449_v1 }
 0x16e   :  { %v932_v62 = vpop.eup %931  ;;  %v505_v7 = vmul.f32 %v930_v52, %v1327_v16  ;;  %953 = verf.f32 %v579_v45  ;;  %v1467_v60 = vadd.f32 %v1418_v49, %v526_v41  ;;  %v563_v45 = vmul.f32 0.5, %v1453_v59 }
 0x16f   :  { %v506_v58 = vmul.f32 %v932_v62, %v1335_v8  ;;  %v1470_v61 = vadd.f32 %v1418_v49, %v527_v35  ;;  %955 = verf.f32 %v580_v14 }
 0x170   :  { %v934_v40 = vpop.eup %933  ;;  %v528_v22 = vmul.f32 %v1415_v31, %v505_v7  ;;  %v581_v16 = vmul.f32 0.70710677, %v1467_v60 }
 0x171   :  { %v936_v3 = vpop.eup %935  ;;  %v582_v19 = vmul.f32 0.70710677, %v1470_v61  ;;  %v606_v4 = vadd.f32 1.0, %v934_v40  ;;  %v529_v5 = vmul.f32 %v1415_v31, %v506_v58 }
 0x172   :  { %v938_v50 = vpop.eup %937  ;;  %v507_v53 = vmul.f32 %v936_v3, %v1339_v9  ;;  %v1477_v8 = vadd.f32 %v1418_v49, %v528_v22  ;;  %957 = verf.f32 %v581_v16 }
 0x173   :  { %v508_v0 = vmul.f32 %v938_v50, %v1347_v34  ;;  %v940_v54 = vpop.eup %939  ;;  %959 = verf.f32 %v582_v19  ;;  %v1487_v21 = vadd.f32 %v1418_v49, %v529_v5  ;;  %v622_v27 = vmul.f32 %v606_v4, %v558_v6 }
 0x174   :  { %v583_v10 = vmul.f32 0.70710677, %v1477_v8  ;;  %v530_v9 = vmul.f32 %v1415_v31, %v507_v53  ;;  %v607_v15 = vadd.f32 1.0, %v940_v54  ;;  %v564_v50 = vmul.f32 0.5, %v1463_v55 }
 0x175   :  { %v942_v11 = vpop.eup %941  ;;  %v531_v34 = vmul.f32 %v1415_v31, %v508_v0  ;;  %v584_v32 = vmul.f32 0.70710677, %v1487_v21  ;;  %v565_v53 = vmul.f32 0.5, %v1467_v60  ;;  %v567_v6 = vmul.f32 0.5, %v1477_v8 }
 0x176   :  { %v944_v23 = vpop.eup %943  ;;  %v509_v24 = vmul.f32 %v942_v11, %v1351_v42  ;;  %961 = verf.f32 %v583_v10  ;;  %v1493_v63 = vadd.f32 %v1418_v49, %v530_v9  ;;  %v623_v28 = vmul.f32 %v607_v15, %v559_v12 }
 0x177   :  { %v946_v25 = vpop.eup %945  ;;  %v510_v36 = vmul.f32 %v944_v23, %v1359_v44  ;;  %963 = verf.f32 %v584_v32  ;;  %v1501_v48 = vadd.f32 %v1418_v49, %v531_v34  ;;  %v568_v23 = vmul.f32 0.5, %v1487_v21 }
 0x178   :  { %v948_v17 = vpop.eup %947  ;;  %v608_v37 = vadd.f32 1.0, %v946_v25  ;;  %v585_v39 = vmul.f32 0.70710677, %v1493_v63  ;;  %v532_v42 = vmul.f32 %v1415_v31, %v509_v24  ;;  %v638_v46 = vpack.c.bf16 %v623_v28, %v622_v27 }
 0x179   :  { %v950_v20 = vpop.eup %949  ;;  %v609_v47 = vadd.f32 1.0, %v948_v17  ;;  %v586_v43 = vmul.f32 0.70710677, %v1501_v48  ;;  %v533_v41 = vmul.f32 %v1415_v31, %v510_v36  ;;  %v569_v24 = vmul.f32 0.5, %v1493_v63 }
 0x17a   :  { %v952_v26 = vpop.eup %951  ;;  %v511_v38 = vmul.f32 %v950_v20, %v1363_v57  ;;  %965 = verf.f32 %v585_v39  ;;  %v555_v44 = vadd.f32 %v1418_v49, %v532_v42  ;;  %886 = vmatprep.mubr.msk.bf16.mxu1 %vm119_vm0, %v638_v46  ;;  %v624_v30 = vmul.f32 %v608_v37, %v560_v13 }
 0x17b   :  { %v954_v29 = vpop.eup %953  ;;  %v625_v56 = vmul.f32 %v609_v47, %v561_v2  ;;  %v610_v33 = vadd.f32 1.0, %v952_v26  ;;  %967 = verf.f32 %v586_v43  ;;  %v556_v7 = vadd.f32 %v1418_v49, %v533_v41 }
 0x17c   :  { %v611_v51 = vadd.f32 1.0, %v954_v29  ;;  %v587_v52 = vmul.f32 0.70710677, %v555_v44  ;;  %v534_v1 = vmul.f32 %v1415_v31, %v511_v38  ;;  %v956_v58 = vpop.eup %955  ;;  %v570_v32 = vmul.f32 0.5, %v1501_v48  ;;  %v816_v48 = vld [vmem:[%s1631_s2] ss:$0 sm:$0xff] }
 0x17d   :  { %v639_v57 = vpack.c.bf16 %v625_v56, %v624_v30  ;;  %v626_v35 = vmul.f32 %v610_v33, %v562_v18  ;;  %v612_v22 = vadd.f32 1.0, %v956_v58  ;;  %v588_v3 = vmul.f32 0.70710677, %v556_v7 }
 0x17e   :  { %v627_v62 = vmul.f32 %v611_v51, %v563_v45  ;;  %969 = verf.f32 %v587_v52  ;;  %v557_v40 = vadd.f32 %v1418_v49, %v534_v1  ;;  %v566_v49 = vmul.f32 0.5, %v1470_v61 }
 0x17f   :  { %887 = vmatmul.mubr.msk.bf16.vlgmr.msra.gmra.mxu1 %vm119_vm0, %v639_v57  ;;  %v958_v14 = vpop.eup %957  ;;  %971 = verf.f32 %v588_v3  ;;  %v628_v5 = vmul.f32 %v612_v22, %v564_v50  ;;  %v571_v17 = vmul.f32 0.5, %v555_v44  ;;  %v572_v46 = vmul.f32 0.5, %v556_v7 }
 0x180   :  { %v640_v59 = vpack.c.bf16 %v627_v62, %v626_v35  ;;  %v960_v16 = vpop.eup %959  ;;  %v613_v31 = vadd.f32 1.0, %v958_v14  ;;  %v589_v19 = vmul.f32 0.70710677, %v557_v40  ;;  %v573_v47 = vmul.f32 0.5, %v557_v40 }
 0x181   :  { %v614_v0 = vadd.f32 1.0, %v960_v16 }
 0x182   :  { %890 = vmatprep.mubr.msk.bf16.mxu1 %vm119_vm0, %v640_v59  ;;  %v629_v54 = vmul.f32 %v613_v31, %v565_v53  ;;  %973 = verf.f32 %v589_v19 }
 0x183   :  { %v962_v4 = vpop.eup %961  ;;  %v630_v55 = vmul.f32 %v614_v0, %v566_v49 }
 0x184   :  { %v615_v10 = vadd.f32 1.0, %v962_v4  ;;  %v641_v9 = vpack.c.bf16 %v629_v54, %v628_v5  ;;  %v964_v11 = vpop.eup %963 }
 0x185   :  { %v616_v15 = vadd.f32 1.0, %v964_v11 }
 0x186   :  { %v631_v12 = vmul.f32 %v615_v10, %v567_v6 }
 0x187   :  { %v966_v60 = vpop.eup %965  ;;  %891 = vmatmul.mubr.msk.bf16.gmra.mxu1 %vm119_vm0, %v641_v9  ;;  %v632_v61 = vmul.f32 %v616_v15, %v568_v23  ;;  %v831_v9 = vld [vmem:[%s1637_s8] ss:$0 sm:$0xff] }
 0x188   :  { %v642_v34 = vpack.c.bf16 %v631_v12, %v630_v55  ;;  %v617_v13 = vadd.f32 1.0, %v966_v60  ;;  %v968_v25 = vpop.eup %967 }
 0x189   :  { %v618_v28 = vadd.f32 1.0, %v968_v25 }
 0x18a   :  { %894 = vmatprep.mubr.msk.bf16.mxu1 %vm119_vm0, %v642_v34  ;;  %v633_v8 = vmul.f32 %v617_v13, %v569_v24 }
 0x18b   :  { %v970_v27 = vpop.eup %969  ;;  %v634_v37 = vmul.f32 %v618_v28, %v570_v32 }
 0x18c   :  { %v643_v2 = vpack.c.bf16 %v633_v8, %v632_v61  ;;  %v619_v36 = vadd.f32 1.0, %v970_v27  ;;  %v972_v42 = vpop.eup %971 }
 0x18d   :  { %v620_v20 = vadd.f32 1.0, %v972_v42 }
 0x18e   :  { %v635_v39 = vmul.f32 %v619_v36, %v571_v17 }
 0x18f   :  { %895 = vmatmul.mubr.msk.bf16.gmra.mxu1 %vm119_vm0, %v643_v2  ;;  %v974_v21 = vpop.eup %973  ;;  %v636_v38 = vmul.f32 %v620_v20, %v572_v46 }
 0x190   :  { %v644_v63 = vpack.c.bf16 %v635_v39, %v634_v37  ;;  %v621_v26 = vadd.f32 1.0, %v974_v21 }
 0x192   :  { %898 = vmatprep.mubr.msk.bf16.mxu1 %vm119_vm0, %v644_v63  ;;  %v637_v18 = vmul.f32 %v621_v26, %v573_v47 }
 0x194   :  { %v645_v29 = vpack.c.bf16 %v637_v18, %v636_v38 }
 0x197   :  { %899 = vmatmul.mubr.msk.bf16.gmra.mxu1 %vm119_vm0, %v645_v29 }
 0x19f   :  { %v868_v44 = vpop.f32.mrf.mxu0 }
 0x1a0   :  { %v187_v30 = vadd.f32 %v868_v44, %v816_v48 }
 0x1a1   :  { %v178_v56 = vpop.f32.mrf.mxu0 }
 0x1a2   :  { %243 = vst [vmem:[%s1638_s9 + $0x10] sm:$0xff] %v187_v30  ;;  %v179_v33 = vadd.f32 %v816_v48, %v178_v56 }
 0x1a3   :  { %v869_v43 = vpop.f32.mrf.mxu0 }
 0x1a4   :  { %241 = vst [vmem:[%s1638_s9] sm:$0xff] %v179_v33  ;;  %v190_v45 = vadd.f32 %v869_v43, %v816_v48 }
 0x1a5   :  { %v181_v51 = vpop.f32.mrf.mxu0 }
 0x1a6   :  { %244 = vst [vmem:[%s1638_s9 + $0x18] sm:$0xff] %v190_v45  ;;  %v182_v52 = vadd.f32 %v816_v48, %v181_v51 }
 0x1a7   :  { %v872_v41 = vpop.f32.mrf.mxu0 }
 0x1a8   :  { %242 = vst [vmem:[%s1638_s9 + $0x8] sm:$0xff] %v182_v52  ;;  %v203_v57 = vadd.f32 %v872_v41, %v816_v48 }
 0x1a9   :  { %v194_v1 = vpop.f32.mrf.mxu0 }
 0x1aa   :  { %247 = vst [vmem:[%s1638_s9 + $0x30] sm:$0xff] %v203_v57  ;;  %v195_v35 = vadd.f32 %v816_v48, %v194_v1 }
 0x1ab   :  { %v873_v62 = vpop.f32.mrf.mxu0 }
 0x1ac   :  { %245 = vst [vmem:[%s1638_s9 + $0x20] sm:$0xff] %v195_v35  ;;  %v206_v7 = vadd.f32 %v873_v62, %v816_v48 }
 0x1ad   :  { %v197_v58 = vpop.f32.mrf.mxu0 }
 0x1ae   :  { %248 = vst [vmem:[%s1638_s9 + $0x38] sm:$0xff] %v206_v7  ;;  %v198_v40 = vadd.f32 %v816_v48, %v197_v58 }
 0x1af   :  { %v876_v14 = vpop.f32.mrf.mxu0 }
 0x1b0   :  { %246 = vst [vmem:[%s1638_s9 + $0x28] sm:$0xff] %v198_v40  ;;  %v219_v59 = vadd.f32 %v876_v14, %v816_v48 }
 0x1b1   :  { %v210_v22 = vpop.f32.mrf.mxu0 }
 0x1b2   :  { %251 = vst [vmem:[%s1638_s9 + $0x50] sm:$0xff] %v219_v59  ;;  %v211_v3 = vadd.f32 %v816_v48, %v210_v22 }
 0x1b3   :  { %v877_v16 = vpop.f32.mrf.mxu0 }
 0x1b4   :  { %249 = vst [vmem:[%s1638_s9 + $0x40] sm:$0xff] %v211_v3  ;;  %v222_v50 = vadd.f32 %v877_v16, %v816_v48 }
 0x1b5   :  { %v213_v53 = vpop.f32.mrf.mxu0 }
 0x1b6   :  { %252 = vst [vmem:[%s1638_s9 + $0x58] sm:$0xff] %v222_v50  ;;  %v214_v31 = vadd.f32 %v816_v48, %v213_v53 }
 0x1b7   :  { %v880_v19 = vpop.f32.mrf.mxu0 }
 0x1b8   :  { %250 = vst [vmem:[%s1638_s9 + $0x48] sm:$0xff] %v214_v31  ;;  %v235_v0 = vadd.f32 %v880_v19, %v816_v48 }
 0x1b9   :  { %v226_v4 = vpop.f32.mrf.mxu0 }
 0x1ba   :  { %255 = vst [vmem:[%s1638_s9 + $0x70] sm:$0xff] %v235_v0  ;;  %v227_v5 = vadd.f32 %v816_v48, %v226_v4 }
 0x1bb   :  { %v881_v54 = vpop.f32.mrf.mxu0 }
 0x1bc   :  { %253 = vst [vmem:[%s1638_s9 + $0x60] sm:$0xff] %v227_v5  ;;  %v238_v49 = vadd.f32 %v881_v54, %v816_v48 }
 0x1bd   :  { %v229_v6 = vpop.f32.mrf.mxu0 }
 0x1be   :  { %256 = vst [vmem:[%s1638_s9 + $0x78] sm:$0xff] %v238_v49  ;;  %v230_v10 = vadd.f32 %v816_v48, %v229_v6 }
 0x1c0   :  { %254 = vst [vmem:[%s1638_s9 + $0x68] sm:$0xff] %v230_v10 }
 0x23f   :  { %v888_v11 = vpop.f32.mrf.mxu1 }
 0x240   :  { %v736_v55 = vadd.f32 %v888_v11, %v831_v9 }
 0x241   :  { %v727_v12 = vpop.f32.mrf.mxu1 }
 0x242   :  { %792 = vst [vmem:[%s1639_s10 + $0x10] sm:$0xff] %v736_v55  ;;  %v728_v60 = vadd.f32 %v831_v9, %v727_v12 }
 0x243   :  { %v889_v15 = vpop.f32.mrf.mxu1 }
 0x244   :  { %790 = vst [vmem:[%s1639_s10] sm:$0xff] %v728_v60  ;;  %v739_v34 = vadd.f32 %v889_v15, %v831_v9 }
 0x245   :  { %v730_v23 = vpop.f32.mrf.mxu1 }
 0x246   :  { %793 = vst [vmem:[%s1639_s10 + $0x18] sm:$0xff] %v739_v34  ;;  %v731_v24 = vadd.f32 %v831_v9, %v730_v23 }
 0x247   :  { %v892_v13 = vpop.f32.mrf.mxu1 }
 0x248   :  { %791 = vst [vmem:[%s1639_s10 + $0x8] sm:$0xff] %v731_v24  ;;  %v752_v25 = vadd.f32 %v892_v13, %v831_v9 }
 0x249   :  { %v743_v61 = vpop.f32.mrf.mxu1 }
 0x24a   :  { %796 = vst [vmem:[%s1639_s10 + $0x30] sm:$0xff] %v752_v25  ;;  %v744_v8 = vadd.f32 %v831_v9, %v743_v61 }
 0x24b   :  { %v893_v27 = vpop.f32.mrf.mxu1 }
 0x24c   :  { %794 = vst [vmem:[%s1639_s10 + $0x20] sm:$0xff] %v744_v8  ;;  %v755_v28 = vadd.f32 %v893_v27, %v831_v9 }
 0x24d   :  { %v746_v2 = vpop.f32.mrf.mxu1 }
 0x24e   :  { %797 = vst [vmem:[%s1639_s10 + $0x38] sm:$0xff] %v755_v28  ;;  %v747_v32 = vadd.f32 %v831_v9, %v746_v2 }
 0x24f   :  { %v896_v17 = vpop.f32.mrf.mxu1 }
 0x250   :  { %795 = vst [vmem:[%s1639_s10 + $0x28] sm:$0xff] %v747_v32  ;;  %v768_v36 = vadd.f32 %v896_v17, %v831_v9 }
 0x251   :  { %v759_v37 = vpop.f32.mrf.mxu1 }
 0x252   :  { %800 = vst [vmem:[%s1639_s10 + $0x50] sm:$0xff] %v768_v36  ;;  %v760_v39 = vadd.f32 %v831_v9, %v759_v37 }
 0x253   :  { %v897_v42 = vpop.f32.mrf.mxu1 }
 0x254   :  { %798 = vst [vmem:[%s1639_s10 + $0x40] sm:$0xff] %v760_v39  ;;  %v771_v21 = vadd.f32 %v897_v42, %v831_v9 }
 0x255   :  { %v762_v63 = vpop.f32.mrf.mxu1 }
 0x256   :  { %801 = vst [vmem:[%s1639_s10 + $0x58] sm:$0xff] %v771_v21  ;;  %v763_v20 = vadd.f32 %v831_v9, %v762_v63 }
 0x257   :  { %v900_v46 = vpop.f32.mrf.mxu1 }
 0x258   :  { %799 = vst [vmem:[%s1639_s10 + $0x48] sm:$0xff] %v763_v20  ;;  %v784_v47 = vadd.f32 %v900_v46, %v831_v9 }
 0x259   :  { %v775_v26 = vpop.f32.mrf.mxu1 }
 0x25a   :  { %804 = vst [vmem:[%s1639_s10 + $0x70] sm:$0xff] %v784_v47  ;;  %v776_v38 = vadd.f32 %v831_v9, %v775_v26 }
 0x25b   :  { %v901_v18 = vpop.f32.mrf.mxu1 }
 0x25c   :  { %802 = vst [vmem:[%s1639_s10 + $0x60] sm:$0xff] %v776_v38  ;;  %v787_v29 = vadd.f32 %v901_v18, %v831_v9 }
 0x25d   :  { %v778_v48 = vpop.f32.mrf.mxu1 }
 0x25e   :  { %805 = vst [vmem:[%s1639_s10 + $0x78] sm:$0xff] %v787_v29  ;;  %v779_v44 = vadd.f32 %v831_v9, %v778_v48 }
 0x260   :  { %803 = vst [vmem:[%s1639_s10 + $0x68] sm:$0xff] %v779_v44 }
 0x261   :  { %814 = vsyncpa [#allocation3], 1 }
 0x262   :  { %815 = vsyncpa [#allocation5], 1 }

// kernel: dcnv3_block_forward.8
= control target key start
LH: loop header
LB: loop body
LE: loop exit
PB: predicated region body
PF: predicated region fallthrough
CT: control target
= control target key end

     0   :  { %s766_s0 = inlined_call_operand.vmem [shape: s32[2,256], index: 0, kind: input, shape index: {}]   ;;  %s767_s2 = inlined_call_operand.vmem [shape: f32[2,100,128], index: 2, kind: input, shape index: {}]   ;;  %s768_s3 = inlined_call_operand.vmem [shape: bf16[128,128], index: 3, kind: input, shape index: {}]   ;;  %s769_s4 = inlined_call_operand.vmem [shape: f32[1,128], index: 4, kind: input, shape index: {}]   ;;  %s770_s5 = inlined_call_operand.vmem [shape: f32[2,64,128], index: 5, kind: output, shape index: {}]   ;;  %s771_s1 = inlined_call_operand.vmem [shape: f32[2,256], index: 1, kind: input, shape index: {}]  }
   0x1   :  { %772 = sst [smem:[#allocation7_spill]] %s767_s2  ;;  %s10_s20 = sshll.u32 %s766_s0, 4  ;;  %s11_s20 = int_to_ptr.vmem [resolvable:$true] %s10_s20 }
   0x2   :  { %s14_s23 = sshll.u32 %s771_s1, 4  ;;  %s588_s24 = scalar_lea.vmem %s11_s20, 64  ;;  %s15_s23 = int_to_ptr.vmem [resolvable:$true] %s14_s23 }
   0x3   :  { %p589_p0 = scmp.ne.s32.totalorder %s11_s20, %s588_s24  ;;  %p593_p1 = scmp.lt.s32.totalorder %s11_s20, %s11_s20 }
   0x4   :  { %p594_p2 = scmp.lt.s32.totalorder %s588_s24, %s588_s24 }
   0x6   :  { %p595_p3 = por %p594_p2, %p593_p1 }
   0x8   :  { %p596_p4 = pnand %p595_p3, %p589_p0 }
   0xa   :  { %599 = shalt.err (!%p596_p4)  }
   0xb   :  { %s630_s25 = smov [#allocation4]   ;;  %s600_s26 = scalar_lea.vmem %s15_s23, 64 }
   0xc   :  { %13 = dma.vmem_to_smem %s11_s20, 64, %s630_s25, [#allocation3] }
   0xd   :  { %p601_p5 = scmp.ne.s32.totalorder %s15_s23, %s600_s26  ;;  %p605_p6 = scmp.lt.s32.totalorder %s15_s23, %s15_s23 }
   0xe   :  { %p606_p7 = scmp.lt.s32.totalorder %s600_s26, %s600_s26 }
  0x10   :  { %p607_p8 = por %p606_p7, %p605_p6 }
  0x12   :  { %p608_p9 = pnand %p607_p8, %p601_p5 }
  0x14   :  { %611 = shalt.err (!%p608_p9)  }
  0x15   :  { %s631_s0 = smov [#allocation5]  }
  0x16   :  { %17 = dma.vmem_to_smem %s15_s23, 64, %s631_s0, [#allocation3] }
  0x17   :  { %620 = dma.done.wait [#allocation3], 128 }
  0x18   :  { %621 = vsyncadd [#allocation3], 4294967168 }
  0x19   :  { %19 = sfence }
  0x1a   :  { %s668_s1 = smov 0  }
  0x1b LB: > { %s674_s27 = sadd.s32 4294967295, %s624_s1   ;;  %p486_p10 = scmp.ge.s32.totalorder %s624_s1, 1  ;;  %s624_s1 = sphi %s668_s1, %s25_s1  }
  0x1c   : > { %p149_p11 = scmp.lt.s32.totalorder %s624_s1, 3 }
  0x1e   : > { %p150_p12 = pnand %p486_p10, %p149_p11 }
  0x1f   : > { %p173_p13 = scmp.lt.s32.totalorder (!%p150_p12), %s674_s27, 1  ;;  %s773_s2 = sld [smem:[#allocation7_spill]] (!%p150_p12) }
  0x20   : > { %153 = sbr.rel (%p150_p12) target bundleno = 300 (0x12c), region = 32  ;;  %s690_s12 = smov (!%p150_p12), 0  }
  0x25   : > { %s174_s28 = scalar_select %p173_p13, %s674_s27, 1 }
  0x27   : > { %s561_s29 = smul.u32 104, %s174_s28  ;;  %s508_s30 = sshll.u32 %s174_s28, 6 }
  0x28   : > { %s683_s8 = scalar_lea.vmem %s770_s5, %s508_s30 }
  0x29   : > { %s688_s11 = scalar_lea.vmem %s773_s2, %s561_s29 }
  0x2a LB: >> { %s193_s13 = sshra.s32 %s674_s27, 1  ;;  %s699_s15 = sshll.u32 %s628_s12, 2  ;;  %s628_s12 = sphi %s690_s12, %s189_s12  }
  0x2b   : >> { %s696_s14 = sshll.u32 %s193_s13, 1  ;;  %s199_s16 = sand.u32 1, %s674_s27 }
  0x2c   : >> { %s191_s17 = sshra.s32 %s699_s15, 7  ;;  %s201_s18 = sand.u32 127, %s699_s15 }
  0x2d   : >> { %s196_s19 = sadd.s32 %s696_s14, %s191_s17  ;;  %s705_s20 = sshll.u32 %s199_s16, 7 }
  0x2e   : >> { %s492_s21 = sshll.u32 %s196_s19, 8  ;;  %s203_s22 = sadd.s32 %s705_s20, %s201_s18 }
  0x2f   : >> { %s204_s23 = sadd.s32 %s492_s21, %s203_s22  ;;  %s211_s24 = sadd.s32 1, %s699_s15 }
  0x30   : >> { %s709_s25 = sld [smem:[#allocation5 + %s204_s23]]  ;;  %s212_s26 = sshra.s32 %s211_s24, 7 }
  0x31   : >> { %s206_s0 = sld [smem:[#allocation4 + %s204_s23]]  ;;  %s214_s28 = sadd.s32 %s696_s14, %s212_s26 }
  0x32   : >> { %s494_s29 = sshll.u32 %s214_s28, 8  ;;  %s217_s30 = sand.u32 127, %s211_s24 }
  0x33   : >> { %s218_s6 = sadd.s32 %s705_s20, %s217_s30  ;;  %s227_s7 = sadd.s32 2, %s699_s15 }
  0x34   : >> { %s219_s9 = sadd.s32 %s494_s29, %s218_s6  ;;  %s228_s10 = sshra.s32 %s227_s7, 7 }
  0x35   : >> { %s220_s13 = sld [smem:[#allocation5 + %s219_s9]]  ;;  %s230_s16 = sadd.s32 %s696_s14, %s228_s10 }
  0x36   : >> { %s221_s17 = sld [smem:[#allocation4 + %s219_s9]]  ;;  %s495_s18 = sshll.u32 %s230_s16, 8  ;;  %v209_v1 = vstv %s709_s25 }
  0x37   : >> { %s207_s19 = scalar_lea.vmem %s688_s11, %s206_s0  ;;  %s233_s21 = sand.u32 127, %s227_s7 }
  0x38   : >> { %s234_s22 = sadd.s32 %s705_s20, %s233_s21  ;;  %s243_s2 = sadd.s32 3, %s699_s15  ;;  %v208_v0 = vld [vmem:[%s207_s19] sm:$0x1] }
  0x39   : >> { %s235_s23 = sadd.s32 %s495_s18, %s234_s22  ;;  %s244_s26 = sshra.s32 %s243_s2, 7  ;;  %v210_v4 = vmul.f32 %v209_v1, %v208_v0 }
  0x3a   : >> { %s236_s28 = sld [smem:[#allocation5 + %s235_s23]]  ;;  %s246_s24 = sadd.s32 %s696_s14, %s244_s26 }
  0x3b   : >> { %v224_v2 = vstv %s220_s13  ;;  %s237_s29 = sld [smem:[#allocation4 + %s235_s23]]  ;;  %s496_s30 = sshll.u32 %s246_s24, 8 }
  0x3c   : >> { %s222_s6 = scalar_lea.vmem %s688_s11, %s221_s17  ;;  %s249_s10 = sand.u32 127, %s243_s2 }
  0x3d   : >> { %v223_v3 = vld [vmem:[%s222_s6] sm:$0x1]  ;;  %s250_s9 = sadd.s32 %s705_s20, %s249_s10  ;;  %s259_s2 = scalar_lea.vmem [#allocation2], %s628_s12 }
  0x3e   : >> { %v225_v5 = vmul.f32 %v224_v2, %v223_v3  ;;  %s251_s0 = sadd.s32 %s496_s30, %s250_s9  ;;  %s189_s12 = sadd.s32 1, %s628_s12  }
  0x3f   : >> { %s252_s15 = sld [smem:[#allocation5 + %s251_s0]]  ;;  %p186_p0 = scmp.ge.s32.totalorder %s189_s12, 64  }
  0x40   : >> { %v240_v6 = vstv %s236_s28  ;;  %s253_s7 = sld [smem:[#allocation4 + %s251_s0]]  ;;  %v226_v7 = vadd.f32 %v225_v5, %v210_v4  ;;  %v580_v15 = vld [vmem:[%s768_s3 + $0x38] sm:$0xff] (%p186_p0)   ;;  %v581_v16 = vld [vmem:[%s768_s3 + $0x30] sm:$0xff] (%p186_p0)   ;;  %v582_v17 = vld [vmem:[%s768_s3 + $0x28] sm:$0xff] (%p186_p0)  }
  0x41   : >> { %s238_s16 = scalar_lea.vmem %s688_s11, %s237_s29  ;;  %521 = vmatprep.subr.bf16.mxu0 (%p186_p0), %v580_v15  ;;  %545 = vmatprep.subr.bf16.mxu1 (%p186_p0), %v580_v15  ;;  %v583_v18 = vld [vmem:[%s768_s3 + $0x20] sm:$0xff] (%p186_p0)   ;;  %v584_v25 = vld [vmem:[%s768_s3 + $0x18] sm:$0xff] (%p186_p0)   ;;  %v585_v26 = vld [vmem:[%s768_s3 + $0x10] sm:$0xff] (%p186_p0)  }
  0x42   : >> { %v239_v8 = vld [vmem:[%s238_s16] sm:$0x1]  ;;  %522 = vmatpush3.bf16.msra.mxu0 (%p186_p0), %v580_v15  ;;  %553 = vmatpush3.bf16.msra.mxu1 (%p186_p0), %v580_v15  ;;  %v586_v27 = vld [vmem:[%s768_s3 + $0x8] sm:$0xff] (%p186_p0)  }
  0x43   : >> { %v241_v9 = vmul.f32 %v240_v6, %v239_v8  ;;  %523 = vmatprep.subr.bf16.mxu0 (%p186_p0), %v581_v16  ;;  %546 = vmatprep.subr.bf16.mxu1 (%p186_p0), %v581_v16  ;;  %v587_v28 = vld [vmem:[%s768_s3] sm:$0xff] (%p186_p0)  }
  0x44   : > { %v497_v35 = vld [vmem:[%s769_s4] ss:$0 sm:$0xff] (%p186_p0) }
  0x45   : >> { %v256_v10 = vstv %s252_s15  ;;  %v242_v11 = vadd.f32 %v241_v9, %v226_v7 }
  0x46   : >> { %s254_s14 = scalar_lea.vmem %s688_s11, %s253_s7  ;;  %524 = vmatpush3.bf16.msra.mxu0 (%p186_p0), %v581_v16  ;;  %554 = vmatpush3.bf16.msra.mxu1 (%p186_p0), %v581_v16 }
  0x47   : >> { %v255_v12 = vld [vmem:[%s254_s14] sm:$0x1]  ;;  %525 = vmatprep.subr.bf16.mxu0 (%p186_p0), %v582_v17  ;;  %547 = vmatprep.subr.bf16.mxu1 (%p186_p0), %v582_v17 }
  0x48   : >> { %v257_v13 = vmul.f32 %v256_v10, %v255_v12  ;;  %188 = sbr.rel (!%p186_p0) target bundleno = 42 (0x2a), region = 74 }
  0x4a   : >> { %v258_v14 = vadd.f32 %v257_v13, %v242_v11  ;;  %526 = vmatpush3.bf16.msra.mxu0 (%p186_p0), %v582_v17  ;;  %555 = vmatpush3.bf16.msra.mxu1 (%p186_p0), %v582_v17 }
  0x4b   : > { %527 = vmatprep.subr.bf16.mxu0 (%p186_p0), %v583_v18  ;;  %548 = vmatprep.subr.bf16.mxu1 (%p186_p0), %v583_v18 }
  0x4c   : >> { %260 = vst [vmem:[%s259_s2] sm:$0x1] %v258_v14 }
  0x4e   : > { %528 = vmatpush3.bf16.msra.mxu0 %v583_v18  ;;  %556 = vmatpush3.bf16.msra.mxu1 %v583_v18 }
  0x4f   : > { %529 = vmatprep.subr.bf16.mxu0 %v584_v25  ;;  %549 = vmatprep.subr.bf16.mxu1 %v584_v25 }
  0x52   : > { %530 = vmatpush3.bf16.msra.mxu0 %v584_v25  ;;  %557 = vmatpush3.bf16.msra.mxu1 %v584_v25 }
  0x53   : > { %v261_v19 = vld [vmem:[#allocation2] sm:$0xff]  ;;  %v262_v20 = vld [vmem:[#allocation2 + $0x8] sm:$0xff]  ;;  %531 = vmatprep.subr.bf16.mxu0 %v585_v26  ;;  %550 = vmatprep.subr.bf16.mxu1 %v585_v26  ;;  %v263_v29 = vld [vmem:[#allocation2 + $0x10] sm:$0xff] }
  0x54   : > { %v265_v21 = vld [vmem:[#allocation2 + $0x20] sm:$0xff]  ;;  %v269_v22 = vpack.c.bf16 %v262_v20, %v261_v19  ;;  %v266_v23 = vld [vmem:[#allocation2 + $0x28] sm:$0xff]  ;;  %v264_v30 = vld [vmem:[#allocation2 + $0x18] sm:$0xff] }
  0x55   : > { %v271_v24 = vpack.c.bf16 %v266_v23, %v265_v21  ;;  %v267_v31 = vld [vmem:[#allocation2 + $0x30] sm:$0xff]  ;;  %v268_v32 = vld [vmem:[#allocation2 + $0x38] sm:$0xff]  ;;  %v270_v33 = vpack.c.bf16 %v264_v30, %v263_v29 }
  0x56   : > { %537 = vmatprep.mubr.bf16.mxu0 %v269_v22  ;;  %532 = vmatpush3.bf16.msra.mxu0 %v585_v26  ;;  %v272_v34 = vpack.c.bf16 %v268_v32, %v267_v31 }
  0x57   : > { %541 = vmatprep.mubr.bf16.mxu1 %v271_v24  ;;  %558 = vmatpush3.bf16.msra.mxu1 %v585_v26 }
  0x58   : > { %533 = vmatprep.subr.bf16.mxu0 %v586_v27  ;;  %551 = vmatprep.subr.bf16.mxu1 %v586_v27 }
  0x5a   : > { %534 = vmatpush3.bf16.msra.mxu0 %v586_v27 }
  0x5b   : > { %559 = vmatpush3.bf16.msra.mxu1 %v586_v27  ;;  %535 = vmatprep.subr.bf16.mxu0 %v587_v28 }
  0x5c   : > { %552 = vmatprep.subr.bf16.mxu1 %v587_v28 }
  0x5e   : > { %536 = vmatpush3.bf16.msra.mxu0 %v587_v28 }
  0x5f   : > { %560 = vmatpush3.bf16.msra.mxu1 %v587_v28 }
  0x61   : > { %538 = vmatmul.mubr.bf16.vlgmr.msra.gmra.mxu0 %v270_v33 }
  0x62   : > { %542 = vmatmul.mubr.bf16.vlgmr.msra.gmra.mxu1 %v272_v34 }
 0x121   : > { %v539_v36 = vpop.f32.mrf.mxu0 }
 0x122   : > { %v543_v37 = vpop.f32.mrf.mxu1  ;;  %v387_v38 = vadd.f32 %v539_v36, %v497_v35 }
 0x123   : > { %v403_v39 = vadd.f32 %v543_v37, %v497_v35  ;;  %v378_v40 = vpop.f32.mrf.mxu0 }
 0x124   : > { %v394_v41 = vpop.f32.mrf.mxu1  ;;  %411 = vst [vmem:[%s683_s8 + $0x10] sm:$0xff] %v387_v38  ;;  %v379_v42 = vadd.f32 %v497_v35, %v378_v40 }
 0x125   : > { %415 = vst [vmem:[%s683_s8 + $0x30] sm:$0xff] %v403_v39  ;;  %v395_v43 = vadd.f32 %v497_v35, %v394_v41  ;;  %v540_v44 = vpop.f32.mrf.mxu0 }
 0x126   : > { %v544_v45 = vpop.f32.mrf.mxu1  ;;  %409 = vst [vmem:[%s683_s8] sm:$0xff] %v379_v42  ;;  %v390_v46 = vadd.f32 %v540_v44, %v497_v35 }
 0x127   : > { %413 = vst [vmem:[%s683_s8 + $0x20] sm:$0xff] %v395_v43  ;;  %v406_v47 = vadd.f32 %v544_v45, %v497_v35  ;;  %v381_v48 = vpop.f32.mrf.mxu0 }
 0x128   : > { %v397_v49 = vpop.f32.mrf.mxu1  ;;  %412 = vst [vmem:[%s683_s8 + $0x18] sm:$0xff] %v390_v46  ;;  %v382_v50 = vadd.f32 %v497_v35, %v381_v48 }
 0x129   : > { %416 = vst [vmem:[%s683_s8 + $0x38] sm:$0xff] %v406_v47  ;;  %v398_v51 = vadd.f32 %v497_v35, %v397_v49 }
 0x12a   : > { %410 = vst [vmem:[%s683_s8 + $0x8] sm:$0xff] %v382_v50 }
 0x12b   : > { %414 = vst [vmem:[%s683_s8 + $0x28] sm:$0xff] %v398_v51 }
 0x12c PF: > { %s25_s1 = sadd.s32 1, %s624_s1  }
 0x12d   : > { %p22_p1 = scmp.ge.s32.totalorder %s25_s1, 4  }
 0x12f   :  { %24 = sbr.rel (!%p22_p1) target bundleno = 27 (0x1b), region = 85 }

// kernel: dcnv3_block_forward.9
= control target key start
LH: loop header
LB: loop body
LE: loop exit
PB: predicated region body
PF: predicated region fallthrough
CT: control target
= control target key end

     0   :  { %s1066_s18 = smov 0   ;;  %s1305_s0 = inlined_call_operand.vmem [shape: f32[2,64,128], index: 0, kind: input, shape index: {}]   ;;  %s1306_s1 = inlined_call_operand.vmem [shape: f32[128,32], index: 1, kind: input, shape index: {}]   ;;  %s1307_s2 = inlined_call_operand.vmem [shape: f32[32,128], index: 2, kind: input, shape index: {}]   ;;  %s1308_s3 = inlined_call_operand.vmem [shape: f32[1,128], index: 3, kind: input, shape index: {}]   ;;  %s1309_s4 = inlined_call_operand.vmem [shape: f32[1,128], index: 4, kind: input, shape index: {}]   ;;  %s1310_s5 = inlined_call_operand.vmem [shape: bf16[2,64,128], index: 5, kind: output, shape index: {}]  }
   0x1 LB: > { %s782_s19 = sadd.s32 4294967295, %s1032_s18   ;;  %p786_p0 = scmp.ge.s32.totalorder %s1032_s18, 1  ;;  %s1032_s18 = sphi %s1066_s18, %s15_s18  }
   0x2   : > { %p187_p1 = scmp.lt.s32.totalorder %s1032_s18, 3 }
   0x4   : > { %p188_p2 = pnand %p786_p0, %p187_p1 }
   0x5   : > { %p215_p3 = scmp.lt.s32.totalorder (!%p188_p2), %s782_s19, 1 }
   0x6   : > { %191 = sbr.rel (%p188_p2) target bundleno = 920 (0x398), region = 40 }
   0xb   : > { %v1077_v0 = vld [vmem:[%s1306_s1 + $0x78] sm:$0xff]  ;;  %v1034_v1 = vmov 0.0   ;;  %v1083_v2 = vld [vmem:[%s1306_s1 + $0x70] sm:$0xff]  ;;  %vm1035_vm0 = vmmov 0   ;;  %s1312_s19 = smov (!%p215_p3, %s782_s19), 1  ;;  %v1095_v3 = vld [vmem:[%s1306_s1 + $0x68] sm:$0xff]  ;;  %v411_v45 = vlaneseq }
   0xc   : > { %890 = vmatprep.subr.mxu0 %v1034_v1  ;;  %922 = vmatprep.mubr.msk.f32.mxu0 %vm1035_vm0, %v1034_v1  ;;  %s813_s26 = sshll.u32 %s1312_s19, 6  ;;  %v1105_v4 = vld [vmem:[%s1306_s1 + $0x60] sm:$0xff]  ;;  %v1115_v5 = vld [vmem:[%s1307_s2 + $0x18] sm:$0xff]  ;;  %v1120_v6 = vld [vmem:[%s1307_s2 + $0x10] sm:$0xff]  ;;  %vm337_vm1 = vcmask 261120   ;;  %s814_s22 = sshll.u32 %s1312_s19, 5 }
   0xd   : > { %891 = vmatpush3.msra.mxu0 %v1077_v0  ;;  %925 = vmatprep.subr.mxu1 %v1034_v1  ;;  %s1110_s6 = scalar_lea.vmem %s1305_s0, %s813_s26  ;;  %v1137_v10 = vld [vmem:[%s1306_s1 + $0x58] sm:$0xff]  ;;  %v1151_v13 = vld [vmem:[%s1306_s1 + $0x50] sm:$0xff]  ;;  %v1163_v16 = vld [vmem:[%s1306_s1 + $0x48] sm:$0xff]  ;;  %v412_v46 = vshrl.u32 %v411_v45, 7  ;;  %s224_s25 = scalar_lea.vmem %s1310_s5, %s814_s22 }
   0xe   : > { %892 = vmatprep.subr.mxu0 %v1034_v1  ;;  %933 = vmatprep.mubr.msk.f32.mxu1 %vm1035_vm0, %v1034_v1  ;;  %v1124_v7 = vld [vmem:[%s1110_s6] sm:$0xff]  ;;  %v1127_v8 = vld [vmem:[%s1110_s6 + $0x8] sm:$0xff]  ;;  %v1130_v9 = vld [vmem:[%s1110_s6 + $0x10] sm:$0xff] }
   0xf   : > { %893 = vmatpush3.msra.mxu0 %v1083_v2  ;;  %926 = vmatpush3.msra.mxu1 %v1115_v5  ;;  %v233_v11 = vadd.f32 %v1127_v8, %v1124_v7  ;;  %v1144_v12 = vld [vmem:[%s1110_s6 + $0x18] sm:$0xff]  ;;  %v1157_v15 = vld [vmem:[%s1110_s6 + $0x20] sm:$0xff]  ;;  %v1168_v18 = vld [vmem:[%s1110_s6 + $0x28] sm:$0xff]  ;;  %v413_v47 = vsub.s32 0, %v412_v46 }
  0x10   : > { %894 = vmatprep.subr.mxu0 %v1034_v1  ;;  %927 = vmatprep.subr.mxu1 %v1034_v1  ;;  %v1174_v19 = vld [vmem:[%s1306_s1 + $0x40] sm:$0xff]  ;;  %v1179_v21 = vld [vmem:[%s1110_s6 + $0x30] sm:$0xff]  ;;  %v1185_v22 = vld [vmem:[%s1306_s1 + $0x38] sm:$0xff] }
  0x11   : > { %895 = vmatpush3.msra.mxu0 %v1095_v3  ;;  %928 = vmatpush3.msra.mxu1 %v1120_v6  ;;  %v234_v14 = vadd.f32 %v233_v11, %v1130_v9  ;;  %v1190_v24 = vld [vmem:[%s1110_s6 + $0x38] sm:$0xff]  ;;  %v1196_v25 = vld [vmem:[%s1306_s1 + $0x30] sm:$0xff]  ;;  %v1204_v27 = vld [vmem:[%s1306_s1 + $0x28] sm:$0xff] }
  0x12   : > { %896 = vmatprep.subr.mxu0 %v1034_v1  ;;  %929 = vmatprep.subr.mxu1 %v1034_v1  ;;  %v1212_v29 = vld [vmem:[%s1306_s1 + $0x20] sm:$0xff]  ;;  %v1219_v31 = vld [vmem:[%s1306_s1 + $0x18] sm:$0xff]  ;;  %v248_v33 = vld [vmem:[%s1306_s1 + $0x10] sm:$0xff] }
  0x13   : > { %897 = vmatpush3.msra.mxu0 %v1105_v4  ;;  %v235_v17 = vadd.f32 %v234_v14, %v1144_v12  ;;  %v247_v35 = vld [vmem:[%s1306_s1 + $0x8] sm:$0xff]  ;;  %v246_v37 = vld [vmem:[%s1306_s1] sm:$0xff] }
  0x14   : > { %898 = vmatprep.subr.mxu0 %v1034_v1  ;;  %v334_v40 = vld [vmem:[%s1307_s2 + $0x8] sm:$0xff]  ;;  %v333_v41 = vld [vmem:[%s1307_s2] sm:$0xff] }
  0x15   : > { %899 = vmatpush3.msra.mxu0 %v1137_v10  ;;  %v236_v20 = vadd.f32 %v235_v17, %v1157_v15  ;;  %930 = vmatpush3.msra.mxu1 %v334_v40 }
  0x16   : > { %900 = vmatprep.subr.mxu0 %v1034_v1  ;;  %931 = vmatprep.subr.mxu1 %v1034_v1 }
  0x17   : > { %901 = vmatpush3.msra.mxu0 %v1151_v13  ;;  %v237_v23 = vadd.f32 %v236_v20, %v1168_v18  ;;  %932 = vmatpush3.msra.mxu1 %v333_v41 }
  0x18   : > { %902 = vmatprep.subr.mxu0 %v1034_v1  ;;  %936 = vmatprep.subr.mxu1 %v1034_v1 }
  0x19   : > { %903 = vmatpush3.msra.mxu0 %v1163_v16  ;;  %v238_v26 = vadd.f32 %v237_v23, %v1179_v21 }
  0x1a   : > { %904 = vmatprep.subr.mxu0 %v1034_v1 }
  0x1b   : > { %905 = vmatpush3.msra.mxu0 %v1174_v19  ;;  %v239_v28 = vadd.f32 %v238_v26, %v1190_v24 }
  0x1c   : > { %906 = vmatprep.subr.mxu0 %v1034_v1 }
  0x1d   : > { %907 = vmatpush3.msra.mxu0 %v1185_v22  ;;  %v240_v30 = vrot.slane %v239_v28, 4 }
  0x1e   : > { %908 = vmatprep.subr.mxu0 %v1034_v1 }
  0x1f   : > { %909 = vmatpush3.msra.mxu0 %v1196_v25  ;;  %v241_v32 = vadd.f32 %v240_v30, %v239_v28 }
  0x20   : > { %910 = vmatprep.subr.mxu0 %v1034_v1 }
  0x21   : > { %911 = vmatpush3.msra.mxu0 %v1204_v27  ;;  %v242_v34 = vrot.slane %v241_v32, 2 }
  0x22   : > { %912 = vmatprep.subr.mxu0 %v1034_v1 }
  0x23   : > { %913 = vmatpush3.msra.mxu0 %v1212_v29  ;;  %v243_v36 = vadd.f32 %v242_v34, %v241_v32 }
  0x24   : > { %914 = vmatprep.subr.mxu0 %v1034_v1 }
  0x25   : > { %915 = vmatpush3.msra.mxu0 %v1219_v31  ;;  %v244_v38 = vrot.slane %v243_v36, 1 }
  0x26   : > { %916 = vmatprep.subr.mxu0 %v1034_v1 }
  0x27   : > { %917 = vmatpush3.msra.mxu0 %v248_v33  ;;  %v245_v39 = vadd.f32 %v244_v38, %v243_v36 }
  0x28   : > { %918 = vmatprep.subr.mxu0 %v1034_v1 }
  0x29   : > { %919 = vmatpush3.msra.mxu0 %v247_v35 }
  0x2a   : > { %920 = vmatprep.subr.mxu0 %v1034_v1 }
  0x2b   : > { %921 = vmatpush3.msra.mxu0 %v246_v37 }
  0x2c   : > { %923 = vmatmul.mubr.f32.vlgmr.msra.gmra.mxu0 %v245_v39  ;;  %971 = vmatprep.subr.mxu0 %v1034_v1 }
  0x2d   : > { %972 = vmatpush3.msra.mxu0 %v1115_v5  ;;  %979 = vmatprep.mubr.msk.f32.mxu0 %vm1035_vm0, %v1034_v1 }
  0x2e   : > { %973 = vmatprep.subr.mxu0 %v1034_v1 }
  0x2f   : > { %974 = vmatpush3.msra.mxu0 %v1120_v6 }
  0x30   : > { %975 = vmatprep.subr.mxu0 %v1034_v1 }
  0x31   : > { %976 = vmatpush3.msra.mxu0 %v334_v40 }
  0x32   : > { %977 = vmatprep.subr.mxu0 %v1034_v1 }
  0x33   : > { %978 = vmatpush3.msra.mxu0 %v333_v41 }
  0xec   : > { %v328_v42 = vpop.f32.mrf.mxu0 }
  0xed   : > { %v332_v43 = vmul.f32 0.015625, %v328_v42 }
  0xee   : > { %v924_v44 = vpop.f32.mrf.mxu0 }
  0xef   : > { %934 = vmatmul.mubr.msk.f32.vlgmr.msra.gmra.mxu1 %vm337_vm1, %v332_v43 }
  0xf0   : > { %937 = vmatpush3.msra.mxu1 %v1077_v0  ;;  %968 = vmatprep.mubr.msk.f32.mxu1 %vm1035_vm0, %v1034_v1 }
  0xf1   : > { %938 = vmatprep.subr.mxu1 %v1034_v1 }
  0xf2   : > { %939 = vmatpush3.msra.mxu1 %v1083_v2 }
  0xf3   : > { %940 = vmatprep.subr.mxu1 %v1034_v1 }
  0xf4   : > { %941 = vmatpush3.msra.mxu1 %v1095_v3 }
  0xf5   : > { %942 = vmatprep.subr.mxu1 %v1034_v1 }
  0xf6   : > { %943 = vmatpush3.msra.mxu1 %v1105_v4 }
  0xf7   : > { %944 = vmatprep.subr.mxu1 %v1034_v1 }
  0xf8   : > { %945 = vmatpush3.msra.mxu1 %v1137_v10 }
  0xf9   : > { %946 = vmatprep.subr.mxu1 %v1034_v1 }
  0xfa   : > { %947 = vmatpush3.msra.mxu1 %v1151_v13 }
  0xfb   : > { %948 = vmatprep.subr.mxu1 %v1034_v1 }
  0xfc   : > { %949 = vmatpush3.msra.mxu1 %v1163_v16 }
  0xfd   : > { %950 = vmatprep.subr.mxu1 %v1034_v1 }
  0xfe   : > { %951 = vmatpush3.msra.mxu1 %v1174_v19 }
  0xff   : > { %952 = vmatprep.subr.mxu1 %v1034_v1 }
 0x100   : > { %953 = vmatpush3.msra.mxu1 %v1185_v22 }
 0x101   : > { %954 = vmatprep.subr.mxu1 %v1034_v1 }
 0x102   : > { %955 = vmatpush3.msra.mxu1 %v1196_v25 }
 0x103   : > { %956 = vmatprep.subr.mxu1 %v1034_v1 }
 0x104   : > { %957 = vmatpush3.msra.mxu1 %v1204_v27 }
 0x105   : > { %958 = vmatprep.subr.mxu1 %v1034_v1 }
 0x106   : > { %959 = vmatpush3.msra.mxu1 %v1212_v29 }
 0x107   : > { %960 = vmatprep.subr.mxu1 %v1034_v1 }
 0x108   : > { %961 = vmatpush3.msra.mxu1 %v1219_v31 }
 0x109   : > { %962 = vmatprep.subr.mxu1 %v1034_v1 }
 0x10a   : > { %963 = vmatpush3.msra.mxu1 %v248_v33  ;;  %v794_v33 = vld [vmem:[%s1309_s4] ss:$0 sm:$0xff] }
 0x10b   : > { %964 = vmatprep.subr.mxu1 %v1034_v1 }
 0x10c   : > { %965 = vmatpush3.msra.mxu1 %v247_v35 }
 0x10d   : > { %966 = vmatprep.subr.mxu1 %v1034_v1 }
 0x10e   : > { %967 = vmatpush3.msra.mxu1 %v246_v37 }
 0x1af   : > { %v407_v48 = vpop.f32.mrf.mxu1 }
 0x1b0   : > { %v414_v49 = vrot.slane %v407_v48, %v413_v47 }
 0x1b1   : > { %v935_v50 = vpop.f32.mrf.mxu1 }
 0x1b2   : > { %v415_v51 = vsub.f32 %v1124_v7, %v414_v49  ;;  %v416_v52 = vsub.f32 %v1127_v8, %v414_v49  ;;  %v417_v53 = vsub.f32 %v1130_v9, %v414_v49  ;;  %v418_v54 = vsub.f32 %v1144_v12, %v414_v49 }
 0x1b3   : > { %v419_v57 = vsub.f32 %v1157_v15, %v414_v49  ;;  %v420_v60 = vsub.f32 %v1168_v18, %v414_v49  ;;  %v421_v63 = vsub.f32 %v1179_v21, %v414_v49  ;;  %v422_v2 = vsub.f32 %v1190_v24, %v414_v49  ;;  %v793_v24 = vld [vmem:[%s1308_s3] ss:$0 sm:$0xff] }
 0x1b4   : > { %v423_v55 = vmul.f32 %v415_v51, %v415_v51  ;;  %v424_v56 = vmul.f32 %v416_v52, %v416_v52  ;;  %v425_v58 = vmul.f32 %v417_v53, %v417_v53  ;;  %v426_v61 = vmul.f32 %v418_v54, %v418_v54 }
 0x1b5   : > { %v427_v0 = vmul.f32 %v419_v57, %v419_v57  ;;  %v428_v3 = vmul.f32 %v420_v60, %v420_v60  ;;  %v429_v5 = vmul.f32 %v421_v63, %v421_v63  ;;  %v430_v7 = vmul.f32 %v422_v2, %v422_v2 }
 0x1b6   : > { %v431_v59 = vadd.f32 %v424_v56, %v423_v55 }
 0x1b8   : > { %v432_v62 = vadd.f32 %v431_v59, %v425_v58 }
 0x1ba   : > { %v433_v1 = vadd.f32 %v432_v62, %v426_v61 }
 0x1bc   : > { %v434_v4 = vadd.f32 %v433_v1, %v427_v0 }
 0x1be   : > { %v435_v6 = vadd.f32 %v434_v4, %v428_v3 }
 0x1c0   : > { %v436_v8 = vadd.f32 %v435_v6, %v429_v5 }
 0x1c2   : > { %v437_v9 = vadd.f32 %v436_v8, %v430_v7 }
 0x1c4   : > { %v438_v10 = vrot.slane %v437_v9, 4 }
 0x1c6   : > { %v439_v11 = vadd.f32 %v438_v10, %v437_v9 }
 0x1c8   : > { %v440_v12 = vrot.slane %v439_v11, 2 }
 0x1ca   : > { %v441_v13 = vadd.f32 %v440_v12, %v439_v11 }
 0x1cc   : > { %v442_v14 = vrot.slane %v441_v13, 1 }
 0x1ce   : > { %v443_v15 = vadd.f32 %v442_v14, %v441_v13 }
 0x1d0   : > { %969 = vmatmul.mubr.f32.vlgmr.msra.gmra.mxu1 %v443_v15 }
 0x290   : > { %v510_v16 = vpop.f32.mrf.mxu1 }
 0x291   : > { %v514_v17 = vmul.f32 0.015625, %v510_v16 }
 0x292   : > { %v970_v18 = vpop.f32.mrf.mxu1 }
 0x293   : > { %980 = vmatmul.mubr.msk.f32.vlgmr.msra.gmra.mxu0 %vm337_vm1, %v514_v17 }
 0x353   : > { %v584_v19 = vpop.f32.mrf.mxu0 }
 0x354   : > { %v585_v20 = vadd.f32 1e-05, %v584_v19 }
 0x355   : > { %v981_v21 = vpop.f32.mrf.mxu0 }
 0x356   : > { %992 = vrsqrt.f32 %v585_v20 }
 0x363   : > { %v993_v22 = vpop.eup %992 }
 0x364   : > { %v592_v23 = vrot.slane %v993_v22, %v413_v47 }
 0x366   : > { %v593_v25 = vmul.f32 %v592_v23, %v415_v51  ;;  %v594_v26 = vmul.f32 %v592_v23, %v416_v52  ;;  %v595_v27 = vmul.f32 %v592_v23, %v417_v53  ;;  %v596_v28 = vmul.f32 %v592_v23, %v418_v54 }
 0x367   : > { %v597_v29 = vmul.f32 %v592_v23, %v419_v57  ;;  %v598_v30 = vmul.f32 %v592_v23, %v420_v60  ;;  %v599_v31 = vmul.f32 %v592_v23, %v421_v63  ;;  %v600_v32 = vmul.f32 %v592_v23, %v422_v2 }
 0x368   : > { %v608_v34 = vmul.f32 %v793_v24, %v593_v25  ;;  %v609_v35 = vmul.f32 %v793_v24, %v594_v26  ;;  %v610_v36 = vmul.f32 %v793_v24, %v595_v27  ;;  %v611_v37 = vmul.f32 %v793_v24, %v596_v28 }
 0x369   : > { %v612_v38 = vmul.f32 %v793_v24, %v597_v29  ;;  %v613_v39 = vmul.f32 %v793_v24, %v598_v30  ;;  %v614_v40 = vmul.f32 %v793_v24, %v599_v31  ;;  %v615_v41 = vmul.f32 %v793_v24, %v600_v32 }
 0x36a   : > { %v623_v42 = vadd.f32 %v794_v33, %v608_v34  ;;  %v624_v43 = vadd.f32 %v794_v33, %v609_v35  ;;  %v625_v44 = vadd.f32 %v794_v33, %v610_v36  ;;  %v626_v45 = vadd.f32 %v794_v33, %v611_v37 }
 0x36b   : > { %v627_v46 = vadd.f32 %v794_v33, %v612_v38  ;;  %v628_v47 = vadd.f32 %v794_v33, %v613_v39  ;;  %v629_v48 = vadd.f32 %v794_v33, %v614_v40  ;;  %v630_v52 = vadd.f32 %v794_v33, %v615_v41 }
 0x36c   : > { %v795_v49 = vmul.f32 -1.442695, %v623_v42  ;;  %v796_v50 = vmul.f32 -1.442695, %v624_v43  ;;  %v797_v51 = vmul.f32 -1.442695, %v625_v44 }
 0x36d   : > { %v798_v53 = vmul.f32 -1.442695, %v626_v45  ;;  %v799_v54 = vmul.f32 -1.442695, %v627_v46  ;;  %v800_v55 = vmul.f32 -1.442695, %v628_v47 }
 0x36e   : > { %994 = vpow2.f32 %v795_v49  ;;  %v801_v56 = vmul.f32 -1.442695, %v629_v48  ;;  %v802_v57 = vmul.f32 -1.442695, %v630_v52 }
 0x36f   : > { %996 = vpow2.f32 %v796_v50 }
 0x370   : > { %998 = vpow2.f32 %v797_v51 }
 0x371   : > { %1000 = vpow2.f32 %v798_v53 }
 0x372   : > { %1002 = vpow2.f32 %v799_v54 }
 0x373   : > { %1004 = vpow2.f32 %v800_v55 }
 0x374   : > { %1006 = vpow2.f32 %v801_v56 }
 0x375   : > { %1008 = vpow2.f32 %v802_v57 }
 0x37b   : > { %v995_v58 = vpop.eup %994 }
 0x37c   : > { %v997_v59 = vpop.eup %996  ;;  %v655_v60 = vadd.f32 1.0, %v995_v58 }
 0x37d   : > { %v999_v61 = vpop.eup %998  ;;  %v656_v62 = vadd.f32 1.0, %v997_v59 }
 0x37e   : > { %v1001_v63 = vpop.eup %1000  ;;  %v657_v0 = vadd.f32 1.0, %v999_v61  ;;  %1010 = vrcp.f32 %v655_v60 }
 0x37f   : > { %v1003_v1 = vpop.eup %1002  ;;  %v658_v2 = vadd.f32 1.0, %v1001_v63  ;;  %1012 = vrcp.f32 %v656_v62 }
 0x380   : > { %v1005_v3 = vpop.eup %1004  ;;  %v659_v4 = vadd.f32 1.0, %v1003_v1  ;;  %1014 = vrcp.f32 %v657_v0 }
 0x381   : > { %v1007_v5 = vpop.eup %1006  ;;  %v660_v6 = vadd.f32 1.0, %v1005_v3  ;;  %1016 = vrcp.f32 %v658_v2 }
 0x382   : > { %v1009_v7 = vpop.eup %1008  ;;  %v661_v8 = vadd.f32 1.0, %v1007_v5  ;;  %1018 = vrcp.f32 %v659_v4 }
 0x383   : > { %v662_v9 = vadd.f32 1.0, %v1009_v7  ;;  %1020 = vrcp.f32 %v660_v6 }
 0x384   : > { %1022 = vrcp.f32 %v661_v8 }
 0x385   : > { %1024 = vrcp.f32 %v662_v9 }
 0x38b   : > { %v1011_v10 = vpop.eup %1010 }
 0x38c   : > { %v1013_v11 = vpop.eup %1012  ;;  %v679_v12 = vmul.f32 %v1011_v10, %v623_v42 }
 0x38d   : > { %v1015_v13 = vpop.eup %1014  ;;  %v680_v14 = vmul.f32 %v1013_v11, %v624_v43 }
 0x38e   : > { %v1017_v15 = vpop.eup %1016  ;;  %v681_v16 = vmul.f32 %v1015_v13, %v625_v44 }
 0x38f   : > { %v1019_v17 = vpop.eup %1018  ;;  %v682_v18 = vmul.f32 %v1017_v15, %v626_v45  ;;  %v826_v19 = vpack.c.bf16 %v680_v14, %v679_v12 }
 0x390   : > { %v1021_v20 = vpop.eup %1020  ;;  %v683_v21 = vmul.f32 %v1019_v17, %v627_v46 }
 0x391   : > { %v1023_v22 = vpop.eup %1022  ;;  %v684_v23 = vmul.f32 %v1021_v20, %v628_v47  ;;  %827 = vst [vmem:[%s224_s25] sm:$0xff] %v826_v19   ;;  %v831_v24 = vpack.c.bf16 %v682_v18, %v681_v16 }
 0x392   : > { %v1025_v25 = vpop.eup %1024  ;;  %v685_v26 = vmul.f32 %v1023_v22, %v629_v48 }
 0x393   : > { %v686_v27 = vmul.f32 %v1025_v25, %v630_v52  ;;  %843 = vst [vmem:[%s224_s25 + $0x8] sm:$0xff] %v831_v24   ;;  %v836_v28 = vpack.c.bf16 %v684_v23, %v683_v21 }
 0x395   : > { %844 = vst [vmem:[%s224_s25 + $0x10] sm:$0xff] %v836_v28   ;;  %v841_v29 = vpack.c.bf16 %v686_v27, %v685_v26 }
 0x397   : > { %845 = vst [vmem:[%s224_s25 + $0x18] sm:$0xff] %v841_v29  }
 0x398 PF: > { %s15_s18 = sadd.s32 1, %s1032_s18  }
 0x399   : > { %p12_p4 = scmp.ge.s32.totalorder %s15_s18, 4  }
 0x39b   :  { %14 = sbr.rel (!%p12_p4) target bundleno = 1 (0x1), region = 70 }

// kernel: dcnv3_block_forward.13
= control target key start
LH: loop header
LB: loop body
LE: loop exit
PB: predicated region body
PF: predicated region fallthrough
CT: control target
= control target key end

     0   :  { %s845_s18 = smov 0   ;;  %s1037_s0 = inlined_call_operand.vmem [shape: f32[2,16,128], index: 0, kind: input, shape index: {}]   ;;  %s1038_s1 = inlined_call_operand.vmem [shape: f32[128,32], index: 1, kind: input, shape index: {}]   ;;  %s1039_s2 = inlined_call_operand.vmem [shape: f32[32,128], index: 2, kind: input, shape index: {}]   ;;  %s1040_s3 = inlined_call_operand.vmem [shape: f32[1,128], index: 3, kind: input, shape index: {}]   ;;  %s1041_s4 = inlined_call_operand.vmem [shape: f32[1,128], index: 4, kind: input, shape index: {}]   ;;  %s1042_s5 = inlined_call_operand.vmem [shape: f32[2,16,128], index: 5, kind: output, shape index: {}]  }
   0x1 LB: > { %s640_s19 = sadd.s32 4294967295, %s811_s18   ;;  %p644_p0 = scmp.ge.s32.totalorder %s811_s18, 1  ;;  %s811_s18 = sphi %s845_s18, %s15_s18  }
   0x2   : > { %p187_p1 = scmp.lt.s32.totalorder %s811_s18, 3 }
   0x4   : > { %p188_p2 = pnand %p644_p0, %p187_p1 }
   0x5   : > { %p215_p3 = scmp.lt.s32.totalorder (!%p188_p2), %s640_s19, 1 }
   0x6   : > { %191 = sbr.rel (%p188_p2) target bundleno = 865 (0x361), region = 40 }
   0xb   : > { %v856_v0 = vld [vmem:[%s1038_s1 + $0x78] sm:$0xff]  ;;  %v813_v1 = vmov 0.0   ;;  %v862_v2 = vld [vmem:[%s1038_s1 + $0x70] sm:$0xff]  ;;  %vm814_vm0 = vmmov 0   ;;  %s1044_s19 = smov (!%p215_p3, %s640_s19), 1  ;;  %v874_v3 = vld [vmem:[%s1038_s1 + $0x68] sm:$0xff]  ;;  %v399_v33 = vlaneseq }
   0xc   : > { %701 = vmatprep.subr.mxu0 %v813_v1  ;;  %733 = vmatprep.mubr.msk.f32.mxu0 %vm814_vm0, %v813_v1  ;;  %s655_s26 = sshll.u32 %s1044_s19, 4  ;;  %v884_v4 = vld [vmem:[%s1038_s1 + $0x60] sm:$0xff]  ;;  %v324_v5 = vld [vmem:[%s1039_s2 + $0x18] sm:$0xff]  ;;  %v323_v6 = vld [vmem:[%s1039_s2 + $0x10] sm:$0xff]  ;;  %vm325_vm1 = vcmask 261120  }
   0xd   : > { %702 = vmatpush3.msra.mxu0 %v856_v0  ;;  %736 = vmatprep.subr.mxu1 %v813_v1  ;;  %s219_s6 = scalar_lea.vmem %s1037_s0, %s655_s26  ;;  %v906_v9 = vld [vmem:[%s1038_s1 + $0x58] sm:$0xff]  ;;  %v916_v11 = vld [vmem:[%s1038_s1 + $0x50] sm:$0xff]  ;;  %v924_v13 = vld [vmem:[%s1038_s1 + $0x48] sm:$0xff]  ;;  %v400_v34 = vshrl.u32 %v399_v33, 7  ;;  %s224_s25 = scalar_lea.vmem %s1042_s5, %s655_s26 }
   0xe   : > { %703 = vmatprep.subr.mxu0 %v813_v1  ;;  %744 = vmatprep.mubr.msk.f32.mxu1 %vm814_vm0, %v813_v1  ;;  %v898_v7 = vld [vmem:[%s219_s6] sm:$0xff]  ;;  %v900_v8 = vld [vmem:[%s219_s6 + $0x8] sm:$0xff]  ;;  %v938_v16 = vld [vmem:[%s1038_s1 + $0x38] sm:$0xff] }
   0xf   : > { %704 = vmatpush3.msra.mxu0 %v862_v2  ;;  %737 = vmatpush3.msra.mxu1 %v324_v5  ;;  %v227_v10 = vadd.f32 %v900_v8, %v898_v7  ;;  %v931_v14 = vld [vmem:[%s1038_s1 + $0x40] sm:$0xff]  ;;  %v945_v17 = vld [vmem:[%s1038_s1 + $0x30] sm:$0xff]  ;;  %v952_v19 = vld [vmem:[%s1038_s1 + $0x28] sm:$0xff]  ;;  %v401_v35 = vsub.s32 0, %v400_v34 }
  0x10   : > { %705 = vmatprep.subr.mxu0 %v813_v1  ;;  %738 = vmatprep.subr.mxu1 %v813_v1  ;;  %v238_v20 = vld [vmem:[%s1038_s1 + $0x20] sm:$0xff]  ;;  %v237_v22 = vld [vmem:[%s1038_s1 + $0x18] sm:$0xff]  ;;  %v236_v23 = vld [vmem:[%s1038_s1 + $0x10] sm:$0xff] }
  0x11   : > { %706 = vmatpush3.msra.mxu0 %v874_v3  ;;  %739 = vmatpush3.msra.mxu1 %v323_v6  ;;  %v228_v12 = vrot.slane %v227_v10, 4  ;;  %v235_v25 = vld [vmem:[%s1038_s1 + $0x8] sm:$0xff]  ;;  %v234_v26 = vld [vmem:[%s1038_s1] sm:$0xff] }
  0x12   : > { %707 = vmatprep.subr.mxu0 %v813_v1  ;;  %740 = vmatprep.subr.mxu1 %v813_v1  ;;  %v322_v28 = vld [vmem:[%s1039_s2 + $0x8] sm:$0xff]  ;;  %v321_v29 = vld [vmem:[%s1039_s2] sm:$0xff] }
  0x13   : > { %708 = vmatpush3.msra.mxu0 %v884_v4  ;;  %v229_v15 = vadd.f32 %v228_v12, %v227_v10  ;;  %741 = vmatpush3.msra.mxu1 %v322_v28  ;;  %v651_v58 = vld [vmem:[%s1040_s3] ss:$0 sm:$0xff] }
  0x14   : > { %709 = vmatprep.subr.mxu0 %v813_v1  ;;  %742 = vmatprep.subr.mxu1 %v813_v1  ;;  %v652_v61 = vld [vmem:[%s1041_s4] ss:$0 sm:$0xff] }
  0x15   : > { %710 = vmatpush3.msra.mxu0 %v906_v9  ;;  %v230_v18 = vrot.slane %v229_v15, 2  ;;  %743 = vmatpush3.msra.mxu1 %v321_v29 }
  0x16   : > { %711 = vmatprep.subr.mxu0 %v813_v1  ;;  %747 = vmatprep.subr.mxu1 %v813_v1 }
  0x17   : > { %712 = vmatpush3.msra.mxu0 %v916_v11  ;;  %v231_v21 = vadd.f32 %v230_v18, %v229_v15 }
  0x18   : > { %713 = vmatprep.subr.mxu0 %v813_v1 }
  0x19   : > { %714 = vmatpush3.msra.mxu0 %v924_v13  ;;  %v232_v24 = vrot.slane %v231_v21, 1 }
  0x1a   : > { %715 = vmatprep.subr.mxu0 %v813_v1 }
  0x1b   : > { %716 = vmatpush3.msra.mxu0 %v931_v14  ;;  %v233_v27 = vadd.f32 %v232_v24, %v231_v21 }
  0x1c   : > { %717 = vmatprep.subr.mxu0 %v813_v1 }
  0x1d   : > { %718 = vmatpush3.msra.mxu0 %v938_v16 }
  0x1e   : > { %719 = vmatprep.subr.mxu0 %v813_v1 }
  0x1f   : > { %720 = vmatpush3.msra.mxu0 %v945_v17 }
  0x20   : > { %721 = vmatprep.subr.mxu0 %v813_v1 }
  0x21   : > { %722 = vmatpush3.msra.mxu0 %v952_v19 }
  0x22   : > { %723 = vmatprep.subr.mxu0 %v813_v1 }
  0x23   : > { %724 = vmatpush3.msra.mxu0 %v238_v20 }
  0x24   : > { %725 = vmatprep.subr.mxu0 %v813_v1 }
  0x25   : > { %726 = vmatpush3.msra.mxu0 %v237_v22 }
  0x26   : > { %727 = vmatprep.subr.mxu0 %v813_v1 }
  0x27   : > { %728 = vmatpush3.msra.mxu0 %v236_v23 }
  0x28   : > { %729 = vmatprep.subr.mxu0 %v813_v1 }
  0x29   : > { %730 = vmatpush3.msra.mxu0 %v235_v25 }
  0x2a   : > { %731 = vmatprep.subr.mxu0 %v813_v1 }
  0x2b   : > { %732 = vmatpush3.msra.mxu0 %v234_v26 }
  0x2c   : > { %734 = vmatmul.mubr.f32.vlgmr.msra.gmra.mxu0 %v233_v27  ;;  %782 = vmatprep.subr.mxu0 %v813_v1 }
  0x2d   : > { %783 = vmatpush3.msra.mxu0 %v324_v5  ;;  %790 = vmatprep.mubr.msk.f32.mxu0 %vm814_vm0, %v813_v1 }
  0x2e   : > { %784 = vmatprep.subr.mxu0 %v813_v1 }
  0x2f   : > { %785 = vmatpush3.msra.mxu0 %v323_v6 }
  0x30   : > { %786 = vmatprep.subr.mxu0 %v813_v1 }
  0x31   : > { %787 = vmatpush3.msra.mxu0 %v322_v28 }
  0x32   : > { %788 = vmatprep.subr.mxu0 %v813_v1 }
  0x33   : > { %789 = vmatpush3.msra.mxu0 %v321_v29 }
  0xec   : > { %v316_v30 = vpop.f32.mrf.mxu0 }
  0xed   : > { %v320_v31 = vmul.f32 0.03125, %v316_v30 }
  0xee   : > { %v735_v32 = vpop.f32.mrf.mxu0 }
  0xef   : > { %745 = vmatmul.mubr.msk.f32.vlgmr.msra.gmra.mxu1 %vm325_vm1, %v320_v31 }
  0xf0   : > { %748 = vmatpush3.msra.mxu1 %v856_v0  ;;  %779 = vmatprep.mubr.msk.f32.mxu1 %vm814_vm0, %v813_v1 }
  0xf1   : > { %749 = vmatprep.subr.mxu1 %v813_v1 }
  0xf2   : > { %750 = vmatpush3.msra.mxu1 %v862_v2 }
  0xf3   : > { %751 = vmatprep.subr.mxu1 %v813_v1 }
  0xf4   : > { %752 = vmatpush3.msra.mxu1 %v874_v3 }
  0xf5   : > { %753 = vmatprep.subr.mxu1 %v813_v1 }
  0xf6   : > { %754 = vmatpush3.msra.mxu1 %v884_v4 }
  0xf7   : > { %755 = vmatprep.subr.mxu1 %v813_v1 }
  0xf8   : > { %756 = vmatpush3.msra.mxu1 %v906_v9 }
  0xf9   : > { %757 = vmatprep.subr.mxu1 %v813_v1 }
  0xfa   : > { %758 = vmatpush3.msra.mxu1 %v916_v11 }
  0xfb   : > { %759 = vmatprep.subr.mxu1 %v813_v1 }
  0xfc   : > { %760 = vmatpush3.msra.mxu1 %v924_v13 }
  0xfd   : > { %761 = vmatprep.subr.mxu1 %v813_v1 }
  0xfe   : > { %762 = vmatpush3.msra.mxu1 %v931_v14 }
  0xff   : > { %763 = vmatprep.subr.mxu1 %v813_v1 }
 0x100   : > { %764 = vmatpush3.msra.mxu1 %v938_v16 }
 0x101   : > { %765 = vmatprep.subr.mxu1 %v813_v1 }
 0x102   : > { %766 = vmatpush3.msra.mxu1 %v945_v17 }
 0x103   : > { %767 = vmatprep.subr.mxu1 %v813_v1 }
 0x104   : > { %768 = vmatpush3.msra.mxu1 %v952_v19 }
 0x105   : > { %769 = vmatprep.subr.mxu1 %v813_v1 }
 0x106   : > { %770 = vmatpush3.msra.mxu1 %v238_v20 }
 0x107   : > { %771 = vmatprep.subr.mxu1 %v813_v1 }
 0x108   : > { %772 = vmatpush3.msra.mxu1 %v237_v22 }
 0x109   : > { %773 = vmatprep.subr.mxu1 %v813_v1 }
 0x10a   : > { %774 = vmatpush3.msra.mxu1 %v236_v23 }
 0x10b   : > { %775 = vmatprep.subr.mxu1 %v813_v1 }
 0x10c   : > { %776 = vmatpush3.msra.mxu1 %v235_v25 }
 0x10d   : > { %777 = vmatprep.subr.mxu1 %v813_v1 }
 0x10e   : > { %778 = vmatpush3.msra.mxu1 %v234_v26 }
 0x1af   : > { %v395_v36 = vpop.f32.mrf.mxu1 }
 0x1b0   : > { %v402_v37 = vrot.slane %v395_v36, %v401_v35 }
 0x1b1   : > { %v746_v38 = vpop.f32.mrf.mxu1 }
 0x1b2   : > { %v403_v39 = vsub.f32 %v898_v7, %v402_v37  ;;  %v404_v40 = vsub.f32 %v900_v8, %v402_v37 }
 0x1b4   : > { %v405_v41 = vmul.f32 %v403_v39, %v403_v39  ;;  %v406_v42 = vmul.f32 %v404_v40, %v404_v40 }
 0x1b6   : > { %v407_v43 = vadd.f32 %v406_v42, %v405_v41 }
 0x1b8   : > { %v408_v44 = vrot.slane %v407_v43, 4 }
 0x1ba   : > { %v409_v45 = vadd.f32 %v408_v44, %v407_v43 }
 0x1bc   : > { %v410_v46 = vrot.slane %v409_v45, 2 }
 0x1be   : > { %v411_v47 = vadd.f32 %v410_v46, %v409_v45 }
 0x1c0   : > { %v412_v48 = vrot.slane %v411_v47, 1 }
 0x1c2   : > { %v413_v49 = vadd.f32 %v412_v48, %v411_v47 }
 0x1c4   : > { %780 = vmatmul.mubr.f32.vlgmr.msra.gmra.mxu1 %v413_v49 }
 0x284   : > { %v480_v50 = vpop.f32.mrf.mxu1 }
 0x285   : > { %v484_v51 = vmul.f32 0.03125, %v480_v50 }
 0x286   : > { %v781_v52 = vpop.f32.mrf.mxu1 }
 0x287   : > { %791 = vmatmul.mubr.msk.f32.vlgmr.msra.gmra.mxu0 %vm325_vm1, %v484_v51 }
 0x347   : > { %v554_v53 = vpop.f32.mrf.mxu0 }
 0x348   : > { %v555_v54 = vadd.f32 1e-05, %v554_v53 }
 0x349   : > { %v792_v55 = vpop.f32.mrf.mxu0 }
 0x34a   : > { %803 = vrsqrt.f32 %v555_v54 }
 0x357   : > { %v804_v56 = vpop.eup %803 }
 0x358   : > { %v562_v57 = vrot.slane %v804_v56, %v401_v35 }
 0x35a   : > { %v563_v59 = vmul.f32 %v562_v57, %v403_v39  ;;  %v564_v60 = vmul.f32 %v562_v57, %v404_v40 }
 0x35c   : > { %v572_v62 = vmul.f32 %v651_v58, %v563_v59  ;;  %v573_v63 = vmul.f32 %v651_v58, %v564_v60 }
 0x35e   : > { %v581_v0 = vadd.f32 %v652_v61, %v572_v62  ;;  %v582_v1 = vadd.f32 %v652_v61, %v573_v63 }
 0x360   : > { %583 = vst [vmem:[%s224_s25] sm:$0xff] %v581_v0  ;;  %584 = vst [vmem:[%s224_s25 + $0x8] sm:$0xff] %v582_v1 }
 0x361 PF: > { %s15_s18 = sadd.s32 1, %s811_s18  }
 0x362   : > { %p12_p4 = scmp.ge.s32.totalorder %s15_s18, 4  }
 0x364   :  { %14 = sbr.rel (!%p12_p4) target bundleno = 1 (0x1), region = 70 }

// kernel: dcnv3_block_forward.10
= control target key start
LH: loop header
LB: loop body
LE: loop exit
PB: predicated region body
PF: predicated region fallthrough
CT: control target
= control target key end

     0   :  { %s2323_s12 = smov 0   ;;  %s2856_s0 = inlined_call_operand.vmem [shape: bf16[2,10,10,128], index: 0, kind: input, shape index: {}]   ;;  %s2857_s1 = inlined_call_operand.vmem [shape: bf16[9,128,128], index: 1, kind: input, shape index: {}]   ;;  %s2858_s2 = inlined_call_operand.vmem [shape: f32[1,128], index: 2, kind: input, shape index: {}]   ;;  %s2859_s3 = inlined_call_operand.vmem [shape: f32[2,64,128], index: 3, kind: output, shape index: {}]  }
   0x1 LB: > { %s1644_s13 = sadd.s32 4294967295, %s2301_s12   ;;  %p1648_p0 = scmp.ge.s32.totalorder %s2301_s12, 1  ;;  %s2301_s12 = sphi %s2323_s12, %s13_s12  }
   0x2   : > { %p137_p1 = scmp.lt.s32.totalorder %s2301_s12, 3 }
   0x4   : > { %p138_p2 = pnand %p1648_p0, %p137_p1 }
   0x6   : > { %141 = sbr.rel (%p138_p2) target bundleno = 377 (0x179), region = 32 }
   0xb   : > { %v2214_v0 = vld [vmem:[%s2857_s1 + $0x78] sm:$0xff]   ;;  %p161_p3 = scmp.lt.s32.totalorder %s1644_s13, 1  ;;  %v2216_v2 = vld [vmem:[%s2857_s1 + $0x70] sm:$0xff]   ;;  %v2218_v4 = vld [vmem:[%s2857_s1 + $0x68] sm:$0xff]   ;;  %vm248_vm0 = vcmask 1046528   ;;  %vm528_vm1 = vcmask 1045504  }
   0xc   : > { %v2215_v1 = vld [vmem:[%s2857_s1 + $0x38] sm:$0xff]   ;;  %1973 = vmatprep.subr.bf16.mxu0 %v2214_v0  ;;  %v2217_v3 = vld [vmem:[%s2857_s1 + $0x30] sm:$0xff]   ;;  %v2219_v5 = vld [vmem:[%s2857_s1 + $0x28] sm:$0xff]  }
   0xd   : > { %1997 = vmatprep.subr.bf16.mxu1 %v2215_v1  ;;  %1974 = vmatpush3.bf16.msra.mxu0 %v2214_v0  ;;  %s2869_s13 = smov (!%p161_p3, %s1644_s13), 1  ;;  %v2220_v6 = vld [vmem:[%s2857_s1 + $0x60] sm:$0xff]   ;;  %v2222_v8 = vld [vmem:[%s2857_s1 + $0x58] sm:$0xff]   ;;  %v2224_v10 = vld [vmem:[%s2857_s1 + $0x50] sm:$0xff]  }
   0xe   : > { %1998 = vmatpush3.bf16.msra.mxu1 %v2215_v1  ;;  %1975 = vmatprep.subr.bf16.mxu0 %v2216_v2  ;;  %v2221_v7 = vld [vmem:[%s2857_s1 + $0x20] sm:$0xff]   ;;  %s2205_s30 = smul.u32 80, %s2869_s13  ;;  %v2223_v9 = vld [vmem:[%s2857_s1 + $0x18] sm:$0xff]   ;;  %v2225_v11 = vld [vmem:[%s2857_s1 + $0x10] sm:$0xff]   ;;  %s1864_s14 = sshll.u32 %s2869_s13, 6 }
   0xf   : > { %1999 = vmatprep.subr.bf16.mxu1 %v2217_v3  ;;  %v2226_v31 = vld [vmem:[%s2857_s1 + $0x48] sm:$0xff]   ;;  %v2228_v42 = vld [vmem:[%s2857_s1 + $0x40] sm:$0xff]   ;;  %v2232_v44 = vld [vmem:[%s2857_s1 + $0xb8] sm:$0xff]   ;;  %s2841_s19 = scalar_lea.vmem %s2859_s3, %s1864_s14 }
  0x10   : > { %s2367_s10 = scalar_lea.vmem %s2856_s0, %s2205_s30  ;;  %v2227_v33 = vld [vmem:[%s2857_s1 + $0x8] sm:$0xff]   ;;  %v2229_v43 = vld [vmem:[%s2857_s1] sm:$0xff]   ;;  %v2233_v47 = vld [vmem:[%s2857_s1 + $0xf8] sm:$0xff]  }
  0x11   : > { %1976 = vmatpush3.bf16.msra.mxu0 %v2216_v2  ;;  %v172_v12 = vld [vmem:[%s2367_s10] sm:$0xf]  ;;  %v173_v13 = vld [vmem:[%s2367_s10 + $0x4] sm:$0x1]  ;;  %v2378_v14 = vld [vmem:[%s2367_s10 + $0x8] sm:$0xf] }
  0x12   : > { %2000 = vmatpush3.bf16.msra.mxu1 %v2217_v3  ;;  %1977 = vmatprep.subr.bf16.mxu0 %v2218_v4  ;;  %v175_v15 = vld [vmem:[%s2367_s10 + $0xc] sm:$0x1]  ;;  %v2382_v16 = vld [vmem:[%s2367_s10 + $0x10] sm:$0xf]  ;;  %v2385_v17 = vld [vmem:[%s2367_s10 + $0x14] sm:$0x1]  ;;  %v192_v18 = vunpack.c.l.bf16 %v172_v12  ;;  %v193_v19 = vunpack.c.l.bf16 %v173_v13  ;;  %v194_v20 = vunpack.c.l.bf16 %v2378_v14  ;;  %v1652_v21 = vcombine.low %v172_v12, %v2378_v14 }
  0x13   : > { %2001 = vmatprep.subr.bf16.mxu1 %v2219_v5  ;;  %v195_v22 = vunpack.c.l.bf16 %v175_v15  ;;  %v196_v23 = vunpack.c.l.bf16 %v2382_v16  ;;  %v197_v24 = vunpack.c.l.bf16 %v2385_v17  ;;  %v2392_v25 = vld [vmem:[%s2367_s10 + $0x18] sm:$0xf]  ;;  %v2395_v26 = vld [vmem:[%s2367_s10 + $0x1c] sm:$0x1]  ;;  %v2234_v53 = vld [vmem:[%s2857_s1 + $0xb0] sm:$0xff]  }
  0x14   : > { %v249_v27 = vrot.slane %v192_v18, 1  ;;  %v250_v28 = vrot.slane %v193_v19, 1  ;;  %v252_v29 = vrot.slane %v194_v20, 1  ;;  %2013 = vmatprep.mubr.bf16.mxu1 %v1652_v21  ;;  %v198_v30 = vunpack.c.l.bf16 %v2392_v25  ;;  %v2444_v54 = vld [vmem:[%s2367_s10 + $0x20] sm:$0xf]  ;;  %v2237_v21 = vld [vmem:[%s2857_s1 + $0xe8] sm:$0xff]  }
  0x15   : > { %1978 = vmatpush3.bf16.msra.mxu0 %v2218_v4  ;;  %v253_v32 = vrot.slane %v195_v22, 1  ;;  %v199_v35 = vunpack.c.l.bf16 %v2395_v26  ;;  %v255_v37 = vrot.slane %v196_v23, 1  ;;  %v256_v38 = vrot.slane %v197_v24, 1  ;;  %v2447_v55 = vld [vmem:[%s2367_s10 + $0x24] sm:$0x1] }
  0x16   : > { %2002 = vmatpush3.bf16.msra.mxu1 %v2219_v5  ;;  %1979 = vmatprep.subr.bf16.mxu0 %v2220_v6  ;;  %v251_v34 = vsel %vm248_vm0, %v249_v27, %v250_v28  ;;  %v258_v40 = vrot.slane %v198_v30, 1  ;;  %v529_v48 = vrot.slane %v192_v18, 2  ;;  %v530_v49 = vrot.slane %v193_v19, 2  ;;  %v2450_v56 = vld [vmem:[%s2367_s10 + $0x28] sm:$0xf] }
  0x17   : > { %2003 = vmatprep.subr.bf16.mxu1 %v2221_v7  ;;  %v2407_v36 = vsel %vm248_vm0, %v252_v29, %v253_v32  ;;  %v259_v41 = vrot.slane %v199_v35, 1  ;;  %v2428_v45 = vsel %vm248_vm0, %v255_v37, %v256_v38  ;;  %v532_v50 = vrot.slane %v194_v20, 2  ;;  %v2457_v58 = vld [vmem:[%s2367_s10 + $0x2c] sm:$0x1]  ;;  %v2463_v62 = vld [vmem:[%s2367_s10 + $0x30] sm:$0xf] }
  0x18   : > { %v281_v39 = vpack.c.bf16 %v2407_v36, %v251_v34  ;;  %v533_v51 = vrot.slane %v195_v22, 2  ;;  %v2454_v57 = vcombine.low %v2382_v16, %v2392_v25  ;;  %v200_v59 = vunpack.c.l.bf16 %v2444_v54  ;;  %v2466_v63 = vld [vmem:[%s2367_s10 + $0x34] sm:$0x1]  ;;  %v2474_v2 = vld [vmem:[%s2367_s10 + $0x38] sm:$0xf]  ;;  %v2236_v18 = vld [vmem:[%s2857_s1 + $0xa8] sm:$0xff]  }
  0x19   : > { %1980 = vmatpush3.bf16.msra.mxu0 %v2220_v6  ;;  %v2431_v46 = vsel %vm248_vm0, %v258_v40, %v259_v41  ;;  %v201_v60 = vunpack.c.l.bf16 %v2447_v55  ;;  %v202_v61 = vunpack.c.l.bf16 %v2450_v56  ;;  %v203_v0 = vunpack.c.l.bf16 %v2457_v58  ;;  %v2477_v3 = vld [vmem:[%s2367_s10 + $0x3c] sm:$0x1]  ;;  %v2235_v6 = vld [vmem:[%s2857_s1 + $0xf0] sm:$0xff]   ;;  %v2238_v38 = vld [vmem:[%s2857_s1 + $0xa0] sm:$0xff]  }
  0x1a   : > { %2004 = vmatpush3.bf16.msra.mxu1 %v2221_v7  ;;  %1981 = vmatprep.subr.bf16.mxu0 %v2222_v8  ;;  %v2438_v52 = vpack.c.bf16 %v2431_v46, %v2428_v45  ;;  %v2471_v1 = vcombine.low %v2444_v54, %v2450_v56  ;;  %v204_v4 = vunpack.c.l.bf16 %v2463_v62  ;;  %v205_v5 = vunpack.c.l.bf16 %v2466_v63  ;;  %v2252_v55 = vld [vmem:[%s2857_s1 + $0x138] sm:$0xff]  }
  0x1b   : > { %2005 = vmatprep.subr.bf16.mxu1 %v2223_v9  ;;  %1989 = vmatprep.mubr.bf16.mxu0 %v281_v39  ;;  %v261_v7 = vrot.slane %v200_v59, 1  ;;  %v207_v12 = vunpack.c.l.bf16 %v2477_v3  ;;  %v531_v32 = vsel %vm528_vm1, %v529_v48, %v530_v49  ;;  %v2538_v37 = vcombine.low %v2463_v62, %v2474_v2  ;;  %v2239_v39 = vld [vmem:[%s2857_s1 + $0xe0] sm:$0xff]   ;;  %v2246_v48 = vld [vmem:[%s2857_s1 + $0x88] sm:$0xff]  }
  0x1c   : > { %v267_v13 = vrot.slane %v204_v4, 1  ;;  %v268_v15 = vrot.slane %v205_v5, 1  ;;  %v1712_v41 = vcombine.low %v2378_v14, %v2382_v16  ;;  %v2244_v14 = vld [vmem:[%s2857_s1 + $0x90] sm:$0xff]   ;;  %v536_v49 = vrot.slane %v197_v24, 2  ;;  %v2583_v24 = vld [vmem:[%s2367_s10 + $0x40] sm:$0xf] }
  0x1d   : > { %1982 = vmatpush3.bf16.msra.mxu0 %v2222_v8  ;;  %v262_v8 = vrot.slane %v201_v60, 1  ;;  %v271_v28 = vrot.slane %v207_v12, 1  ;;  %v539_v16 = vrot.slane %v199_v35, 2  ;;  %v541_v17 = vrot.slane %v200_v59, 2 }
  0x1e   : > { %2006 = vmatpush3.bf16.msra.mxu1 %v2223_v9  ;;  %1983 = vmatprep.subr.bf16.mxu0 %v2224_v10  ;;  %v264_v9 = vrot.slane %v202_v61, 1  ;;  %v2515_v27 = vsel %vm248_vm0, %v267_v13, %v268_v15  ;;  %v542_v26 = vrot.slane %v201_v60, 2  ;;  %v208_v35 = vunpack.c.l.bf16 %v2583_v24  ;;  %v189_v60 = vld [vmem:[%s2367_s10 + $0x44] sm:$0x1] }
  0x1f   : > { %2007 = vmatprep.subr.bf16.mxu1 %v2225_v11  ;;  %v2504_v19 = vsel %vm248_vm0, %v261_v7, %v262_v8  ;;  %v545_v7 = vrot.slane %v203_v0, 2  ;;  %v1714_v3 = vcombine.low %v2450_v56, %v2463_v62  ;;  %v2257_v56 = vld [vmem:[%s2857_s1 + $0x168] sm:$0xff]  }
  0x20   : > { %v847_v58 = vrot.slane %v208_v35, 1  ;;  %v2620_v13 = vsel %vm528_vm1, %v541_v17, %v542_v26  ;;  %v2265_v26 = vld [vmem:[%s2857_s1 + $0x150] sm:$0xff]  }
  0x21   : > { %1984 = vmatpush3.bf16.msra.mxu0 %v2224_v10  ;;  %v206_v10 = vunpack.c.l.bf16 %v2474_v2 }
  0x22   : > { %2008 = vmatpush3.bf16.msra.mxu1 %v2225_v11  ;;  %1985 = vmatprep.subr.bf16.mxu0 %v2226_v31  ;;  %v265_v11 = vrot.slane %v203_v0, 1  ;;  %v1713_v0 = vcombine.low %v2392_v25, %v2444_v54  ;;  %v551_v54 = vrot.slane %v207_v12, 2 }
  0x23   : > { %2009 = vmatprep.subr.bf16.mxu1 %v2227_v33  ;;  %v270_v20 = vrot.slane %v206_v10, 1  ;;  %v550_v25 = vrot.slane %v206_v10, 2 }
  0x24   : > { %v2512_v22 = vsel %vm248_vm0, %v264_v9, %v265_v11  ;;  %v209_v9 = vunpack.c.l.bf16 %v189_v60  ;;  %v2254_v11 = vld [vmem:[%s2857_s1 + $0x130] sm:$0xff]   ;;  %v2269_v60 = vld [vmem:[%s2857_s1 + $0x140] sm:$0xff]  }
  0x25   : > { %1986 = vmatpush3.bf16.msra.mxu0 %v2226_v31  ;;  %v2521_v29 = vpack.c.bf16 %v2512_v22, %v2504_v19  ;;  %v2525_v31 = vsel %vm248_vm0, %v270_v20, %v271_v28  ;;  %v548_v20 = vrot.slane %v205_v5, 2  ;;  %v2255_v28 = vld [vmem:[%s2857_s1 + $0x170] sm:$0xff]   ;;  %v2652_v12 = vsel %vm528_vm1, %v550_v25, %v551_v54  ;;  %v2279_v25 = vld [vmem:[%s2857_s1 + $0x1d8] sm:$0xff]  }
  0x26   : > { %2010 = vmatpush3.bf16.msra.mxu1 %v2227_v33  ;;  %1987 = vmatprep.subr.bf16.mxu0 %v2228_v42  ;;  %v2529_v33 = vsel %vm528_vm1, %v532_v50, %v533_v51  ;;  %v2534_v34 = vpack.c.bf16 %v2525_v31, %v2515_v27  ;;  %v2247_v50 = vld [vmem:[%s2857_s1 + $0xc8] sm:$0xff]   ;;  %v538_v51 = vrot.slane %v198_v30, 2  ;;  %v2249_v30 = vld [vmem:[%s2857_s1 + $0xc0] sm:$0xff]   ;;  %v2281_v54 = vld [vmem:[%s2857_s1 + $0x1d0] sm:$0xff]  }
  0x27   : > { %2011 = vmatprep.subr.bf16.mxu1 %v2229_v43  ;;  %v561_v40 = vpack.c.bf16 %v2529_v33, %v531_v32  ;;  %v2256_v32 = vld [vmem:[%s2857_s1 + $0x128] sm:$0xff]  }
  0x28   : > { %v2595_v59 = vsel %vm528_vm1, %v538_v51, %v539_v16  ;;  %v2264_v16 = vld [vmem:[%s2857_s1 + $0x110] sm:$0xff]  }
  0x29   : > { %1988 = vmatpush3.bf16.msra.mxu0 %v2228_v42  ;;  %v2240_v42 = vld [vmem:[%s2857_s1 + $0x98] sm:$0xff]  }
  0x2a   : > { %2012 = vmatpush3.bf16.msra.mxu1 %v2229_v43  ;;  %2021 = vmatprep.subr.bf16.mxu0 %v2232_v44  ;;  %v2241_v43 = vld [vmem:[%s2857_s1 + $0xd8] sm:$0xff]  }
  0x2b   : > { %2045 = vmatprep.subr.bf16.mxu1 %v2233_v47 }
  0x2c   : > { %1990 = vmatmul.mubr.bf16.vlgmr.msra.gmra.mxu0 %v2438_v52 }
  0x2d   : > { %2014 = vmatmul.mubr.bf16.vlgmr.msra.gmra.mxu1 %v2454_v57  ;;  %2022 = vmatpush3.bf16.msra.mxu0 %v2232_v44  ;;  %v2245_v44 = vld [vmem:[%s2857_s1 + $0xd0] sm:$0xff]  }
  0x2e   : > { %2046 = vmatpush3.bf16.msra.mxu1 %v2233_v47  ;;  %2023 = vmatprep.subr.bf16.mxu0 %v2234_v53  ;;  %v535_v47 = vrot.slane %v196_v23, 2  ;;  %v2248_v23 = vld [vmem:[%s2857_s1 + $0x80] sm:$0xff]  }
  0x2f   : > { %2047 = vmatprep.subr.bf16.mxu1 %v2235_v6  ;;  %2017 = vmatprep.mubr.bf16.mxu1 %v2471_v1 }
  0x30   : > { %1993 = vmatprep.mubr.bf16.mxu0 %v2521_v29 }
  0x31   : > { %2024 = vmatpush3.bf16.msra.mxu0 %v2234_v53  ;;  %v2592_v53 = vsel %vm528_vm1, %v535_v47, %v536_v49  ;;  %v994_v47 = vrot.slane %v209_v9, 2 }
  0x32   : > { %2048 = vmatpush3.bf16.msra.mxu1 %v2235_v6  ;;  %2025 = vmatprep.subr.bf16.mxu0 %v2236_v18  ;;  %v544_v6 = vrot.slane %v202_v61, 2  ;;  %v2607_v8 = vpack.c.bf16 %v2595_v59, %v2592_v53  ;;  %v2253_v61 = vld [vmem:[%s2857_s1 + $0x178] sm:$0xff]  }
  0x33   : > { %2049 = vmatprep.subr.bf16.mxu1 %v2237_v21 }
  0x34   : > { %1994 = vmatmul.mubr.bf16.gmra.mxu0 %v2534_v34  ;;  %v2623_v15 = vsel %vm528_vm1, %v544_v6, %v545_v7  ;;  %v2266_v6 = vld [vmem:[%s2857_s1 + $0x108] sm:$0xff]  }
  0x35   : > { %2026 = vmatpush3.bf16.msra.mxu0 %v2236_v18  ;;  %2018 = vmatmul.mubr.bf16.gmra.mxu1 %v2538_v37  ;;  %v547_v18 = vrot.slane %v204_v4, 2  ;;  %v2638_v4 = vpack.c.bf16 %v2623_v15, %v2620_v13  ;;  %v2267_v7 = vld [vmem:[%s2857_s1 + $0x148] sm:$0xff]  }
  0x36   : > { %2050 = vmatpush3.bf16.msra.mxu1 %v2237_v21  ;;  %2027 = vmatprep.subr.bf16.mxu0 %v2238_v38  ;;  %v848_v21 = vrot.slane %v209_v9, 1  ;;  %v2271_v9 = vld [vmem:[%s2857_s1 + $0x1f8] sm:$0xff]  }
  0x37   : > { %2051 = vmatprep.subr.bf16.mxu1 %v2239_v39  ;;  %2037 = vmatprep.mubr.bf16.mxu0 %v561_v40  ;;  %v2649_v10 = vsel %vm528_vm1, %v547_v18, %v548_v20  ;;  %v851_v40 = vpack.c.bf16 %v2428_v45, %v2407_v36  ;;  %v2263_v36 = vld [vmem:[%s2857_s1 + $0x158] sm:$0xff]   ;;  %v2273_v18 = vld [vmem:[%s2857_s1 + $0x1f0] sm:$0xff]   ;;  %v853_v20 = vpack.c.bf16 %v2515_v27, %v2512_v22  ;;  %v2276_v27 = vld [vmem:[%s2857_s1 + $0x1a0] sm:$0xff]  }
  0x38   : > { %2061 = vmatprep.mubr.bf16.mxu1 %v1712_v41  ;;  %v2641_v63 = vsel %vm248_vm0, %v847_v58, %v848_v21  ;;  %v2663_v62 = vpack.c.bf16 %v2652_v12, %v2649_v10  ;;  %v2261_v41 = vld [vmem:[%s2857_s1 + $0x160] sm:$0xff]   ;;  %v852_v58 = vpack.c.bf16 %v2504_v19, %v2431_v46  ;;  %v999_v46 = vpack.c.bf16 %v2649_v10, %v2623_v15  ;;  %v2274_v19 = vld [vmem:[%s2857_s1 + $0x1a8] sm:$0xff]   ;;  %v2278_v15 = vld [vmem:[%s2857_s1 + $0x198] sm:$0xff]  }
  0x39   : > { %2028 = vmatpush3.bf16.msra.mxu0 %v2238_v38  ;;  %v854_v5 = vpack.c.bf16 %v2641_v63, %v2525_v31  ;;  %v1715_v38 = vcombine.low %v2474_v2, %v2583_v24  ;;  %v2262_v2 = vld [vmem:[%s2857_s1 + $0x118] sm:$0xff]   ;;  %v2280_v31 = vld [vmem:[%s2857_s1 + $0x190] sm:$0xff]   ;;  %v2284_v21 = vld [vmem:[%s2857_s1 + $0x180] sm:$0xff]  }
  0x3a   : > { %2052 = vmatpush3.bf16.msra.mxu1 %v2239_v39  ;;  %2029 = vmatprep.subr.bf16.mxu0 %v2240_v42  ;;  %v2260_v39 = vld [vmem:[%s2857_s1 + $0x120] sm:$0xff]   ;;  %v2289_v10 = vld [vmem:[%s2857_s1 + $0x228] sm:$0xff]  }
  0x3b   : > { %2053 = vmatprep.subr.bf16.mxu1 %v2241_v43 }
  0x3d   : > { %2030 = vmatpush3.bf16.msra.mxu0 %v2240_v42  ;;  %v997_v42 = vpack.c.bf16 %v2592_v53, %v2529_v33 }
  0x3e   : > { %2054 = vmatpush3.bf16.msra.mxu1 %v2241_v43  ;;  %2031 = vmatprep.subr.bf16.mxu0 %v2244_v14  ;;  %v2682_v43 = vld [vmem:[%s2367_s10 + $0x48] sm:$0xf] }
  0x3f   : > { %2055 = vmatprep.subr.bf16.mxu1 %v2245_v44  ;;  %v210_v45 = vunpack.c.l.bf16 %v2682_v43 }
  0x41   : > { %2032 = vmatpush3.bf16.msra.mxu0 %v2244_v14  ;;  %v191_v14 = vld [vmem:[%s2367_s10 + $0x4c] sm:$0x1]  ;;  %v1280_v33 = vrot.slane %v210_v45, 1  ;;  %v1423_v49 = vrot.slane %v210_v45, 2 }
  0x42   : > { %2056 = vmatpush3.bf16.msra.mxu1 %v2245_v44  ;;  %2033 = vmatprep.subr.bf16.mxu0 %v2246_v48  ;;  %v993_v44 = vrot.slane %v208_v35, 2 }
  0x43   : > { %2057 = vmatprep.subr.bf16.mxu1 %v2247_v50 }
  0x45   : > { %2034 = vmatpush3.bf16.msra.mxu0 %v2246_v48  ;;  %v211_v48 = vunpack.c.l.bf16 %v191_v14 }
  0x46   : > { %2058 = vmatpush3.bf16.msra.mxu1 %v2247_v50  ;;  %2035 = vmatprep.subr.bf16.mxu0 %v2248_v23 }
  0x47   : > { %2059 = vmatprep.subr.bf16.mxu1 %v2249_v30  ;;  %v1281_v50 = vrot.slane %v211_v48, 1  ;;  %v1424_v51 = vrot.slane %v211_v48, 2 }
  0x49   : > { %2036 = vmatpush3.bf16.msra.mxu0 %v2248_v23  ;;  %v2695_v23 = vsel %vm528_vm1, %v993_v44, %v994_v47  ;;  %v2698_v17 = vsel %vm248_vm0, %v1280_v33, %v1281_v50 }
  0x4a   : > { %2060 = vmatpush3.bf16.msra.mxu1 %v2249_v30  ;;  %2069 = vmatprep.subr.bf16.mxu0 %v2252_v55  ;;  %v2701_v30 = vsel %vm528_vm1, %v1423_v49, %v1424_v51  ;;  %v1284_v35 = vpack.c.bf16 %v2698_v17, %v2641_v63  ;;  %v1000_v22 = vpack.c.bf16 %v2695_v23, %v2652_v12 }
  0x4b   : > { %2093 = vmatprep.subr.bf16.mxu1 %v2253_v61  ;;  %v1427_v53 = vpack.c.bf16 %v2701_v30, %v2695_v23  ;;  %v1788_v12 = vcombine.low %v2583_v24, %v2682_v43  ;;  %v2294_v24 = vld [vmem:[%s2857_s1 + $0x200] sm:$0xff]  }
  0x4c   : > { %2038 = vmatmul.mubr.bf16.vlgmr.msra.gmra.mxu0 %v2607_v8 }
  0x4d   : > { %2062 = vmatmul.mubr.bf16.vlgmr.msra.gmra.mxu1 %v1713_v0  ;;  %2070 = vmatpush3.bf16.msra.mxu0 %v2252_v55  ;;  %v2268_v55 = vld [vmem:[%s2857_s1 + $0x100] sm:$0xff]   ;;  %v998_v0 = vpack.c.bf16 %v2620_v13, %v2595_v59  ;;  %v2275_v59 = vld [vmem:[%s2857_s1 + $0x1e8] sm:$0xff]  }
  0x4e   : > { %2094 = vmatpush3.bf16.msra.mxu1 %v2253_v61  ;;  %2071 = vmatprep.subr.bf16.mxu0 %v2254_v11  ;;  %v2270_v61 = vld [vmem:[%s2857_s1 + $0x1b8] sm:$0xff]   ;;  %v2277_v13 = vld [vmem:[%s2857_s1 + $0x1e0] sm:$0xff]  }
  0x4f   : > { %2095 = vmatprep.subr.bf16.mxu1 %v2255_v28  ;;  %2041 = vmatprep.mubr.bf16.mxu0 %v2638_v4 }
  0x50   : > { %2065 = vmatprep.mubr.bf16.mxu1 %v1714_v3  ;;  %v2286_v3 = vld [vmem:[%s2857_s1 + $0x238] sm:$0xff]  }
  0x51   : > { %2072 = vmatpush3.bf16.msra.mxu0 %v2254_v11  ;;  %v2272_v11 = vld [vmem:[%s2857_s1 + $0x1b0] sm:$0xff]  }
  0x52   : > { %2096 = vmatpush3.bf16.msra.mxu1 %v2255_v28  ;;  %2073 = vmatprep.subr.bf16.mxu0 %v2256_v32  ;;  %v2285_v28 = vld [vmem:[%s2857_s1 + $0x1c0] sm:$0xff]  }
  0x53   : > { %2097 = vmatprep.subr.bf16.mxu1 %v2257_v56 }
  0x54   : > { %2042 = vmatmul.mubr.bf16.gmra.mxu0 %v2663_v62 }
  0x55   : > { %2074 = vmatpush3.bf16.msra.mxu0 %v2256_v32  ;;  %2066 = vmatmul.mubr.bf16.gmra.mxu1 %v1715_v38 }
  0x56   : > { %2098 = vmatpush3.bf16.msra.mxu1 %v2257_v56  ;;  %2075 = vmatprep.subr.bf16.mxu0 %v2260_v39 }
  0x57   : > { %2099 = vmatprep.subr.bf16.mxu1 %v2261_v41  ;;  %2085 = vmatprep.mubr.bf16.mxu0 %v851_v40 }
  0x58   : > { %2109 = vmatprep.mubr.bf16.mxu1 %v997_v42 }
  0x59   : > { %2076 = vmatpush3.bf16.msra.mxu0 %v2260_v39 }
  0x5a   : > { %2100 = vmatpush3.bf16.msra.mxu1 %v2261_v41  ;;  %2077 = vmatprep.subr.bf16.mxu0 %v2262_v2 }
  0x5b   : > { %2101 = vmatprep.subr.bf16.mxu1 %v2263_v36 }
  0x5d   : > { %2078 = vmatpush3.bf16.msra.mxu0 %v2262_v2 }
  0x5e   : > { %2102 = vmatpush3.bf16.msra.mxu1 %v2263_v36  ;;  %2079 = vmatprep.subr.bf16.mxu0 %v2264_v16 }
  0x5f   : > { %2103 = vmatprep.subr.bf16.mxu1 %v2265_v26 }
  0x61   : > { %2080 = vmatpush3.bf16.msra.mxu0 %v2264_v16 }
  0x62   : > { %2104 = vmatpush3.bf16.msra.mxu1 %v2265_v26  ;;  %2081 = vmatprep.subr.bf16.mxu0 %v2266_v6 }
  0x63   : > { %2105 = vmatprep.subr.bf16.mxu1 %v2267_v7 }
  0x65   : > { %2082 = vmatpush3.bf16.msra.mxu0 %v2266_v6 }
  0x66   : > { %2106 = vmatpush3.bf16.msra.mxu1 %v2267_v7  ;;  %2083 = vmatprep.subr.bf16.mxu0 %v2268_v55 }
  0x67   : > { %2107 = vmatprep.subr.bf16.mxu1 %v2269_v60 }
  0x69   : > { %2084 = vmatpush3.bf16.msra.mxu0 %v2268_v55 }
  0x6a   : > { %2108 = vmatpush3.bf16.msra.mxu1 %v2269_v60  ;;  %2117 = vmatprep.subr.bf16.mxu0 %v2270_v61 }
  0x6b   : > { %2141 = vmatprep.subr.bf16.mxu1 %v2271_v9 }
  0x6c   : > { %2086 = vmatmul.mubr.bf16.vlgmr.msra.gmra.mxu0 %v852_v58 }
  0x6d   : > { %2110 = vmatmul.mubr.bf16.vlgmr.msra.gmra.mxu1 %v998_v0  ;;  %2118 = vmatpush3.bf16.msra.mxu0 %v2270_v61 }
  0x6e   : > { %2142 = vmatpush3.bf16.msra.mxu1 %v2271_v9  ;;  %2119 = vmatprep.subr.bf16.mxu0 %v2272_v11 }
  0x6f   : > { %2143 = vmatprep.subr.bf16.mxu1 %v2273_v18  ;;  %2089 = vmatprep.mubr.bf16.mxu0 %v853_v20 }
  0x70   : > { %2113 = vmatprep.mubr.bf16.mxu1 %v999_v46 }
  0x71   : > { %2120 = vmatpush3.bf16.msra.mxu0 %v2272_v11 }
  0x72   : > { %2144 = vmatpush3.bf16.msra.mxu1 %v2273_v18  ;;  %2121 = vmatprep.subr.bf16.mxu0 %v2274_v19 }
  0x73   : > { %2145 = vmatprep.subr.bf16.mxu1 %v2275_v59 }
  0x74   : > { %2090 = vmatmul.mubr.bf16.gmra.mxu0 %v854_v5  ;;  %v2287_v5 = vld [vmem:[%s2857_s1 + $0x230] sm:$0xff]  }
  0x75   : > { %2122 = vmatpush3.bf16.msra.mxu0 %v2274_v19  ;;  %2114 = vmatmul.mubr.bf16.gmra.mxu1 %v1000_v22 }
  0x76   : > { %2146 = vmatpush3.bf16.msra.mxu1 %v2275_v59  ;;  %2123 = vmatprep.subr.bf16.mxu0 %v2276_v27 }
  0x77   : > { %2147 = vmatprep.subr.bf16.mxu1 %v2277_v13  ;;  %2133 = vmatprep.mubr.bf16.mxu0 %v2454_v57  ;;  %v2282_v57 = vld [vmem:[%s2857_s1 + $0x188] sm:$0xff]  }
  0x78   : > { %2157 = vmatprep.mubr.bf16.mxu1 %v2438_v52  ;;  %v2283_v52 = vld [vmem:[%s2857_s1 + $0x1c8] sm:$0xff]  }
  0x79   : > { %2124 = vmatpush3.bf16.msra.mxu0 %v2276_v27 }
  0x7a   : > { %2148 = vmatpush3.bf16.msra.mxu1 %v2277_v13  ;;  %2125 = vmatprep.subr.bf16.mxu0 %v2278_v15 }
  0x7b   : > { %2149 = vmatprep.subr.bf16.mxu1 %v2279_v25 }
  0x7d   : > { %2126 = vmatpush3.bf16.msra.mxu0 %v2278_v15 }
  0x7e   : > { %2150 = vmatpush3.bf16.msra.mxu1 %v2279_v25  ;;  %2127 = vmatprep.subr.bf16.mxu0 %v2280_v31 }
  0x7f   : > { %2151 = vmatprep.subr.bf16.mxu1 %v2281_v54 }
  0x81   : > { %2128 = vmatpush3.bf16.msra.mxu0 %v2280_v31 }
  0x82   : > { %2152 = vmatpush3.bf16.msra.mxu1 %v2281_v54  ;;  %2129 = vmatprep.subr.bf16.mxu0 %v2282_v57 }
  0x83   : > { %2153 = vmatprep.subr.bf16.mxu1 %v2283_v52 }
  0x85   : > { %2130 = vmatpush3.bf16.msra.mxu0 %v2282_v57 }
  0x86   : > { %2154 = vmatpush3.bf16.msra.mxu1 %v2283_v52  ;;  %2131 = vmatprep.subr.bf16.mxu0 %v2284_v21 }
  0x87   : > { %2155 = vmatprep.subr.bf16.mxu1 %v2285_v28 }
  0x89   : > { %2132 = vmatpush3.bf16.msra.mxu0 %v2284_v21 }
  0x8a   : > { %2156 = vmatpush3.bf16.msra.mxu1 %v2285_v28  ;;  %2165 = vmatprep.subr.bf16.mxu0 %v2286_v3 }
  0x8b   : > { %2189 = vmatprep.subr.bf16.mxu1 %v2286_v3 }
  0x8c   : > { %2134 = vmatmul.mubr.bf16.vlgmr.msra.gmra.mxu0 %v2471_v1  ;;  %v2290_v1 = vld [vmem:[%s2857_s1 + $0x220] sm:$0xff]  }
  0x8d   : > { %2158 = vmatmul.mubr.bf16.vlgmr.msra.gmra.mxu1 %v2521_v29  ;;  %2166 = vmatpush3.bf16.msra.mxu0 %v2286_v3  ;;  %v2291_v29 = vld [vmem:[%s2857_s1 + $0x218] sm:$0xff]  }
  0x8e   : > { %2197 = vmatpush3.bf16.msra.mxu1 %v2286_v3  ;;  %2167 = vmatprep.subr.bf16.mxu0 %v2287_v5 }
  0x8f   : > { %2190 = vmatprep.subr.bf16.mxu1 %v2287_v5  ;;  %2137 = vmatprep.mubr.bf16.mxu0 %v2538_v37  ;;  %v2293_v37 = vld [vmem:[%s2857_s1 + $0x208] sm:$0xff]  }
  0x90   : > { %2161 = vmatprep.mubr.bf16.mxu1 %v2534_v34  ;;  %v2292_v34 = vld [vmem:[%s2857_s1 + $0x210] sm:$0xff]  }
  0x91   : > { %2168 = vmatpush3.bf16.msra.mxu0 %v2287_v5 }
  0x92   : > { %2198 = vmatpush3.bf16.msra.mxu1 %v2287_v5  ;;  %2169 = vmatprep.subr.bf16.mxu0 %v2289_v10 }
  0x93   : > { %2191 = vmatprep.subr.bf16.mxu1 %v2289_v10 }
  0x94   : > { %2138 = vmatmul.mubr.bf16.gmra.mxu0 %v1788_v12 }
  0x95   : > { %2170 = vmatpush3.bf16.msra.mxu0 %v2289_v10  ;;  %2162 = vmatmul.mubr.bf16.gmra.mxu1 %v1284_v35 }
  0x96   : > { %2199 = vmatpush3.bf16.msra.mxu1 %v2289_v10  ;;  %2171 = vmatprep.subr.bf16.mxu0 %v2290_v1 }
  0x97   : > { %2192 = vmatprep.subr.bf16.mxu1 %v2290_v1  ;;  %2181 = vmatprep.mubr.bf16.mxu0 %v2607_v8 }
  0x98   : > { %2185 = vmatprep.mubr.bf16.mxu1 %v2663_v62 }
  0x99   : > { %2172 = vmatpush3.bf16.msra.mxu0 %v2290_v1 }
  0x9a   : > { %2200 = vmatpush3.bf16.msra.mxu1 %v2290_v1  ;;  %2173 = vmatprep.subr.bf16.mxu0 %v2291_v29 }
  0x9b   : > { %2193 = vmatprep.subr.bf16.mxu1 %v2291_v29 }
  0x9d   : > { %2174 = vmatpush3.bf16.msra.mxu0 %v2291_v29 }
  0x9e   : > { %2201 = vmatpush3.bf16.msra.mxu1 %v2291_v29  ;;  %2175 = vmatprep.subr.bf16.mxu0 %v2292_v34 }
  0x9f   : > { %2194 = vmatprep.subr.bf16.mxu1 %v2292_v34 }
  0xa1   : > { %2176 = vmatpush3.bf16.msra.mxu0 %v2292_v34 }
  0xa2   : > { %2202 = vmatpush3.bf16.msra.mxu1 %v2292_v34  ;;  %2177 = vmatprep.subr.bf16.mxu0 %v2293_v37 }
  0xa3   : > { %2195 = vmatprep.subr.bf16.mxu1 %v2293_v37 }
  0xa5   : > { %2178 = vmatpush3.bf16.msra.mxu0 %v2293_v37 }
  0xa6   : > { %2203 = vmatpush3.bf16.msra.mxu1 %v2293_v37  ;;  %2179 = vmatprep.subr.bf16.mxu0 %v2294_v24 }
  0xa7   : > { %2196 = vmatprep.subr.bf16.mxu1 %v2294_v24 }
  0xa9   : > { %2180 = vmatpush3.bf16.msra.mxu0 %v2294_v24 }
  0xaa   : > { %2204 = vmatpush3.bf16.msra.mxu1 %v2294_v24 }
  0xac   : > { %2182 = vmatmul.mubr.bf16.vlgmr.msra.gmra.mxu0 %v2638_v4 }
  0xad   : > { %2186 = vmatmul.mubr.bf16.vlgmr.msra.gmra.mxu1 %v1427_v53 }
  0xec   : > { %v1991_v8 = vpop.f32.mrf.mxu0 }
  0xed   : > { %v2015_v32 = vpop.f32.mrf.mxu1 }
  0xee   : > { %v384_v63 = vpop.f32.mrf.mxu0  ;;  %v506_v21 = vadd.f32 %v2015_v32, %v1991_v8 }
  0xef   : > { %v497_v62 = vpop.f32.mrf.mxu1 }
  0xf0   : > { %v1992_v56 = vpop.f32.mrf.mxu0  ;;  %v498_v10 = vadd.f32 %v497_v62, %v384_v63 }
  0xf1   : > { %v2016_v40 = vpop.f32.mrf.mxu1 }
  0xf2   : > { %v387_v38 = vpop.f32.mrf.mxu0  ;;  %v509_v34 = vadd.f32 %v2016_v40, %v1992_v56 }
  0xf3   : > { %v500_v2 = vpop.f32.mrf.mxu1 }
  0xf4   : > { %v1995_v39 = vpop.f32.mrf.mxu0  ;;  %v501_v32 = vadd.f32 %v500_v2, %v387_v38 }
  0xf5   : > { %v2019_v42 = vpop.f32.mrf.mxu1 }
  0xf6   : > { %v400_v41 = vpop.f32.mrf.mxu0  ;;  %v522_v3 = vadd.f32 %v2019_v42, %v1995_v39 }
  0xf7   : > { %v513_v36 = vpop.f32.mrf.mxu1 }
  0xf8   : > { %v1996_v43 = vpop.f32.mrf.mxu0  ;;  %v514_v1 = vadd.f32 %v513_v36, %v400_v41 }
  0xf9   : > { %v2020_v4 = vpop.f32.mrf.mxu1 }
  0xfa   : > { %v403_v45 = vpop.f32.mrf.mxu0 }
  0xfb   : > { %v516_v47 = vpop.f32.mrf.mxu1 }
  0xfc   : > { %v517_v62 = vadd.f32 %v516_v47, %v403_v45 }
 0x10c   : > { %v2039_v14 = vpop.f32.mrf.mxu0 }
 0x10d   : > { %v2063_v48 = vpop.f32.mrf.mxu1  ;;  %v697_v12 = vadd.f32 %v2039_v14, %v506_v21 }
 0x10e   : > { %v664_v44 = vpop.f32.mrf.mxu0 }
 0x10f   : > { %v806_v49 = vpop.f32.mrf.mxu1  ;;  %v695_v37 = vadd.f32 %v664_v44, %v498_v10 }
 0x110   : > { %v2040_v33 = vpop.f32.mrf.mxu0 }
 0x111   : > { %v2064_v51 = vpop.f32.mrf.mxu1  ;;  %v698_v39 = vadd.f32 %v2040_v33, %v509_v34  ;;  %v837_v21 = vadd.f32 %v806_v49, %v695_v37 }
 0x112   : > { %v667_v50 = vpop.f32.mrf.mxu0 }
 0x113   : > { %v809_v23 = vpop.f32.mrf.mxu1  ;;  %v696_v36 = vadd.f32 %v667_v50, %v501_v32  ;;  %v840_v44 = vadd.f32 %v2064_v51, %v698_v39 }
 0x114   : > { %v2043_v16 = vpop.f32.mrf.mxu0 }
 0x115   : > { %v2067_v30 = vpop.f32.mrf.mxu1  ;;  %v701_v29 = vadd.f32 %v2043_v16, %v522_v3 }
 0x116   : > { %v680_v17 = vpop.f32.mrf.mxu0 }
 0x117   : > { %v822_v35 = vpop.f32.mrf.mxu1  ;;  %v843_v63 = vadd.f32 %v2067_v30, %v701_v29 }
 0x118   : > { %v2044_v26 = vpop.f32.mrf.mxu0 }
 0x119   : > { %v2068_v6 = vpop.f32.mrf.mxu1 }
 0x11a   : > { %v683_v53 = vpop.f32.mrf.mxu0 }
 0x11b   : > { %v825_v55 = vpop.f32.mrf.mxu1  ;;  %v700_v16 = vadd.f32 %v683_v53, %v517_v62 }
 0x12c   : > { %v2087_v7 = vpop.f32.mrf.mxu0 }
 0x12d   : > { %v2111_v61 = vpop.f32.mrf.mxu1 }
 0x12e   : > { %v954_v60 = vpop.f32.mrf.mxu0 }
 0x12f   : > { %v1100_v58 = vpop.f32.mrf.mxu1  ;;  %v985_v10 = vadd.f32 %v954_v60, %v837_v21 }
 0x130   : > { %v2088_v9 = vpop.f32.mrf.mxu0 }
 0x131   : > { %v2112_v11 = vpop.f32.mrf.mxu1  ;;  %v988_v2 = vadd.f32 %v2088_v9, %v840_v44  ;;  %v1131_v30 = vadd.f32 %v1100_v58, %v985_v10 }
 0x132   : > { %v957_v0 = vpop.f32.mrf.mxu0 }
 0x133   : > { %v2824_v20 = vpop.f32.mrf.mxu1  ;;  %v1134_v51 = vadd.f32 %v2112_v11, %v988_v2 }
 0x134   : > { %v2091_v18 = vpop.f32.mrf.mxu0  ;;  %2860 = vst [vmem:[#allocation2_spill] sm:$0xff] %v2824_v20  ;;  %v525_v20 = vadd.f32 %v2020_v4, %v1996_v43 }
 0x135   : > { %v2115_v46 = vpop.f32.mrf.mxu1  ;;  %v991_v40 = vadd.f32 %v2091_v18, %v843_v63 }
 0x136   : > { %v970_v19 = vpop.f32.mrf.mxu0  ;;  %v702_v14 = vadd.f32 %v2044_v26, %v525_v20 }
 0x137   : > { %v1116_v59 = vpop.f32.mrf.mxu1  ;;  %v1137_v33 = vadd.f32 %v2115_v46, %v991_v40 }
 0x138   : > { %v2092_v22 = vpop.f32.mrf.mxu0  ;;  %v844_v43 = vadd.f32 %v2068_v6, %v702_v14 }
 0x139   : > { %v2116_v27 = vpop.f32.mrf.mxu1 }
 0x13a   : > { %v973_v13 = vpop.f32.mrf.mxu0  ;;  %v992_v45 = vadd.f32 %v2092_v22, %v844_v43 }
 0x13b   : > { %v1119_v25 = vpop.f32.mrf.mxu1 }
 0x13c   : > { %v1138_v18 = vadd.f32 %v2116_v27, %v992_v45 }
 0x14c   : > { %v2135_v15 = vpop.f32.mrf.mxu0 }
 0x14d   : > { %v2159_v31 = vpop.f32.mrf.mxu1 }
 0x14e   : > { %v1239_v54 = vpop.f32.mrf.mxu0 }
 0x14f   : > { %v2826_v57 = vpop.f32.mrf.mxu1  ;;  %v1270_v60 = vadd.f32 %v1239_v54, %v1131_v30 }
 0x150   : > { %2861 = vst [vmem:[#allocation3_spill] sm:$0xff] %v2826_v57  ;;  %v2136_v52 = vpop.f32.mrf.mxu0  ;;  %v699_v57 = vadd.f32 %v680_v17, %v514_v1  ;;  %v838_v17 = vadd.f32 %v809_v23, %v696_v36  ;;  %v2864_v23 = vld [vmem:[#allocation2_spill] sm:$0xff] }
 0x151   : > { %v2828_v28 = vpop.f32.mrf.mxu1 }
 0x152   : > { %2862 = vst [vmem:[#allocation4_spill] sm:$0xff] %v2828_v28  ;;  %v1242_v5 = vpop.f32.mrf.mxu0  ;;  %v839_v28 = vadd.f32 %v2063_v48, %v697_v12  ;;  %v841_v3 = vadd.f32 %v822_v35, %v699_v57  ;;  %v842_v48 = vadd.f32 %v825_v55, %v700_v16  ;;  %v986_v49 = vadd.f32 %v957_v0, %v838_v17 }
 0x153   : > { %v2830_v24 = vpop.f32.mrf.mxu1  ;;  %v1273_v55 = vadd.f32 %v2136_v52, %v1134_v51 }
 0x154   : > { %2863 = vst [vmem:[#allocation5_spill] sm:$0xff] %v2830_v24  ;;  %v2139_v8 = vpop.f32.mrf.mxu0  ;;  %v987_v41 = vadd.f32 %v2087_v7, %v839_v28  ;;  %v989_v4 = vadd.f32 %v970_v19, %v841_v3  ;;  %v990_v53 = vadd.f32 %v973_v13, %v842_v48 }
 0x155   : > { %v2163_v42 = vpop.f32.mrf.mxu1  ;;  %v1276_v7 = vadd.f32 %v2139_v8, %v1137_v33 }
 0x156   : > { %v1255_v56 = vpop.f32.mrf.mxu0  ;;  %v1133_v38 = vadd.f32 %v2111_v61, %v987_v41  ;;  %v1135_v35 = vadd.f32 %v1116_v59, %v989_v4  ;;  %v1132_v61 = vadd.f32 %v2864_v23, %v986_v49  ;;  %v1136_v19 = vadd.f32 %v1119_v25, %v990_v53  ;;  %v1861_v59 = vld [vmem:[%s2858_s2] ss:$0 sm:$0xff] }
 0x157   : > { %v1400_v24 = vpop.f32.mrf.mxu1  ;;  %v1421_v58 = vadd.f32 %v2163_v42, %v1276_v7  ;;  %v2865_v13 = vld [vmem:[#allocation3_spill] sm:$0xff] }
 0x158   : > { %v2140_v47 = vpop.f32.mrf.mxu0  ;;  %v1272_v50 = vadd.f32 %v2135_v15, %v1133_v38  ;;  %v1274_v6 = vadd.f32 %v1255_v56, %v1135_v35  ;;  %v1415_v11 = vadd.f32 %v2865_v13, %v1270_v60  ;;  %v1271_v15 = vadd.f32 %v1242_v5, %v1132_v61 }
 0x159   : > { %v2164_v26 = vpop.f32.mrf.mxu1  ;;  %v1277_v22 = vadd.f32 %v2140_v47, %v1138_v18  ;;  %v2866_v52 = vld [vmem:[#allocation4_spill] sm:$0xff] }
 0x15a   : > { %v1258_v20 = vpop.f32.mrf.mxu0  ;;  %v1417_v9 = vadd.f32 %v2159_v31, %v1272_v50  ;;  %v1419_v57 = vadd.f32 %v1400_v24, %v1274_v6  ;;  %v1418_v12 = vadd.f32 %v2866_v52, %v1273_v55 }
 0x15b   : > { %v1403_v46 = vpop.f32.mrf.mxu1  ;;  %v1275_v28 = vadd.f32 %v1258_v20, %v1136_v19  ;;  %v1422_v5 = vadd.f32 %v2164_v26, %v1277_v22  ;;  %v2867_v32 = vld [vmem:[#allocation5_spill] sm:$0xff] }
 0x15c   : > { %v1416_v39 = vadd.f32 %v2867_v32, %v1271_v15 }
 0x15d   : > { %v1420_v14 = vadd.f32 %v1403_v46, %v1275_v28 }
 0x16c   : > { %v2183_v0 = vpop.f32.mrf.mxu0 }
 0x16d   : > { %v1560_v27 = vadd.f32 %v2183_v0, %v1417_v9  ;;  %v2187_v54 = vpop.f32.mrf.mxu1 }
 0x16e   : > { %v1564_v25 = vadd.f32 %v2187_v54, %v1421_v58  ;;  %v1527_v31 = vpop.f32.mrf.mxu0 }
 0x16f   : > { %v1575_v1 = vadd.f32 %v1861_v59, %v1560_v27  ;;  %v1558_v29 = vadd.f32 %v1527_v31, %v1415_v11  ;;  %v1543_v34 = vpop.f32.mrf.mxu1 }
 0x170   : > { %v1579_v37 = vadd.f32 %v1861_v59, %v1564_v25  ;;  %v1562_v8 = vadd.f32 %v1543_v34, %v1419_v57  ;;  %v2184_v24 = vpop.f32.mrf.mxu0 }
 0x171   : > { %1583 = vst [vmem:[%s2841_s19 + $0x10] sm:$0xff] %v1575_v1  ;;  %v1573_v42 = vadd.f32 %v1861_v59, %v1558_v29  ;;  %v1561_v62 = vadd.f32 %v2184_v24, %v1418_v12  ;;  %v2188_v63 = vpop.f32.mrf.mxu1 }
 0x172   : > { %1587 = vst [vmem:[%s2841_s19 + $0x30] sm:$0xff] %v1579_v37  ;;  %v1577_v21 = vadd.f32 %v1861_v59, %v1562_v8  ;;  %v1565_v36 = vadd.f32 %v2188_v63, %v1422_v5  ;;  %v1530_v41 = vpop.f32.mrf.mxu0 }
 0x173   : > { %1581 = vst [vmem:[%s2841_s19] sm:$0xff] %v1573_v42  ;;  %v1576_v3 = vadd.f32 %v1861_v59, %v1561_v62  ;;  %v1559_v16 = vadd.f32 %v1530_v41, %v1416_v39  ;;  %v1546_v40 = vpop.f32.mrf.mxu1 }
 0x174   : > { %1585 = vst [vmem:[%s2841_s19 + $0x20] sm:$0xff] %v1577_v21  ;;  %v1580_v56 = vadd.f32 %v1861_v59, %v1565_v36  ;;  %v1563_v44 = vadd.f32 %v1546_v40, %v1420_v14 }
 0x175   : > { %1584 = vst [vmem:[%s2841_s19 + $0x18] sm:$0xff] %v1576_v3  ;;  %v1574_v10 = vadd.f32 %v1861_v59, %v1559_v16 }
 0x176   : > { %1588 = vst [vmem:[%s2841_s19 + $0x38] sm:$0xff] %v1580_v56  ;;  %v1578_v43 = vadd.f32 %v1861_v59, %v1563_v44 }
 0x177   : > { %1582 = vst [vmem:[%s2841_s19 + $0x8] sm:$0xff] %v1574_v10 }
 0x178   : > { %1586 = vst [vmem:[%s2841_s19 + $0x28] sm:$0xff] %v1578_v43 }
 0x179 PF: > { %s13_s12 = sadd.s32 1, %s2301_s12  }
 0x17a   : > { %p10_p4 = scmp.ge.s32.totalorder %s13_s12, 4  }
 0x17c   :  { %12 = sbr.rel (!%p10_p4) target bundleno = 1 (0x1), region = 70 }

// kernel: dcnv3_block_forward.12
= control target key start
LH: loop header
LB: loop body
LE: loop exit
PB: predicated region body
PF: predicated region fallthrough
CT: control target
= control target key end

     0   :  { %s2142_s21 = smov 0   ;;  %s2615_s0 = inlined_call_operand.vmem [shape: bf16[2,5,5,128], index: 0, kind: input, shape index: {}]   ;;  %s2616_s1 = inlined_call_operand.vmem [shape: bf16[2,5,5,128], index: 1, kind: input, shape index: {}]   ;;  %s2617_s2 = inlined_call_operand.vmem [shape: bf16[2,5,5,128], index: 2, kind: input, shape index: {}]   ;;  %s2618_s3 = inlined_call_operand.vmem [shape: bf16[2,5,5,128], index: 3, kind: input, shape index: {}]   ;;  %s2619_s4 = inlined_call_operand.vmem [shape: bf16[9,128,128], index: 4, kind: input, shape index: {}]   ;;  %s2620_s5 = inlined_call_operand.vmem [shape: f32[1,128], index: 5, kind: input, shape index: {}]   ;;  %s2621_s6 = inlined_call_operand.vmem [shape: f32[2,16,128], index: 6, kind: output, shape index: {}]  }
   0x1 LB: > { %s1529_s22 = sadd.s32 4294967295, %s2103_s21   ;;  %p1533_p0 = scmp.ge.s32.totalorder %s2103_s21, 1  ;;  %s2103_s21 = sphi %s2142_s21, %s16_s21  }
   0x2   : > { %p242_p1 = scmp.lt.s32.totalorder %s2103_s21, 3 }
   0x4   : > { %p243_p2 = pnand %p1533_p0, %p242_p1 }
   0x5   : > { %p287_p3 = scmp.lt.s32.totalorder (!%p243_p2), %s1529_s22, 1 }
   0x6   : > { %246 = sbr.rel (%p243_p2) target bundleno = 374 (0x176), region = 44 }
   0xb   : > { %v2025_v0 = vld [vmem:[%s2619_s4 + $0x78] sm:$0xff]   ;;  %v2105_v1 = vmov 0.0   ;;  %v2027_v3 = vld [vmem:[%s2619_s4 + $0x70] sm:$0xff]   ;;  %vm2106_vm0 = vmmov 0   ;;  %s2625_s22 = smov (!%p287_p3, %s1529_s22), 1  ;;  %v2029_v5 = vld [vmem:[%s2619_s4 + $0x68] sm:$0xff]  }
   0xc   : > { %1834 = vmatprep.subr.bf16.mxu0 %v2105_v1  ;;  %1854 = vmatprep.subr.bf16.mxu1 %v2105_v1  ;;  %v2026_v2 = vld [vmem:[%s2619_s4 + $0x38] sm:$0xff]   ;;  %v2028_v4 = vld [vmem:[%s2619_s4 + $0x30] sm:$0xff]   ;;  %v2030_v6 = vld [vmem:[%s2619_s4 + $0x28] sm:$0xff]   ;;  %s2181_s11 = smul.u32 20, %s2625_s22  ;;  %vm582_vm1 = vcmask 1042432   ;;  %vm583_vm2 = vcmask 1046532  }
   0xd   : > { %1835 = vmatpush3.bf16.msra.mxu0 %v2025_v0  ;;  %1850 = vmatprep.mubr.msk.bf16.mxu0 %vm2106_vm0, %v2105_v1  ;;  %v2031_v7 = vld [vmem:[%s2619_s4 + $0x60] sm:$0xff]   ;;  %v2033_v9 = vld [vmem:[%s2619_s4 + $0x58] sm:$0xff]   ;;  %v2035_v11 = vld [vmem:[%s2619_s4 + $0x50] sm:$0xff]   ;;  %s1752_s9 = sshll.u32 %s2625_s22, 4 }
   0xe   : > { %1855 = vmatpush3.bf16.msra.mxu1 %v2026_v2  ;;  %1836 = vmatprep.subr.bf16.mxu0 %v2105_v1  ;;  %v2032_v8 = vld [vmem:[%s2619_s4 + $0x20] sm:$0xff]   ;;  %s2195_s18 = scalar_lea.vmem %s2616_s1, %s2181_s11  ;;  %s2204_s25 = scalar_lea.vmem %s2615_s0, %s2181_s11  ;;  %v2034_v10 = vld [vmem:[%s2619_s4 + $0x18] sm:$0xff]   ;;  %v2036_v14 = vld [vmem:[%s2619_s4 + $0x10] sm:$0xff]  }
   0xf   : > { %1856 = vmatprep.subr.bf16.mxu1 %v2105_v1  ;;  %1870 = vmatprep.mubr.msk.bf16.mxu1 %vm2106_vm0, %v2105_v1  ;;  %v324_v12 = vld [vmem:[%s2195_s18 + $0x4] sm:$0x7]  ;;  %v325_v13 = vld [vmem:[%s2195_s18 + $0x8] sm:$0x7]  ;;  %v323_v15 = vld [vmem:[%s2195_s18] sm:$0x7]  ;;  %s301_s19 = scalar_lea.vmem %s2617_s2, %s2181_s11  ;;  %s306_s13 = scalar_lea.vmem %s2618_s3, %s2181_s11 }
  0x10   : > { %v2221_v16 = vld [vmem:[%s2195_s18 + $0xc] sm:$0x7]  ;;  %v329_v17 = vunpack.c.l.bf16 %v324_v12  ;;  %v330_v18 = vunpack.c.l.bf16 %v325_v13  ;;  %v314_v19 = vld [vmem:[%s2204_s25 + $0x4] sm:$0x7]  ;;  %v313_v20 = vld [vmem:[%s2204_s25] sm:$0x7]  ;;  %v328_v26 = vunpack.c.l.bf16 %v323_v15  ;;  %s311_s15 = scalar_lea.vmem %s2621_s6, %s1752_s9 }
  0x11   : > { %1837 = vmatpush3.bf16.msra.mxu0 %v2027_v3  ;;  %v315_v21 = vld [vmem:[%s2204_s25 + $0x8] sm:$0x7]  ;;  %v316_v22 = vld [vmem:[%s2204_s25 + $0xc] sm:$0x7]  ;;  %v2231_v24 = vunpack.c.l.bf16 %v314_v19  ;;  %v331_v27 = vunpack.c.l.bf16 %v2221_v16  ;;  %v2239_v29 = vunpack.c.l.bf16 %v313_v20  ;;  %v2039_v35 = vld [vmem:[%s2619_s4 + $0x40] sm:$0xff]  }
  0x12   : > { %1857 = vmatpush3.bf16.msra.mxu1 %v2028_v4  ;;  %1838 = vmatprep.subr.bf16.mxu0 %v2105_v1  ;;  %v2228_v23 = vcombine.low %v329_v17, %v330_v18  ;;  %v2233_v25 = vunpack.c.l.bf16 %v315_v21  ;;  %v2037_v28 = vld [vmem:[%s2619_s4 + $0x48] sm:$0xff]   ;;  %v2241_v30 = vunpack.c.l.bf16 %v316_v22  ;;  %v378_v33 = vcombine.low %v328_v26, %v329_v17  ;;  %v2040_v39 = vld [vmem:[%s2619_s4] sm:$0xff]   ;;  %v2041_v41 = vld [vmem:[%s2619_s4 + $0xb8] sm:$0xff]  }
  0x13   : > { %1858 = vmatprep.subr.bf16.mxu1 %v2105_v1  ;;  %v2038_v32 = vld [vmem:[%s2619_s4 + $0x8] sm:$0xff]   ;;  %v379_v34 = vcombine.low %v330_v18, %v331_v27  ;;  %v353_v36 = vcombine.low %v2239_v29, %v2231_v24  ;;  %v579_v38 = vcombine.high %v2231_v24, %v2231_v24  ;;  %v2042_v43 = vld [vmem:[%s2619_s4 + $0xf8] sm:$0xff]   ;;  %v1573_v45 = vrot.slane %v2231_v24, 9  ;;  %v2043_v49 = vld [vmem:[%s2619_s4 + $0xb0] sm:$0xff]  }
  0x14   : > { %v1082_v31 = vcombine.low %v2231_v24, %v2233_v25  ;;  %v354_v37 = vcombine.low %v2233_v25, %v2241_v30  ;;  %v580_v40 = vcombine.high %v2233_v25, %v2233_v25  ;;  %v1574_v47 = vrot.slane %v2233_v25, 9  ;;  %vm2282_vm3 = vmor %vm582_vm1, %vm583_vm2  ;;  %v2044_v51 = vld [vmem:[%s2619_s4 + $0xf0] sm:$0xff]   ;;  %v2045_v55 = vld [vmem:[%s2619_s4 + $0xa8] sm:$0xff]  }
  0x15   : > { %1839 = vmatpush3.bf16.msra.mxu0 %v2029_v5  ;;  %v382_v42 = vpack.c.bf16 %v379_v34, %v378_v33  ;;  %v591_v46 = vrot.slane %v579_v38, 5  ;;  %v2046_v56 = vld [vmem:[%s2619_s4 + $0xe8] sm:$0xff]   ;;  %v578_v57 = vcombine.high %v2239_v29, %v2239_v29  ;;  %v2047_v58 = vld [vmem:[%s2619_s4 + $0xa0] sm:$0xff]   ;;  %v581_v60 = vcombine.high %v2241_v30, %v2241_v30  ;;  %v2049_v62 = vld [vmem:[%s2619_s4 + $0x98] sm:$0xff]  }
  0x16   : > { %1859 = vmatpush3.bf16.msra.mxu1 %v2030_v6  ;;  %1840 = vmatprep.subr.bf16.mxu0 %v2105_v1  ;;  %v357_v44 = vpack.c.bf16 %v354_v37, %v353_v36  ;;  %v595_v48 = vrot.slane %v580_v40, 5  ;;  %v2048_v59 = vld [vmem:[%s2619_s4 + $0xe0] sm:$0xff]   ;;  %v1572_v61 = vrot.slane %v2239_v29, 9  ;;  %v2050_v0 = vld [vmem:[%s2619_s4 + $0xd8] sm:$0xff]   ;;  %v1575_v2 = vrot.slane %v2241_v30, 9  ;;  %v2051_v3 = vld [vmem:[%s2619_s4 + $0x90] sm:$0xff]  }
  0x17   : > { %1860 = vmatprep.subr.bf16.mxu1 %v2105_v1  ;;  %v2292_v52 = vsel %vm2282_vm3, %v1573_v45, %v591_v46  ;;  %v587_v63 = vrot.slane %v578_v57, 5  ;;  %v599_v4 = vrot.slane %v581_v60, 5  ;;  %v2052_v5 = vld [vmem:[%s2619_s4 + $0xd0] sm:$0xff]   ;;  %v333_v6 = vld [vmem:[%s301_s19] sm:$0x7]  ;;  %v2053_v12 = vld [vmem:[%s2619_s4 + $0x88] sm:$0xff]  }
  0x18   : > { %v2296_v53 = vsel %vm2282_vm3, %v1574_v47, %v595_v48  ;;  %v2356_v13 = vunpack.c.l.bf16 %v333_v6  ;;  %v2054_v18 = vld [vmem:[%s2619_s4 + $0xc8] sm:$0xff]   ;;  %v2055_v21 = vld [vmem:[%s2619_s4 + $0x80] sm:$0xff]   ;;  %v2058_v34 = vld [vmem:[%s2619_s4 + $0x178] sm:$0xff]  }
  0x19   : > { %1841 = vmatpush3.bf16.msra.mxu0 %v2031_v7  ;;  %v1314_v54 = vcombine.low %v2292_v52, %v2296_v53  ;;  %v334_v7 = vld [vmem:[%s301_s19 + $0x4] sm:$0x7]  ;;  %v2060_v36 = vld [vmem:[%s2619_s4 + $0x170] sm:$0xff]   ;;  %v2061_v37 = vld [vmem:[%s2619_s4 + $0x128] sm:$0xff]  }
  0x1a   : > { %1861 = vmatpush3.bf16.msra.mxu1 %v2032_v8  ;;  %1842 = vmatprep.subr.bf16.mxu0 %v2105_v1  ;;  %v335_v8 = vld [vmem:[%s301_s19 + $0x8] sm:$0x7]  ;;  %v317_v38 = vld [vmem:[%s2204_s25 + $0x10] sm:$0x7]  ;;  %v2063_v46 = vld [vmem:[%s2619_s4 + $0x120] sm:$0xff]   ;;  %v948_v16 = vcombine.high %v2356_v13, %v2356_v13 }
  0x1b   : > { %1862 = vmatprep.subr.bf16.mxu1 %v2105_v1  ;;  %v2360_v15 = vunpack.c.l.bf16 %v335_v8  ;;  %v322_v40 = vunpack.c.l.bf16 %v317_v38  ;;  %v2067_v60 = vld [vmem:[%s2619_s4 + $0x110] sm:$0xff]   ;;  %v2080_v38 = vld [vmem:[%s2619_s4 + $0x1e0] sm:$0xff]  }
  0x1d   : > { %1843 = vmatpush3.bf16.msra.mxu0 %v2033_v9  ;;  %v336_v9 = vld [vmem:[%s301_s19 + $0xc] sm:$0x7]  ;;  %v1724_v45 = vrot.slane %v322_v40, 9 }
  0x1e   : > { %1863 = vmatpush3.bf16.msra.mxu1 %v2034_v10  ;;  %1844 = vmatprep.subr.bf16.mxu0 %v2105_v1  ;;  %v588_v10 = vsel %vm2282_vm3, %v1572_v61, %v587_v63  ;;  %v2362_v17 = vunpack.c.l.bf16 %v336_v9  ;;  %v341_v61 = vld [vmem:[%s306_s13] sm:$0x7] }
  0x1f   : > { %1864 = vmatprep.subr.bf16.mxu1 %v2105_v1  ;;  %v601_v19 = vcombine.low %v588_v10, %v2292_v52  ;;  %v2068_v52 = vld [vmem:[%s2619_s4 + $0x150] sm:$0xff]  }
  0x20   : > { %v719_v26 = vcombine.low %v2360_v15, %v2362_v17  ;;  %v951_v57 = vcombine.high %v2362_v17, %v2362_v17 }
  0x21   : > { %1845 = vmatpush3.bf16.msra.mxu0 %v2035_v11  ;;  %v2351_v11 = vsel %vm2282_vm3, %v1575_v2, %v599_v4  ;;  %v342_v2 = vld [vmem:[%s306_s13 + $0x4] sm:$0x7]  ;;  %v344_v4 = vld [vmem:[%s306_s13 + $0xc] sm:$0x7] }
  0x22   : > { %1865 = vmatpush3.bf16.msra.mxu1 %v2036_v14  ;;  %1846 = vmatprep.subr.bf16.mxu0 %v2105_v1  ;;  %v2358_v14 = vunpack.c.l.bf16 %v334_v7  ;;  %v602_v20 = vcombine.low %v2296_v53, %v2351_v11  ;;  %v1650_v53 = vrot.slane %v2360_v15, 9  ;;  %v966_v6 = vrot.slane %v951_v57, 5 }
  0x23   : > { %1866 = vmatprep.subr.bf16.mxu1 %v2105_v1  ;;  %v345_v7 = vunpack.c.l.bf16 %v341_v61  ;;  %v346_v8 = vunpack.c.l.bf16 %v342_v2  ;;  %v348_v10 = vunpack.c.l.bf16 %v344_v4 }
  0x24   : > { %v718_v22 = vcombine.low %v2356_v13, %v2358_v14  ;;  %v605_v29 = vpack.c.bf16 %v602_v20, %v601_v19  ;;  %v949_v25 = vcombine.high %v2358_v14, %v2358_v14  ;;  %v1649_v63 = vrot.slane %v2358_v14, 9  ;;  %v2071_v20 = vld [vmem:[%s2619_s4 + $0x100] sm:$0xff]  }
  0x25   : > { %1847 = vmatpush3.bf16.msra.mxu0 %v2037_v28  ;;  %v2056_v28 = vld [vmem:[%s2619_s4 + $0xc0] sm:$0xff]  }
  0x26   : > { %1867 = vmatpush3.bf16.msra.mxu1 %v2038_v32  ;;  %1848 = vmatprep.subr.bf16.mxu0 %v2105_v1  ;;  %v2057_v32 = vld [vmem:[%s2619_s4 + $0x138] sm:$0xff]   ;;  %v722_v33 = vpack.c.bf16 %v719_v26, %v718_v22  ;;  %v2072_v26 = vld [vmem:[%s2619_s4 + $0x140] sm:$0xff]  }
  0x27   : > { %1868 = vmatprep.subr.bf16.mxu1 %v2105_v1 }
  0x29   : > { %1849 = vmatpush3.bf16.msra.mxu0 %v2039_v35  ;;  %v2059_v35 = vld [vmem:[%s2619_s4 + $0x130] sm:$0xff]  }
  0x2a   : > { %1869 = vmatpush3.bf16.msra.mxu1 %v2040_v39  ;;  %1874 = vmatprep.subr.bf16.mxu0 %v2105_v1  ;;  %v2062_v39 = vld [vmem:[%s2619_s4 + $0x168] sm:$0xff]  }
  0x2b   : > { %1894 = vmatprep.subr.bf16.mxu1 %v2105_v1 }
  0x2c   : > { %1851 = vmatmul.mubr.bf16.vlgmr.msra.gmra.mxu0 %v382_v42  ;;  %v1083_v42 = vcombine.low %v2241_v30, %v322_v40  ;;  %v2064_v30 = vld [vmem:[%s2619_s4 + $0x160] sm:$0xff]  }
  0x2d   : > { %1871 = vmatmul.mubr.bf16.vlgmr.msra.gmra.mxu1 %v357_v44  ;;  %1875 = vmatpush3.bf16.msra.mxu0 %v2041_v41  ;;  %v327_v41 = vld [vmem:[%s2195_s18 + $0x10] sm:$0x7]  ;;  %v1309_v44 = vcombine.high %v322_v40, %v322_v40  ;;  %v2082_v40 = vld [vmem:[%s2619_s4 + $0x1d8] sm:$0xff]  }
  0x2e   : > { %1895 = vmatpush3.bf16.msra.mxu1 %v2042_v43  ;;  %1876 = vmatprep.subr.bf16.mxu0 %v2105_v1  ;;  %v332_v43 = vunpack.c.l.bf16 %v327_v41  ;;  %v2421_v47 = vpack.c.bf16 %v1083_v42, %v1082_v31  ;;  %v2065_v31 = vld [vmem:[%s2619_s4 + $0x118] sm:$0xff]   ;;  %v2083_v41 = vld [vmem:[%s2619_s4 + $0x190] sm:$0xff]  }
  0x2f   : > { %1896 = vmatprep.subr.bf16.mxu1 %v2105_v1  ;;  %1890 = vmatprep.mubr.msk.bf16.mxu0 %vm2106_vm0, %v2105_v1  ;;  %v2084_v42 = vld [vmem:[%s2619_s4 + $0x1d0] sm:$0xff]  }
  0x30   : > { %1910 = vmatprep.mubr.msk.bf16.mxu1 %vm2106_vm0, %v2105_v1  ;;  %v2425_v48 = vcombine.low %v331_v27, %v332_v43  ;;  %v2085_v43 = vld [vmem:[%s2619_s4 + $0x188] sm:$0xff]  }
  0x31   : > { %1877 = vmatpush3.bf16.msra.mxu0 %v2043_v49  ;;  %v1312_v49 = vrot.slane %v1309_v44, 5  ;;  %v2086_v44 = vld [vmem:[%s2619_s4 + $0x1c8] sm:$0xff]  }
  0x32   : > { %1897 = vmatpush3.bf16.msra.mxu1 %v2044_v51  ;;  %1878 = vmatprep.subr.bf16.mxu0 %v2105_v1  ;;  %v1200_v51 = vpack.c.bf16 %v2425_v48, %v2228_v23  ;;  %v2092_v23 = vld [vmem:[%s2619_s4 + $0x220] sm:$0xff]   ;;  %v2094_v48 = vld [vmem:[%s2619_s4 + $0x210] sm:$0xff]  }
  0x33   : > { %1898 = vmatprep.subr.bf16.mxu1 %v2105_v1  ;;  %v1313_v24 = vsel %vm2282_vm3, %v1724_v45, %v1312_v49  ;;  %v2087_v45 = vld [vmem:[%s2619_s4 + $0x180] sm:$0xff]   ;;  %v2089_v49 = vld [vmem:[%s2619_s4 + $0x238] sm:$0xff]  }
  0x34   : > { %v1315_v27 = vcombine.low %v2351_v11, %v1313_v24  ;;  %v2069_v11 = vld [vmem:[%s2619_s4 + $0x108] sm:$0xff]  }
  0x35   : > { %1879 = vmatpush3.bf16.msra.mxu0 %v2045_v55  ;;  %v2066_v55 = vld [vmem:[%s2619_s4 + $0x158] sm:$0xff]   ;;  %v2091_v24 = vld [vmem:[%s2619_s4 + $0x228] sm:$0xff]  }
  0x36   : > { %1899 = vmatpush3.bf16.msra.mxu1 %v2046_v56  ;;  %1880 = vmatprep.subr.bf16.mxu0 %v2105_v1  ;;  %v950_v56 = vcombine.high %v2360_v15, %v2360_v15 }
  0x37   : > { %1900 = vmatprep.subr.bf16.mxu1 %v2105_v1 }
  0x39   : > { %1881 = vmatpush3.bf16.msra.mxu0 %v2047_v58  ;;  %v2459_v58 = vpack.c.bf16 %v1315_v27, %v1314_v54  ;;  %v962_v54 = vrot.slane %v950_v56, 5 }
  0x3a   : > { %1901 = vmatpush3.bf16.msra.mxu1 %v2048_v59  ;;  %1882 = vmatprep.subr.bf16.mxu0 %v2105_v1  ;;  %v1648_v59 = vrot.slane %v2356_v13, 9  ;;  %v2070_v13 = vld [vmem:[%s2619_s4 + $0x148] sm:$0xff]  }
  0x3b   : > { %1902 = vmatprep.subr.bf16.mxu1 %v2105_v1  ;;  %v963_v15 = vsel %vm2282_vm3, %v1650_v53, %v962_v54 }
  0x3d   : > { %1883 = vmatpush3.bf16.msra.mxu0 %v2049_v62  ;;  %v954_v62 = vrot.slane %v948_v16, 5  ;;  %v2096_v16 = vld [vmem:[%s2619_s4 + $0x200] sm:$0xff]  }
  0x3e   : > { %1903 = vmatpush3.bf16.msra.mxu1 %v2050_v0  ;;  %1884 = vmatprep.subr.bf16.mxu0 %v2105_v1  ;;  %v958_v0 = vrot.slane %v949_v25, 5 }
  0x3f   : > { %1904 = vmatprep.subr.bf16.mxu1 %v2105_v1 }
  0x40   : > { %v959_v14 = vsel %vm2282_vm3, %v1649_v63, %v958_v0 }
  0x41   : > { %1885 = vmatpush3.bf16.msra.mxu0 %v2051_v3  ;;  %v343_v3 = vld [vmem:[%s306_s13 + $0x8] sm:$0x7] }
  0x42   : > { %1905 = vmatpush3.bf16.msra.mxu1 %v2052_v5  ;;  %1886 = vmatprep.subr.bf16.mxu0 %v2105_v1  ;;  %v1651_v5 = vrot.slane %v2362_v17, 9  ;;  %v347_v9 = vunpack.c.l.bf16 %v343_v3 }
  0x43   : > { %1906 = vmatprep.subr.bf16.mxu1 %v2105_v1 }
  0x44   : > { %v967_v17 = vsel %vm2282_vm3, %v1651_v5, %v966_v6  ;;  %v836_v19 = vcombine.low %v347_v9, %v348_v10 }
  0x45   : > { %1887 = vmatpush3.bf16.msra.mxu0 %v2053_v12  ;;  %v955_v12 = vsel %vm2282_vm3, %v1648_v59, %v954_v62  ;;  %v969_v22 = vcombine.low %v963_v15, %v967_v17 }
  0x46   : > { %1907 = vmatpush3.bf16.msra.mxu1 %v2054_v18  ;;  %1888 = vmatprep.subr.bf16.mxu0 %v2105_v1  ;;  %v835_v18 = vcombine.low %v345_v7, %v346_v8 }
  0x47   : > { %1908 = vmatprep.subr.bf16.mxu1 %v2105_v1 }
  0x48   : > { %v839_v50 = vpack.c.bf16 %v836_v19, %v835_v18 }
  0x49   : > { %1889 = vmatpush3.bf16.msra.mxu0 %v2055_v21  ;;  %v968_v21 = vcombine.low %v955_v12, %v959_v14 }
  0x4a   : > { %1909 = vmatpush3.bf16.msra.mxu1 %v2056_v28  ;;  %1914 = vmatprep.subr.bf16.mxu0 %v2105_v1  ;;  %v2073_v28 = vld [vmem:[%s2619_s4 + $0x1b8] sm:$0xff]  }
  0x4b   : > { %1934 = vmatprep.subr.bf16.mxu1 %v2105_v1 }
  0x4c   : > { %1891 = vmatmul.mubr.bf16.vlgmr.msra.gmra.mxu0 %v605_v29  ;;  %v972_v29 = vpack.c.bf16 %v969_v22, %v968_v21 }
  0x4d   : > { %1915 = vmatpush3.bf16.msra.mxu0 %v2057_v32  ;;  %1911 = vmatmul.mubr.bf16.vlgmr.msra.gmra.mxu1 %v722_v33  ;;  %v2074_v32 = vld [vmem:[%s2619_s4 + $0x1f8] sm:$0xff]   ;;  %v2075_v33 = vld [vmem:[%s2619_s4 + $0x1b0] sm:$0xff]  }
  0x4e   : > { %1935 = vmatpush3.bf16.msra.mxu1 %v2058_v34  ;;  %1916 = vmatprep.subr.bf16.mxu0 %v2105_v1  ;;  %v2076_v34 = vld [vmem:[%s2619_s4 + $0x1f0] sm:$0xff]  }
  0x4f   : > { %1936 = vmatprep.subr.bf16.mxu1 %v2105_v1  ;;  %1930 = vmatprep.mubr.msk.bf16.mxu0 %vm2106_vm0, %v2105_v1 }
  0x50   : > { %1950 = vmatprep.mubr.msk.bf16.mxu1 %vm2106_vm0, %v2105_v1 }
  0x51   : > { %1917 = vmatpush3.bf16.msra.mxu0 %v2059_v35  ;;  %v2077_v35 = vld [vmem:[%s2619_s4 + $0x1a8] sm:$0xff]  }
  0x52   : > { %1937 = vmatpush3.bf16.msra.mxu1 %v2060_v36  ;;  %1918 = vmatprep.subr.bf16.mxu0 %v2105_v1  ;;  %v2078_v36 = vld [vmem:[%s2619_s4 + $0x1e8] sm:$0xff]  }
  0x53   : > { %1938 = vmatprep.subr.bf16.mxu1 %v2105_v1 }
  0x55   : > { %1919 = vmatpush3.bf16.msra.mxu0 %v2061_v37  ;;  %v2079_v37 = vld [vmem:[%s2619_s4 + $0x1a0] sm:$0xff]  }
  0x56   : > { %1939 = vmatpush3.bf16.msra.mxu1 %v2062_v39  ;;  %1920 = vmatprep.subr.bf16.mxu0 %v2105_v1  ;;  %v2081_v39 = vld [vmem:[%s2619_s4 + $0x198] sm:$0xff]  }
  0x57   : > { %1940 = vmatprep.subr.bf16.mxu1 %v2105_v1 }
  0x59   : > { %1921 = vmatpush3.bf16.msra.mxu0 %v2063_v46  ;;  %v2088_v46 = vld [vmem:[%s2619_s4 + $0x1c0] sm:$0xff]  }
  0x5a   : > { %1941 = vmatpush3.bf16.msra.mxu1 %v2064_v30  ;;  %1922 = vmatprep.subr.bf16.mxu0 %v2105_v1  ;;  %v2090_v30 = vld [vmem:[%s2619_s4 + $0x230] sm:$0xff]  }
  0x5b   : > { %1942 = vmatprep.subr.bf16.mxu1 %v2105_v1 }
  0x5d   : > { %1923 = vmatpush3.bf16.msra.mxu0 %v2065_v31 }
  0x5e   : > { %1943 = vmatpush3.bf16.msra.mxu1 %v2066_v55  ;;  %1924 = vmatprep.subr.bf16.mxu0 %v2105_v1 }
  0x5f   : > { %1944 = vmatprep.subr.bf16.mxu1 %v2105_v1 }
  0x61   : > { %1925 = vmatpush3.bf16.msra.mxu0 %v2067_v60 }
  0x62   : > { %1945 = vmatpush3.bf16.msra.mxu1 %v2068_v52  ;;  %1926 = vmatprep.subr.bf16.mxu0 %v2105_v1 }
  0x63   : > { %1946 = vmatprep.subr.bf16.mxu1 %v2105_v1 }
  0x65   : > { %1927 = vmatpush3.bf16.msra.mxu0 %v2069_v11 }
  0x66   : > { %1947 = vmatpush3.bf16.msra.mxu1 %v2070_v13  ;;  %1928 = vmatprep.subr.bf16.mxu0 %v2105_v1 }
  0x67   : > { %1948 = vmatprep.subr.bf16.mxu1 %v2105_v1 }
  0x69   : > { %1929 = vmatpush3.bf16.msra.mxu0 %v2071_v20 }
  0x6a   : > { %1949 = vmatpush3.bf16.msra.mxu1 %v2072_v26  ;;  %1954 = vmatprep.subr.bf16.mxu0 %v2105_v1 }
  0x6b   : > { %1974 = vmatprep.subr.bf16.mxu1 %v2105_v1 }
  0x6c   : > { %1931 = vmatmul.mubr.bf16.vlgmr.msra.gmra.mxu0 %v839_v50 }
  0x6d   : > { %1955 = vmatpush3.bf16.msra.mxu0 %v2073_v28  ;;  %1951 = vmatmul.mubr.bf16.vlgmr.msra.gmra.mxu1 %v972_v29 }
  0x6e   : > { %1975 = vmatpush3.bf16.msra.mxu1 %v2074_v32  ;;  %1956 = vmatprep.subr.bf16.mxu0 %v2105_v1 }
  0x6f   : > { %1976 = vmatprep.subr.bf16.mxu1 %v2105_v1  ;;  %1970 = vmatprep.mubr.msk.bf16.mxu0 %vm2106_vm0, %v2105_v1 }
  0x70   : > { %1990 = vmatprep.mubr.msk.bf16.mxu1 %vm2106_vm0, %v2105_v1 }
  0x71   : > { %1957 = vmatpush3.bf16.msra.mxu0 %v2075_v33 }
  0x72   : > { %1977 = vmatpush3.bf16.msra.mxu1 %v2076_v34  ;;  %1958 = vmatprep.subr.bf16.mxu0 %v2105_v1 }
  0x73   : > { %1978 = vmatprep.subr.bf16.mxu1 %v2105_v1 }
  0x75   : > { %1959 = vmatpush3.bf16.msra.mxu0 %v2077_v35 }
  0x76   : > { %1979 = vmatpush3.bf16.msra.mxu1 %v2078_v36  ;;  %1960 = vmatprep.subr.bf16.mxu0 %v2105_v1 }
  0x77   : > { %1980 = vmatprep.subr.bf16.mxu1 %v2105_v1 }
  0x79   : > { %1961 = vmatpush3.bf16.msra.mxu0 %v2079_v37  ;;  %v1749_v37 = vld [vmem:[%s2620_s5] ss:$0 sm:$0xff] }
  0x7a   : > { %1981 = vmatpush3.bf16.msra.mxu1 %v2080_v38  ;;  %1962 = vmatprep.subr.bf16.mxu0 %v2105_v1 }
  0x7b   : > { %1982 = vmatprep.subr.bf16.mxu1 %v2105_v1 }
  0x7d   : > { %1963 = vmatpush3.bf16.msra.mxu0 %v2081_v39 }
  0x7e   : > { %1983 = vmatpush3.bf16.msra.mxu1 %v2082_v40  ;;  %1964 = vmatprep.subr.bf16.mxu0 %v2105_v1 }
  0x7f   : > { %1984 = vmatprep.subr.bf16.mxu1 %v2105_v1 }
  0x81   : > { %1965 = vmatpush3.bf16.msra.mxu0 %v2083_v41 }
  0x82   : > { %1985 = vmatpush3.bf16.msra.mxu1 %v2084_v42  ;;  %1966 = vmatprep.subr.bf16.mxu0 %v2105_v1 }
  0x83   : > { %1986 = vmatprep.subr.bf16.mxu1 %v2105_v1 }
  0x85   : > { %1967 = vmatpush3.bf16.msra.mxu0 %v2085_v43 }
  0x86   : > { %1987 = vmatpush3.bf16.msra.mxu1 %v2086_v44  ;;  %1968 = vmatprep.subr.bf16.mxu0 %v2105_v1 }
  0x87   : > { %1988 = vmatprep.subr.bf16.mxu1 %v2105_v1 }
  0x89   : > { %1969 = vmatpush3.bf16.msra.mxu0 %v2087_v45 }
  0x8a   : > { %1989 = vmatpush3.bf16.msra.mxu1 %v2088_v46  ;;  %1994 = vmatprep.subr.bf16.mxu0 %v2105_v1 }
  0x8c   : > { %1971 = vmatmul.mubr.bf16.vlgmr.msra.gmra.mxu0 %v2421_v47  ;;  %v2093_v47 = vld [vmem:[%s2619_s4 + $0x218] sm:$0xff]  }
  0x8d   : > { %1995 = vmatpush3.bf16.msra.mxu0 %v2089_v49  ;;  %1991 = vmatmul.mubr.bf16.vlgmr.msra.gmra.mxu1 %v1200_v51  ;;  %v2095_v51 = vld [vmem:[%s2619_s4 + $0x208] sm:$0xff]  }
  0x8e   : > { %1996 = vmatprep.subr.bf16.mxu0 %v2105_v1  ;;  %2010 = vmatprep.mubr.msk.bf16.mxu0 %vm2106_vm0, %v2105_v1 }
  0x91   : > { %1997 = vmatpush3.bf16.msra.mxu0 %v2090_v30 }
  0x92   : > { %1998 = vmatprep.subr.bf16.mxu0 %v2105_v1 }
  0x95   : > { %1999 = vmatpush3.bf16.msra.mxu0 %v2091_v24 }
  0x96   : > { %2000 = vmatprep.subr.bf16.mxu0 %v2105_v1 }
  0x99   : > { %2001 = vmatpush3.bf16.msra.mxu0 %v2092_v23 }
  0x9a   : > { %2002 = vmatprep.subr.bf16.mxu0 %v2105_v1 }
  0x9d   : > { %2003 = vmatpush3.bf16.msra.mxu0 %v2093_v47 }
  0x9e   : > { %2004 = vmatprep.subr.bf16.mxu0 %v2105_v1 }
  0xa1   : > { %2005 = vmatpush3.bf16.msra.mxu0 %v2094_v48 }
  0xa2   : > { %2006 = vmatprep.subr.bf16.mxu0 %v2105_v1 }
  0xa5   : > { %2007 = vmatpush3.bf16.msra.mxu0 %v2095_v51 }
  0xa6   : > { %2008 = vmatprep.subr.bf16.mxu0 %v2105_v1 }
  0xa9   : > { %2009 = vmatpush3.bf16.msra.mxu0 %v2096_v16 }
  0xac   : > { %2011 = vmatmul.mubr.bf16.vlgmr.msra.gmra.mxu0 %v2459_v58 }
  0xec   : > { %v482_v25 = vpop.f32.mrf.mxu0 }
  0xed   : > { %v571_v27 = vpop.f32.mrf.mxu1 }
  0xee   : > { %v572_v31 = vadd.f32 %v571_v27, %v482_v25  ;;  %v1852_v55 = vpop.f32.mrf.mxu0 }
  0xef   : > { %v1872_v56 = vpop.f32.mrf.mxu1 }
  0xf0   : > { %v485_v57 = vpop.f32.mrf.mxu0 }
  0xf1   : > { %v574_v59 = vpop.f32.mrf.mxu1 }
  0xf2   : > { %v575_v60 = vadd.f32 %v574_v59, %v485_v57  ;;  %v1853_v61 = vpop.f32.mrf.mxu0 }
  0xf3   : > { %v1873_v62 = vpop.f32.mrf.mxu1 }
 0x10c   : > { %v705_v63 = vpop.f32.mrf.mxu0 }
 0x10d   : > { %v712_v0 = vadd.f32 %v705_v63, %v572_v31  ;;  %v822_v2 = vpop.f32.mrf.mxu1 }
 0x10e   : > { %v1892_v3 = vpop.f32.mrf.mxu0 }
 0x10f   : > { %v829_v4 = vadd.f32 %v822_v2, %v712_v0  ;;  %v1912_v52 = vpop.f32.mrf.mxu1 }
 0x110   : > { %v708_v1 = vpop.f32.mrf.mxu0 }
 0x111   : > { %v713_v53 = vadd.f32 %v708_v1, %v575_v60  ;;  %v825_v54 = vpop.f32.mrf.mxu1 }
 0x112   : > { %v1893_v58 = vpop.f32.mrf.mxu0 }
 0x113   : > { %v830_v5 = vadd.f32 %v825_v54, %v713_v53  ;;  %v1913_v6 = vpop.f32.mrf.mxu1 }
 0x12c   : > { %v939_v7 = vpop.f32.mrf.mxu0 }
 0x12d   : > { %v1072_v8 = vpop.f32.mrf.mxu1  ;;  %v946_v50 = vadd.f32 %v939_v7, %v829_v4 }
 0x12e   : > { %v1932_v9 = vpop.f32.mrf.mxu0 }
 0x12f   : > { %v1952_v10 = vpop.f32.mrf.mxu1  ;;  %v1079_v28 = vadd.f32 %v1072_v8, %v946_v50 }
 0x130   : > { %v942_v11 = vpop.f32.mrf.mxu0 }
 0x131   : > { %v1075_v12 = vpop.f32.mrf.mxu1  ;;  %v947_v29 = vadd.f32 %v942_v11, %v830_v5 }
 0x132   : > { %v1933_v13 = vpop.f32.mrf.mxu0 }
 0x133   : > { %v1953_v14 = vpop.f32.mrf.mxu1  ;;  %v1080_v33 = vadd.f32 %v1075_v12, %v947_v29 }
 0x14c   : > { %v1186_v15 = vpop.f32.mrf.mxu0 }
 0x14d   : > { %v1300_v17 = vpop.f32.mrf.mxu1  ;;  %v1193_v32 = vadd.f32 %v1186_v15, %v1079_v28 }
 0x14e   : > { %v1972_v18 = vpop.f32.mrf.mxu0 }
 0x14f   : > { %v1992_v19 = vpop.f32.mrf.mxu1  ;;  %v1307_v34 = vadd.f32 %v1300_v17, %v1193_v32 }
 0x150   : > { %v1189_v20 = vpop.f32.mrf.mxu0 }
 0x151   : > { %v1303_v21 = vpop.f32.mrf.mxu1  ;;  %v1194_v35 = vadd.f32 %v1189_v20, %v1080_v33 }
 0x152   : > { %v1973_v22 = vpop.f32.mrf.mxu0 }
 0x153   : > { %v1993_v26 = vpop.f32.mrf.mxu1  ;;  %v1308_v40 = vadd.f32 %v1303_v21, %v1194_v35 }
 0x16c   : > { %v1418_v36 = vpop.f32.mrf.mxu0 }
 0x16d   : > { %v1425_v38 = vadd.f32 %v1418_v36, %v1307_v34 }
 0x16e   : > { %v2012_v39 = vpop.f32.mrf.mxu0 }
 0x16f   : > { %v1434_v41 = vadd.f32 %v1749_v37, %v1425_v38 }
 0x170   : > { %v1421_v42 = vpop.f32.mrf.mxu0 }
 0x171   : > { %1436 = vst [vmem:[%s311_s15] sm:$0xff] %v1434_v41  ;;  %v1426_v43 = vadd.f32 %v1421_v42, %v1308_v40 }
 0x172   : > { %v2013_v44 = vpop.f32.mrf.mxu0 }
 0x173   : > { %v1435_v45 = vadd.f32 %v1749_v37, %v1426_v43 }
 0x175   : > { %1437 = vst [vmem:[%s311_s15 + $0x8] sm:$0xff] %v1435_v45 }
 0x176 PF: > { %s16_s21 = sadd.s32 1, %s2103_s21  }
 0x177   : > { %p13_p4 = scmp.ge.s32.totalorder %s16_s21, 4  }
 0x179   :  { %15 = sbr.rel (!%p13_p4) target bundleno = 1 (0x1), region = 91 }

</bundles_post_ra>
